<compile_context>
chip_gen: v5e
topology: v5e:2x2
jax: 0.10.0
libtpu: 0.0.40
codegen_flags: <defaults>
</compile_context>

<pallas_src>
import functools

import jax
import jax.numpy as jnp
from jax.experimental import pallas as pl
from jax.experimental.pallas import tpu as pltpu

BN_EPS = 1e-5


# ------------- conv3x3 (pad 1) [+ fused input BN*scale+shift & ReLU] + batch BN stats -------------
def _conv3x3_kernel(*refs, apply_input_act):
    if apply_input_act:
        x_ref, sc_ref, sh_ref, w_ref, y_ref, stat_ref, xp_ref = refs
    else:
        x_ref, w_ref, y_ref, stat_ref, xp_ref = refs
        sc_ref = sh_ref = None
    # x_ref:    (N, H, W, Cin)    f32 or bf16 input (whole batch, unpadded)
    # sc/sh:    (1, Cin)          f32 folded BN scale/shift of the PREVIOUS layer (fused apply)
    # w_ref:    (9, Cin, Cout)    bf16 weights, tap-major (ky, kx)
    # y_ref:    (N, H*W, Cout)    bf16 conv output (pre-BN)
    # stat_ref: (2, Cout)         f32 [mean, var] over the whole batch
    # xp_ref:   (N, H+2, W+2, Cin) f32 scratch (zero-padded, post-activation input)
    N, H, W, Cin = x_ref.shape
    Cout = w_ref.shape[-1]

    x = x_ref[...].astype(jnp.float32)
    if apply_input_act:
        # previous layer's BN + ReLU, fused here (saves one full HBM round trip)
        x = jnp.maximum(x * sc_ref[...] + sh_ref[...], 0.0)

    # Halo padding in VMEM. Whole batch runs in a single grid step, so this zero-fill
    # happens exactly once per layer (no per-step redundancy).
    xp_ref[...] = jnp.zeros(xp_ref.shape, xp_ref.dtype)
    xp_ref[:, pl.ds(1, H), pl.ds(1, W), :] = x
    xp = xp_ref[...]

    # 9 accumulated dots (no im2col concat / no (HW, 9*Cin) patch buffer).
    acc = jnp.zeros((N * H * W, Cout), jnp.float32)
    for ky in range(3):
        for kx in range(3):
            tap = xp[:, ky:ky + H, kx:kx + W, :].reshape(N * H * W, Cin).astype(jnp.bfloat16)
            acc = acc + jnp.dot(tap, w_ref[ky * 3 + kx], preferred_element_type=jnp.float32)

    # bf16 writeback of the pre-BN activation (halves HBM traffic of the dominant tensor).
    y_ref[...] = acc.reshape(N, H * W, Cout).astype(jnp.bfloat16)

    # Shifted two-pass batch statistics from the f32 accumulator (no cancellation).
    cnt = float(N * H * W)
    mean = jnp.sum(acc, axis=0, keepdims=True) / cnt                  # (1, Cout)
    var = jnp.sum((acc - mean) ** 2, axis=0, keepdims=True) / cnt     # (1, Cout)
    stat_ref[...] = jnp.concatenate([mean, var], axis=0)              # (2, Cout)


def conv3x3_with_stats(x_nhwc, w9_bf16, in_scale=None, in_shift=None):
    N, H, W, Cin = x_nhwc.shape
    Cout = w9_bf16.shape[-1]
    fuse = in_scale is not None

    kernel = functools.partial(_conv3x3_kernel, apply_input_act=fuse)
    in_specs = [pl.BlockSpec((N, H, W, Cin), lambda i: (0, 0, 0, 0))]
    args = [x_nhwc]
    if fuse:
        in_specs += [pl.BlockSpec((1, Cin), lambda i: (0, 0)),
                     pl.BlockSpec((1, Cin), lambda i: (0, 0))]
        args += [in_scale.reshape(1, Cin).astype(jnp.float32),
                 in_shift.reshape(1, Cin).astype(jnp.float32)]
    in_specs.append(pl.BlockSpec((9, Cin, Cout), lambda i: (0, 0, 0)))
    args.append(w9_bf16)

    # TODO(synk): at real VGG sizes use grid=(N, H//strip) with a 1-row halo via index_map
    # and set pltpu.CompilerParams(vmem_limit_bytes=...) per generation.
    return pl.pallas_call(
        kernel,
        out_shape=(jax.ShapeDtypeStruct((N, H * W, Cout), jnp.bfloat16),
                   jax.ShapeDtypeStruct((2, Cout), jnp.float32)),
        grid=(1,),
        in_specs=in_specs,
        out_specs=(pl.BlockSpec((N, H * W, Cout), lambda i: (0, 0, 0)),
                   pl.BlockSpec((2, Cout), lambda i: (0, 0))),
        scratch_shapes=[pltpu.VMEM((N, H + 2, W + 2, Cin), jnp.float32)],
        compiler_params=pltpu.CompilerParams(dimension_semantics=("arbitrary",)),
    )(*args)


# ------------- fused BN + ReLU + MaxPool 2x2 (conv followed by 'M') -------------
def _bn_relu_pool_kernel(y_ref, sc_ref, sh_ref, o_ref):
    # y_ref: (N, H, W/2, 2C) bf16 -- adjacent column pairs sit side by side in the lane dim
    # o_ref: (N, H/2, W/2, C) f32
    N, H, W2, C2 = y_ref.shape
    C = C2 // 2
    sc = sc_ref[...]
    sh = sh_ref[...]
    for n in range(N):                                   # small static batch, unrolled
        a = jnp.maximum(y_ref[n].astype(jnp.float32) * sc + sh, 0.0)   # (H, W/2, 2C)
        wmax = jnp.maximum(a[:, :, :C], a[:, :, C:])                   # W-direction pair max
        r = wmax.reshape(H // 2, 2, W2, C)                             # leading-dim split (safe)
        o_ref[n] = jnp.maximum(r[:, 0], r[:, 1])                       # H-direction pair max


def bn_relu_pool(y4_bf16, scale2_1c, shift2_1c, c_out):
    N, H, W2, C2 = y4_bf16.shape
    return pl.pallas_call(
        _bn_relu_pool_kernel,
        out_shape=jax.ShapeDtypeStruct((N, H // 2, W2, c_out), jnp.float32),
        grid=(1,),
        in_specs=[pl.BlockSpec((N, H, W2, C2), lambda i: (0, 0, 0, 0)),
                  pl.BlockSpec((1, C2), lambda i: (0, 0)),
                  pl.BlockSpec((1, C2), lambda i: (0, 0))],
        out_specs=pl.BlockSpec((N, H // 2, W2, c_out), lambda i: (0, 0, 0, 0)),
        compiler_params=pltpu.CompilerParams(dimension_semantics=("arbitrary",)),
    )(y4_bf16, scale2_1c, shift2_1c)


# ------------- standalone BN + ReLU (only for a trailing conv not followed by 'M') -------------
def _bn_relu_kernel(y_ref, sc_ref, sh_ref, o_ref):
    o_ref[...] = jnp.maximum(y_ref[...].astype(jnp.float32) * sc_ref[...] + sh_ref[...], 0.0)


def bn_relu(y_bf16, scale_1c, shift_1c):
    N, S, C = y_bf16.shape
    return pl.pallas_call(
        _bn_relu_kernel,
        out_shape=jax.ShapeDtypeStruct((N, S, C), jnp.float32),
        grid=(1,),
        in_specs=[pl.BlockSpec((N, S, C), lambda i: (0, 0, 0)),
                  pl.BlockSpec((1, C), lambda i: (0, 0)),
                  pl.BlockSpec((1, C), lambda i: (0, 0))],
        out_specs=pl.BlockSpec((N, S, C), lambda i: (0, 0, 0)),
        compiler_params=pltpu.CompilerParams(dimension_semantics=("arbitrary",)),
    )(y_bf16, scale_1c, shift_1c)


# ------------- standalone MaxPool 2x2 (only for an 'M' not preceded by a conv) -------------
def _maxpool2x2_kernel(x_ref, o_ref):
    N, H, W2, C2 = x_ref.shape
    C = C2 // 2
    for n in range(N):
        a = x_ref[n]
        wmax = jnp.maximum(a[:, :, :C], a[:, :, C:])
        r = wmax.reshape(H // 2, 2, W2, C)
        o_ref[n] = jnp.maximum(r[:, 0], r[:, 1])


def maxpool2x2(x_nhwc):
    N, H, W, C = x_nhwc.shape
    x4 = x_nhwc.reshape(N, H, W // 2, 2 * C)     # free row-major reinterpretation in HBM
    return pl.pallas_call(
        _maxpool2x2_kernel,
        out_shape=jax.ShapeDtypeStruct((N, H // 2, W // 2, C), x_nhwc.dtype),
        grid=(1,),
        in_specs=[pl.BlockSpec((N, H, W // 2, 2 * C), lambda i: (0, 0, 0, 0))],
        out_specs=pl.BlockSpec((N, H // 2, W // 2, C), lambda i: (0, 0, 0, 0)),
        compiler_params=pltpu.CompilerParams(dimension_semantics=("arbitrary",)),
    )(x4)


# ------------- Final Linear (K-tiled, bf16 operands, f32 acc, lane-dense 128-padded output) -------------
def _linear_kernel(x_ref, w_ref, b_ref, o_ref, acc_ref):
    k = pl.program_id(0)

    @pl.when(k == 0)
    def _():
        acc_ref[...] = jnp.zeros_like(acc_ref)

    acc_ref[...] += jnp.dot(x_ref[...], w_ref[...], preferred_element_type=jnp.float32)

    @pl.when(k == pl.num_programs(0) - 1)
    def _():
        o_ref[...] = acc_ref[...] + b_ref[...]


def linear(x_flat, w_pad, b_pad, tk=2048):
    # w_pad: (F, Kp) with Kp a multiple of 128 (lane-dense output store); rows already in
    # NHWC flatten order.  Remainder of F is zero-padded instead of disabling tiling.
    N, F = x_flat.shape
    Kp = w_pad.shape[1]
    tk = min(tk, F)
    rem = F % tk
    if rem:
        pad = tk - rem
        x_flat = jnp.pad(x_flat, ((0, 0), (0, pad)))
        w_pad = jnp.pad(w_pad, ((0, pad), (0, 0)))
        F += pad
    return pl.pallas_call(
        _linear_kernel,
        out_shape=jax.ShapeDtypeStruct((N, Kp), jnp.float32),
        grid=(F // tk,),
        in_specs=[pl.BlockSpec((N, tk), lambda k: (0, k)),
                  pl.BlockSpec((tk, Kp), lambda k: (k, 0)),
                  pl.BlockSpec((1, Kp), lambda k: (0, 0))],
        out_specs=pl.BlockSpec((N, Kp), lambda k: (0, 0)),
        scratch_shapes=[pltpu.VMEM((N, Kp), jnp.float32)],
        compiler_params=pltpu.CompilerParams(dimension_semantics=("arbitrary",)),
    )(x_flat.astype(jnp.bfloat16), w_pad.astype(jnp.bfloat16),
      b_pad.reshape(1, Kp).astype(jnp.float32))


# ------------- VGG forward (glue) -------------
def _fold_bn(stats, gamma, beta):
    mean, var = stats[0], stats[1]
    inv = jax.lax.rsqrt(var + BN_EPS)
    scale = gamma * inv
    shift = beta - mean * scale
    return scale, shift


def vgg_forward(x_nchw, params, architecture):
    x = jnp.transpose(x_nchw, (0, 2, 3, 1)).astype(jnp.float32)   # NCHW -> NHWC (already activated)
    N = x.shape[0]
    pending = None     # (y_bf16 (N,H*W,C), scale (C,), shift (C,), H, W, C) awaiting its BN+ReLU
    i, ci = 0, 0
    while i < len(architecture):
        a = architecture[i]
        if a == "M":
            if pending is not None:
                # fused BN + ReLU + pool over the previous conv's pre-BN output
                y, scale, shift, H, W, C = pending
                y4 = y.reshape(N, H, W // 2, 2 * C)        # free row-major reinterpretation
                x = bn_relu_pool(y4, jnp.tile(scale, 2)[None, :],
                                 jnp.tile(shift, 2)[None, :], C)
                pending = None
            else:
                x = maxpool2x2(x)
            i += 1
            continue

        # conv layer
        w, gamma, beta = params["convs"][ci]
        ci += 1
        Cout = w.shape[-1]
        if pending is not None:
            # conv -> conv: previous BN + ReLU fused into this conv's input stage
            y_prev, scale_p, shift_p, H, W, Cin = pending
            x_in = y_prev.reshape(N, H, W, Cin)            # free row-major reinterpretation
            w9 = w.reshape(9, Cin, Cout).astype(jnp.bfloat16)
            y, stats = conv3x3_with_stats(x_in, w9, in_scale=scale_p, in_shift=shift_p)
            pending = None
        else:
            _, H, W, Cin = x.shape
            w9 = w.reshape(9, Cin, Cout).astype(jnp.bfloat16)
            y, stats = conv3x3_with_stats(x, w9)
        scale, shift = _fold_bn(stats, gamma, beta)
        pending = (y, scale, shift, H, W, Cout)
        i += 1

    if pending is not None:        # architecture ends with a conv: apply its BN + ReLU now
        y, scale, shift, H, W, C = pending
        x = bn_relu(y, scale[None, :], shift[None, :]).reshape(N, H, W, C)

    feat_nhwc = x
    feat = jnp.transpose(feat_nhwc, (0, 3, 1, 2))          # NCHW feat (module return value)
    flat = feat_nhwc.reshape(N, -1)                        # NHWC flatten; fc_w rows were permuted
    logits_padded = linear(flat, params["fc_w_nhwc_p"], params["fc_b_p"])
    logits = logits_padded[:, :params["num_classes"]]
    return feat, logits


# ------------- pure-JAX reference (mirrors bf16 matmul operands & bf16 activation storage) -------------
def vgg_reference(x_nchw, params, architecture):
    x = jnp.transpose(x_nchw, (0, 2, 3, 1)).astype(jnp.float32)
    ci = 0
    for a in architecture:
        if a == "M":
            N, H, W, C = x.shape
            x = x.reshape(N, H // 2, 2, W // 2, 2, C).max(axis=(2, 4))
        else:
            w, gamma, beta = params["convs"][ci]
            ci += 1
            y = jax.lax.conv_general_dilated(
                x.astype(jnp.bfloat16), w.astype(jnp.bfloat16),
                window_strides=(1, 1), padding=((1, 1), (1, 1)),
                dimension_numbers=("NHWC", "HWIO", "NHWC"),
                preferred_element_type=jnp.float32)
            mean = y.mean(axis=(0, 1, 2))
            var = y.var(axis=(0, 1, 2))
            yq = y.astype(jnp.bfloat16).astype(jnp.float32)   # mirror bf16 intermediate storage
            x = jnp.maximum((yq - mean) * jax.lax.rsqrt(var + BN_EPS) * gamma + beta, 0.0)
    feat = jnp.transpose(x, (0, 3, 1, 2))
    flat = feat.reshape(feat.shape[0], -1)
    logits = jnp.dot(flat.astype(jnp.bfloat16), params["fc_w"].astype(jnp.bfloat16),
                     preferred_element_type=jnp.float32) + params["fc_b"]
    return feat, logits


# ------------- deterministic parameter init -------------
def init_params(key, architecture, in_channels, in_h, in_w, num_classes):
    convs = []
    c_in = in_channels
    for a in architecture:
        if a == "M":
            continue
        key, kw = jax.random.split(key)
        w = jax.random.normal(kw, (3, 3, c_in, a), jnp.float32) / jnp.sqrt(9.0 * c_in)   # HWIO
        gamma = jnp.ones((a,), jnp.float32)      # nn.BatchNorm2d default init
        beta = jnp.zeros((a,), jnp.float32)
        convs.append((w, gamma, beta))
        c_in = a

    factor = 2 ** architecture.count("M")
    assert in_h % factor == 0 and in_w % factor == 0
    out_h, out_w = in_h // factor, in_w // factor
    feat_dim = c_in * out_h * out_w

    key, kw, kb = jax.random.split(key, 3)
    fc_w = jax.random.normal(kw, (feat_dim, num_classes), jnp.float32) / jnp.sqrt(feat_dim)
    fc_b = jax.random.normal(kb, (num_classes,), jnp.float32) * 0.01

    # One-time static weight prep for the Pallas path:
    #  * rows permuted so an NHWC flatten matches PyTorch's NCHW flatten order
    #  * class dim zero-padded to a multiple of 128 (lane-dense output store in linear())
    perm = jnp.arange(feat_dim).reshape(c_in, out_h, out_w).transpose(1, 2, 0).reshape(-1)
    kp = ((num_classes + 127) // 128) * 128
    fc_w_nhwc_p = jnp.pad(fc_w[perm], ((0, 0), (0, kp - num_classes)))
    fc_b_p = jnp.pad(fc_b, (0, kp - num_classes))

    return {"convs": convs, "fc_w": fc_w, "fc_b": fc_b,
            "fc_w_nhwc_p": fc_w_nhwc_p, "fc_b_p": fc_b_p,
            "num_classes": num_classes}


if __name__ == "__main__":
    architecture = [8, 8, "M", 16, "M"]          # small VGG-style config (conv-conv-pool-conv-pool)
    batch, in_channels, in_h, in_w = 2, 4, 16, 16
    num_classes = 10

    key = jax.random.PRNGKey(0)
    key, kx = jax.random.split(key)
    x = jax.random.normal(kx, (batch, in_channels, in_h, in_w), jnp.float32)

    params = init_params(key, architecture, in_channels, in_h, in_w, num_classes)

    feat, logits = vgg_forward(x, params, architecture)
    jax.block_until_ready((feat, logits))

    feat_ref, logits_ref = vgg_reference(x, params, architecture)
    assert feat.shape == (batch, 16, in_h // 4, in_w // 4)
    assert logits.shape == (batch, num_classes)
    # bf16 matmul operands + bf16 stored intermediates in both paths -> 2e-2 tolerance.
    assert jnp.allclose(feat, feat_ref, atol=2e-2, rtol=2e-2), \
        float(jnp.max(jnp.abs(feat - feat_ref)))
    assert jnp.allclose(logits, logits_ref, atol=2e-2, rtol=2e-2), \
        float(jnp.max(jnp.abs(logits - logits_ref)))

    print("KERNEL_OK")
</pallas_src>

<mosaic_0001>
module attributes {stable_mosaic.version = 11 : i64} {
  func.func @_conv3x3_kernel(%arg0: i32, %arg1: memref<2x16x16x4xf32, #tpu.memory_space<vmem>>, %arg2: memref<9x4x8xbf16, #tpu.memory_space<vmem>>, %arg3: memref<2x256x8xbf16, #tpu.memory_space<vmem>>, %arg4: memref<2x8xf32, #tpu.memory_space<vmem>>, %arg5: memref<2x18x18x4xf32, #tpu.memory_space<vmem>>) attributes {dimension_semantics = [#tpu.dimension_semantics<arbitrary>], iteration_bounds = array<i64: 1>, scalar_prefetch = 0 : i64, scratch_operands = 1 : i64, tpu.core_type = #tpu.core_type<tc>, window_params = [{pipeline_mode = #tpu.pipeline_mode<synchronous>, transform_indices = @transform_0, window_bounds = array<i64: 2, 16, 16, 4>}, {pipeline_mode = #tpu.pipeline_mode<synchronous>, transform_indices = @transform_1, window_bounds = array<i64: 9, 4, 8>}, {pipeline_mode = #tpu.pipeline_mode<synchronous>, transform_indices = @transform_2, window_bounds = array<i64: 2, 256, 8>}, {pipeline_mode = #tpu.pipeline_mode<synchronous>, transform_indices = @transform_3, window_bounds = array<i64: 2, 8>}]} {
    %c0 = arith.constant 0 : index
    %c0_0 = arith.constant 0 : index
    %c0_1 = arith.constant 0 : index
    %c0_2 = arith.constant 0 : index
    %0 = vector.load %arg1[%c0, %c0_0, %c0_1, %c0_2] : memref<2x16x16x4xf32, #tpu.memory_space<vmem>>, vector<2x16x16x4xf32>
    %cst = arith.constant 0.000000e+00 : f32
    %1 = vector.broadcast %cst : f32 to vector<2x18x18x4xf32>
    %c0_3 = arith.constant 0 : index
    %c0_4 = arith.constant 0 : index
    %c0_5 = arith.constant 0 : index
    %c0_6 = arith.constant 0 : index
    %2 = vector.load %arg5[%c0_3, %c0_4, %c0_5, %c0_6] : memref<2x18x18x4xf32, #tpu.memory_space<vmem>>, vector<2x18x18x4xf32>
    tpu.vector_store %arg5[%c0_3, %c0_4, %c0_5, %c0_6], %1 {strides = array<i32>} : memref<2x18x18x4xf32, #tpu.memory_space<vmem>>, vector<2x18x18x4xf32>,
    %c0_7 = arith.constant 0 : index
    %c1 = arith.constant 1 : index
    %c1_8 = arith.constant 1 : index
    %c0_9 = arith.constant 0 : index
    %3 = vector.load %arg5[%c0_7, %c1, %c1_8, %c0_9] : memref<2x18x18x4xf32, #tpu.memory_space<vmem>>, vector<2x16x16x4xf32>
    tpu.vector_store %arg5[%c0_7, %c1, %c1_8, %c0_9], %0 {strides = array<i32>} : memref<2x18x18x4xf32, #tpu.memory_space<vmem>>, vector<2x16x16x4xf32>,
    %c0_10 = arith.constant 0 : index
    %c0_11 = arith.constant 0 : index
    %c0_12 = arith.constant 0 : index
    %c0_13 = arith.constant 0 : index
    %4 = vector.load %arg5[%c0_10, %c0_11, %c0_12, %c0_13] : memref<2x18x18x4xf32, #tpu.memory_space<vmem>>, vector<2x18x18x4xf32>
    %cst_14 = arith.constant 0.000000e+00 : f32
    %5 = vector.broadcast %cst_14 : f32 to vector<512x8xf32>
    %6 = vector.extract_strided_slice %4 {offsets = [0, 0, 0, 0], sizes = [2, 16, 16, 4], strides = [1, 1, 1, 1]} : vector<2x18x18x4xf32> to vector<2x16x16x4xf32>
    %7 = vector.shape_cast %6 : vector<2x16x16x4xf32> to vector<512x4xf32>
    %8 = arith.truncf %7 : vector<512x4xf32> to vector<512x4xbf16>
    %c0_15 = arith.constant 0 : index
    %c0_16 = arith.constant 0 : index
    %c0_17 = arith.constant 0 : index
    %9 = vector.load %arg2[%c0_15, %c0_16, %c0_17] : memref<9x4x8xbf16, #tpu.memory_space<vmem>>, vector<1x4x8xbf16>
    %10 = vector.shape_cast %9 : vector<1x4x8xbf16> to vector<4x8xbf16>
    %cst_18 = arith.constant dense<0.000000e+00> : vector<512x8xf32>
    %11 = tpu.matmul %8, %10, %cst_18 {dimension_numbers = #tpu.dot_dimension_numbers<[1], [0], [0], [1], [0, 0, 1, 1], [], []>} : vector<512x4xbf16>, vector<4x8xbf16>, vector<512x8xf32> -> vector<512x8xf32>
    %12 = arith.addf %5, %11 : vector<512x8xf32>
    %13 = vector.extract_strided_slice %4 {offsets = [0, 0, 1, 0], sizes = [2, 16, 16, 4], strides = [1, 1, 1, 1]} : vector<2x18x18x4xf32> to vector<2x16x16x4xf32>
    %14 = vector.shape_cast %13 : vector<2x16x16x4xf32> to vector<512x4xf32>
    %15 = arith.truncf %14 : vector<512x4xf32> to vector<512x4xbf16>
    %c1_19 = arith.constant 1 : index
    %c0_20 = arith.constant 0 : index
    %c0_21 = arith.constant 0 : index
    %16 = vector.load %arg2[%c1_19, %c0_20, %c0_21] : memref<9x4x8xbf16, #tpu.memory_space<vmem>>, vector<1x4x8xbf16>
    %17 = vector.shape_cast %16 : vector<1x4x8xbf16> to vector<4x8xbf16>
    %cst_22 = arith.constant dense<0.000000e+00> : vector<512x8xf32>
    %18 = tpu.matmul %15, %17, %cst_22 {dimension_numbers = #tpu.dot_dimension_numbers<[1], [0], [0], [1], [0, 0, 1, 1], [], []>} : vector<512x4xbf16>, vector<4x8xbf16>, vector<512x8xf32> -> vector<512x8xf32>
    %19 = arith.addf %12, %18 : vector<512x8xf32>
    %20 = vector.extract_strided_slice %4 {offsets = [0, 0, 2, 0], sizes = [2, 16, 16, 4], strides = [1, 1, 1, 1]} : vector<2x18x18x4xf32> to vector<2x16x16x4xf32>
    %21 = vector.shape_cast %20 : vector<2x16x16x4xf32> to vector<512x4xf32>
    %22 = arith.truncf %21 : vector<512x4xf32> to vector<512x4xbf16>
    %c2 = arith.constant 2 : index
    %c0_23 = arith.constant 0 : index
    %c0_24 = arith.constant 0 : index
    %23 = vector.load %arg2[%c2, %c0_23, %c0_24] : memref<9x4x8xbf16, #tpu.memory_space<vmem>>, vector<1x4x8xbf16>
    %24 = vector.shape_cast %23 : vector<1x4x8xbf16> to vector<4x8xbf16>
    %cst_25 = arith.constant dense<0.000000e+00> : vector<512x8xf32>
    %25 = tpu.matmul %22, %24, %cst_25 {dimension_numbers = #tpu.dot_dimension_numbers<[1], [0], [0], [1], [0, 0, 1, 1], [], []>} : vector<512x4xbf16>, vector<4x8xbf16>, vector<512x8xf32> -> vector<512x8xf32>
    %26 = arith.addf %19, %25 : vector<512x8xf32>
    %27 = vector.extract_strided_slice %4 {offsets = [0, 1, 0, 0], sizes = [2, 16, 16, 4], strides = [1, 1, 1, 1]} : vector<2x18x18x4xf32> to vector<2x16x16x4xf32>
    %28 = vector.shape_cast %27 : vector<2x16x16x4xf32> to vector<512x4xf32>
    %29 = arith.truncf %28 : vector<512x4xf32> to vector<512x4xbf16>
    %c3 = arith.constant 3 : index
    %c0_26 = arith.constant 0 : index
    %c0_27 = arith.constant 0 : index
    %30 = vector.load %arg2[%c3, %c0_26, %c0_27] : memref<9x4x8xbf16, #tpu.memory_space<vmem>>, vector<1x4x8xbf16>
    %31 = vector.shape_cast %30 : vector<1x4x8xbf16> to vector<4x8xbf16>
    %cst_28 = arith.constant dense<0.000000e+00> : vector<512x8xf32>
    %32 = tpu.matmul %29, %31, %cst_28 {dimension_numbers = #tpu.dot_dimension_numbers<[1], [0], [0], [1], [0, 0, 1, 1], [], []>} : vector<512x4xbf16>, vector<4x8xbf16>, vector<512x8xf32> -> vector<512x8xf32>
    %33 = arith.addf %26, %32 : vector<512x8xf32>
    %34 = vector.extract_strided_slice %4 {offsets = [0, 1, 1, 0], sizes = [2, 16, 16, 4], strides = [1, 1, 1, 1]} : vector<2x18x18x4xf32> to vector<2x16x16x4xf32>
    %35 = vector.shape_cast %34 : vector<2x16x16x4xf32> to vector<512x4xf32>
    %36 = arith.truncf %35 : vector<512x4xf32> to vector<512x4xbf16>
    %c4 = arith.constant 4 : index
    %c0_29 = arith.constant 0 : index
    %c0_30 = arith.constant 0 : index
    %37 = vector.load %arg2[%c4, %c0_29, %c0_30] : memref<9x4x8xbf16, #tpu.memory_space<vmem>>, vector<1x4x8xbf16>
    %38 = vector.shape_cast %37 : vector<1x4x8xbf16> to vector<4x8xbf16>
    %cst_31 = arith.constant dense<0.000000e+00> : vector<512x8xf32>
    %39 = tpu.matmul %36, %38, %cst_31 {dimension_numbers = #tpu.dot_dimension_numbers<[1], [0], [0], [1], [0, 0, 1, 1], [], []>} : vector<512x4xbf16>, vector<4x8xbf16>, vector<512x8xf32> -> vector<512x8xf32>
    %40 = arith.addf %33, %39 : vector<512x8xf32>
    %41 = vector.extract_strided_slice %4 {offsets = [0, 1, 2, 0], sizes = [2, 16, 16, 4], strides = [1, 1, 1, 1]} : vector<2x18x18x4xf32> to vector<2x16x16x4xf32>
    %42 = vector.shape_cast %41 : vector<2x16x16x4xf32> to vector<512x4xf32>
    %43 = arith.truncf %42 : vector<512x4xf32> to vector<512x4xbf16>
    %c5 = arith.constant 5 : index
    %c0_32 = arith.constant 0 : index
    %c0_33 = arith.constant 0 : index
    %44 = vector.load %arg2[%c5, %c0_32, %c0_33] : memref<9x4x8xbf16, #tpu.memory_space<vmem>>, vector<1x4x8xbf16>
    %45 = vector.shape_cast %44 : vector<1x4x8xbf16> to vector<4x8xbf16>
    %cst_34 = arith.constant dense<0.000000e+00> : vector<512x8xf32>
    %46 = tpu.matmul %43, %45, %cst_34 {dimension_numbers = #tpu.dot_dimension_numbers<[1], [0], [0], [1], [0, 0, 1, 1], [], []>} : vector<512x4xbf16>, vector<4x8xbf16>, vector<512x8xf32> -> vector<512x8xf32>
    %47 = arith.addf %40, %46 : vector<512x8xf32>
    %48 = vector.extract_strided_slice %4 {offsets = [0, 2, 0, 0], sizes = [2, 16, 16, 4], strides = [1, 1, 1, 1]} : vector<2x18x18x4xf32> to vector<2x16x16x4xf32>
    %49 = vector.shape_cast %48 : vector<2x16x16x4xf32> to vector<512x4xf32>
    %50 = arith.truncf %49 : vector<512x4xf32> to vector<512x4xbf16>
    %c6 = arith.constant 6 : index
    %c0_35 = arith.constant 0 : index
    %c0_36 = arith.constant 0 : index
    %51 = vector.load %arg2[%c6, %c0_35, %c0_36] : memref<9x4x8xbf16, #tpu.memory_space<vmem>>, vector<1x4x8xbf16>
    %52 = vector.shape_cast %51 : vector<1x4x8xbf16> to vector<4x8xbf16>
    %cst_37 = arith.constant dense<0.000000e+00> : vector<512x8xf32>
    %53 = tpu.matmul %50, %52, %cst_37 {dimension_numbers = #tpu.dot_dimension_numbers<[1], [0], [0], [1], [0, 0, 1, 1], [], []>} : vector<512x4xbf16>, vector<4x8xbf16>, vector<512x8xf32> -> vector<512x8xf32>
    %54 = arith.addf %47, %53 : vector<512x8xf32>
    %55 = vector.extract_strided_slice %4 {offsets = [0, 2, 1, 0], sizes = [2, 16, 16, 4], strides = [1, 1, 1, 1]} : vector<2x18x18x4xf32> to vector<2x16x16x4xf32>
    %56 = vector.shape_cast %55 : vector<2x16x16x4xf32> to vector<512x4xf32>
    %57 = arith.truncf %56 : vector<512x4xf32> to vector<512x4xbf16>
    %c7 = arith.constant 7 : index
    %c0_38 = arith.constant 0 : index
    %c0_39 = arith.constant 0 : index
    %58 = vector.load %arg2[%c7, %c0_38, %c0_39] : memref<9x4x8xbf16, #tpu.memory_space<vmem>>, vector<1x4x8xbf16>
    %59 = vector.shape_cast %58 : vector<1x4x8xbf16> to vector<4x8xbf16>
    %cst_40 = arith.constant dense<0.000000e+00> : vector<512x8xf32>
    %60 = tpu.matmul %57, %59, %cst_40 {dimension_numbers = #tpu.dot_dimension_numbers<[1], [0], [0], [1], [0, 0, 1, 1], [], []>} : vector<512x4xbf16>, vector<4x8xbf16>, vector<512x8xf32> -> vector<512x8xf32>
    %61 = arith.addf %54, %60 : vector<512x8xf32>
    %62 = vector.extract_strided_slice %4 {offsets = [0, 2, 2, 0], sizes = [2, 16, 16, 4], strides = [1, 1, 1, 1]} : vector<2x18x18x4xf32> to vector<2x16x16x4xf32>
    %63 = vector.shape_cast %62 : vector<2x16x16x4xf32> to vector<512x4xf32>
    %64 = arith.truncf %63 : vector<512x4xf32> to vector<512x4xbf16>
    %c8 = arith.constant 8 : index
    %c0_41 = arith.constant 0 : index
    %c0_42 = arith.constant 0 : index
    %65 = vector.load %arg2[%c8, %c0_41, %c0_42] : memref<9x4x8xbf16, #tpu.memory_space<vmem>>, vector<1x4x8xbf16>
    %66 = vector.shape_cast %65 : vector<1x4x8xbf16> to vector<4x8xbf16>
    %cst_43 = arith.constant dense<0.000000e+00> : vector<512x8xf32>
    %67 = tpu.matmul %64, %66, %cst_43 {dimension_numbers = #tpu.dot_dimension_numbers<[1], [0], [0], [1], [0, 0, 1, 1], [], []>} : vector<512x4xbf16>, vector<4x8xbf16>, vector<512x8xf32> -> vector<512x8xf32>
    %68 = arith.addf %61, %67 : vector<512x8xf32>
    %69 = vector.shape_cast %68 : vector<512x8xf32> to vector<2x256x8xf32>
    %70 = arith.truncf %69 : vector<2x256x8xf32> to vector<2x256x8xbf16>
    %c0_44 = arith.constant 0 : index
    %c0_45 = arith.constant 0 : index
    %c0_46 = arith.constant 0 : index
    %71 = vector.load %arg3[%c0_44, %c0_45, %c0_46] : memref<2x256x8xbf16, #tpu.memory_space<vmem>>, vector<2x256x8xbf16>
    tpu.vector_store %arg3[%c0_44, %c0_45, %c0_46], %70 {strides = array<i32>} : memref<2x256x8xbf16, #tpu.memory_space<vmem>>, vector<2x256x8xbf16>,
    %cst_47 = arith.constant dense<0.000000e+00> : vector<8xf32>
    %72 = vector.multi_reduction <add>, %68, %cst_47 [0] : vector<512x8xf32> to vector<8xf32>
    %73 = vector.shape_cast %72 : vector<8xf32> to vector<1x8xf32>
    %cst_48 = arith.constant 5.120000e+02 : f32
    %74 = vector.broadcast %cst_48 : f32 to vector<1x8xf32>
    %75 = arith.divf %73, %74 : vector<1x8xf32>
    %76 = vector.broadcast %75 : vector<1x8xf32> to vector<512x8xf32>
    %77 = arith.subf %68, %76 : vector<512x8xf32>
    %78 = arith.mulf %77, %77 : vector<512x8xf32>
    %cst_49 = arith.constant dense<0.000000e+00> : vector<8xf32>
    %79 = vector.multi_reduction <add>, %78, %cst_49 [0] : vector<512x8xf32> to vector<8xf32>
    %80 = vector.shape_cast %79 : vector<8xf32> to vector<1x8xf32>
    %cst_50 = arith.constant 5.120000e+02 : f32
    %81 = vector.broadcast %cst_50 : f32 to vector<1x8xf32>
    %82 = arith.divf %80, %81 : vector<1x8xf32>
    %83 = tpu.concatenate %75, %82 in 0 : vector<1x8xf32>, vector<1x8xf32> -> vector<2x8xf32>
    %c0_51 = arith.constant 0 : index
    %c0_52 = arith.constant 0 : index
    %84 = vector.load %arg4[%c0_51, %c0_52] : memref<2x8xf32, #tpu.memory_space<vmem>>, vector<2x8xf32>
    tpu.vector_store %arg4[%c0_51, %c0_52], %83 {strides = array<i32>} : memref<2x8xf32, #tpu.memory_space<vmem>>, vector<2x8xf32>,
    return
  }
  func.func @transform_0(%arg0: i32) -> (i32, i32, i32, i32) {
    %c0_i32 = arith.constant 0 : i32
    %c0_i32_0 = arith.constant 0 : i32
    %c0_i32_1 = arith.constant 0 : i32
    %c0_i32_2 = arith.constant 0 : i32
    %c0_i32_3 = arith.constant 0 : i32
    return %c0_i32, %c0_i32_0, %c0_i32_1, %c0_i32_2 : i32, i32, i32, i32
  }
  func.func @transform_1(%arg0: i32) -> (i32, i32, i32) {
    %c0_i32 = arith.constant 0 : i32
    %c0_i32_0 = arith.constant 0 : i32
    %c0_i32_1 = arith.constant 0 : i32
    %c0_i32_2 = arith.constant 0 : i32
    return %c0_i32, %c0_i32_0, %c0_i32_1 : i32, i32, i32
  }
  func.func @transform_2(%arg0: i32) -> (i32, i32, i32) {
    %c0_i32 = arith.constant 0 : i32
    %c0_i32_0 = arith.constant 0 : i32
    %c0_i32_1 = arith.constant 0 : i32
    %c0_i32_2 = arith.constant 0 : i32
    return %c0_i32, %c0_i32_0, %c0_i32_1 : i32, i32, i32
  }
  func.func @transform_3(%arg0: i32) -> (i32, i32) {
    %c0_i32 = arith.constant 0 : i32
    %c0_i32_0 = arith.constant 0 : i32
    %c0_i32_1 = arith.constant 0 : i32
    return %c0_i32, %c0_i32_0 : i32, i32
  }
}

</mosaic_0001>

<bundles_post_ra>
// kernel: tpu_custom_call.1
= control target key start
LH: loop header
LB: loop body
LE: loop exit
PB: predicated region body
PF: predicated region fallthrough
CT: control target
= control target key end

     0   :  { %vm846_vm0 = vcmask 1041408   ;;  %vm79_vm1 = vcmask 31744   ;;  %vm82_vm2 = vcmask 25600   ;;  %v4369_v2 = vmov 0.0   ;;  %s7214_s0 = inlined_call_operand.vmem [shape: f32[2,16,16,4], index: 0, kind: input, shape index: {}]   ;;  %s7215_s1 = inlined_call_operand.vmem [shape: bf16[9,4,8], index: 1, kind: input, shape index: {}]   ;;  %s7216_s2 = inlined_call_operand.vmem [shape: bf16[2,256,8], index: 2, kind: output, shape index: {0}]   ;;  %s7217_s3 = inlined_call_operand.hbm [shape: f32[2,8], index: 3, kind: output, shape index: {1}]  }
   0x1   :  { %v3979_v0 = vld [vmem:[%s7215_s1 + $0x2] sm:$0x3]  ;;  %135 = vst.msk [vmem:[#allocation2 + $0x1b0] sm:$0xff] %vm79_vm1, %v4369_v2 }
   0x2   :  { %v848_v1 = vsel %vm846_vm0, %v3979_v0, 0 }
   0x3   :  { %9 = vsyncpa [#allocation4], 0  ;;  %4276 = vmatpush.bf16.msra.mxu2 %v848_v1  ;;  %4275 = vmatpush.bf16.msra.mxu1 %v848_v1  ;;  %136 = vst.msk [vmem:[#allocation2 + $0x1b8] sm:$0xff] %vm79_vm1, %v4369_v2  ;;  %vm491_vm3 = vcmask 1046528   ;;  %v4044_v12 = vld [vmem:[%s7215_s1 + $0x4] sm:$0x3] }
   0x4   :  { %4277 = vmatpush.bf16.msra.mxu3 %v848_v1  ;;  %857 = vmatpush.bf16.msra.mxu0 %v848_v1  ;;  %137 = vst.msk [vmem:[#allocation2 + $0x1c0] sm:$0x3] %vm82_vm2, %v4369_v2  ;;  %v1643_v13 = vsel %vm846_vm0, %v4044_v12, 0  ;;  %v4077_v23 = vld [vmem:[%s7215_s1 + $0x6] sm:$0x3]  ;;  %v29_v29 = vld [vmem:[%s7214_s0 + $0x70] sm:$0xff] }
   0x5   :  { %80 = vst.msk [vmem:[#allocation2] sm:$0xff] %vm79_vm1, %v4369_v2  ;;  %v1889_v24 = vsel %vm846_vm0, %v4077_v23, 0  ;;  %v394_v25 = vld [vmem:[%s7215_s1] sm:$0x3]  ;;  %v4110_v26 = vld [vmem:[%s7215_s1 + $0x8] sm:$0x3] }
   0x6   :  { %81 = vst.msk [vmem:[#allocation2 + $0x8] sm:$0xff] %vm79_vm1, %v4369_v2  ;;  %v1116_v27 = vsel %vm846_vm0, %v394_v25, 0  ;;  %v2155_v28 = vsel %vm846_vm0, %v4110_v26, 0  ;;  %v30_v30 = vld [vmem:[%s7214_s0 + $0x78] sm:$0xff]  ;;  %v61_v31 = vld [vmem:[%s7214_s0 + $0x170] sm:$0xff]  ;;  %v47_v33 = vld [vmem:[%s7214_s0 + $0x100] sm:$0xff] }
   0x7   :  { %83 = vst.msk [vmem:[#allocation2 + $0x10] sm:$0x3] %vm82_vm2, %v4369_v2  ;;  %1652 = vmatpush.bf16.msrb.mxu2 %v1643_v13  ;;  %1125 = vmatpush.bf16.msrb.mxu1 %v1116_v27  ;;  %v62_v32 = vld [vmem:[%s7214_s0 + $0x178] sm:$0xff]  ;;  %v48_v34 = vld [vmem:[%s7214_s0 + $0x108] sm:$0xff]  ;;  %v31_v35 = vld [vmem:[%s7214_s0 + $0x80] sm:$0xff]  ;;  %vm1287_vm4 = vcmask 1045504  }
   0x8   :  { %84 = vst.msk [vmem:[#allocation2 + $0x18] sm:$0xff] %vm79_vm1, %v4369_v2  ;;  %v308_v3 = vld [vmem:[#allocation2 + $0x1b0] sm:$0xff]  ;;  %1898 = vmatpush.bf16.msrb.mxu3 %v1889_v24  ;;  %2164 = vmatpush.bf16.msrb.mxu0 %v2155_v28  ;;  %v32_v36 = vld [vmem:[%s7214_s0 + $0x88] sm:$0xff]  ;;  %v63_v37 = vld [vmem:[%s7214_s0 + $0x180] sm:$0xff]  ;;  %vm3486_vm5 = vcmask 60416   ;;  %vm3551_vm6 = vcmask 64512  }
   0x9   :  { %85 = vst.msk [vmem:[#allocation2 + $0x20] sm:$0xff] %vm79_vm1, %v4369_v2  ;;  %v572_v5 = vrot.slane %v308_v3, 1  ;;  %v64_v38 = vld [vmem:[%s7214_s0 + $0x188] sm:$0xff]  ;;  %v15_v40 = vld [vmem:[%s7214_s0] sm:$0xff]  ;;  %v49_v48 = vld [vmem:[%s7214_s0 + $0x110] sm:$0xff]  ;;  %s3968_s9 = sshll.u32 %s7217_s3, 4  ;;  %s3969_s9 = int_to_ptr.hbm [resolvable:$true] %s3968_s9 }
   0xa   :  { %v309_v4 = vld [vmem:[#allocation2 + $0x1b8] sm:$0xff]  ;;  %86 = vst.msk [vmem:[#allocation2 + $0x28] sm:$0x3] %vm82_vm2, %v4369_v2  ;;  %v16_v44 = vld [vmem:[%s7214_s0 + $0x8] sm:$0xff]  ;;  %v33_v58 = vld [vmem:[%s7214_s0 + $0x90] sm:$0xff]  ;;  %vm3955_vm8 = vcmask 1040384  }
   0xb   :  { %v310_v6 = vld [vmem:[#allocation2 + $0x1c0] sm:$0x3]  ;;  %v573_v7 = vrot.slane %v309_v4, 1  ;;  %87 = vst.msk [vmem:[#allocation2 + $0x30] sm:$0xff] %vm79_vm1, %v4369_v2  ;;  %v50_v52 = vld [vmem:[%s7214_s0 + $0x118] sm:$0xff]  ;;  %v52_v28 = vld [vmem:[%s7214_s0 + $0x128] sm:$0xff] }
   0xc   :  { %v575_v8 = vrot.slane %v310_v6, 1  ;;  %88 = vst.msk [vmem:[#allocation2 + $0x38] sm:$0xff] %vm79_vm1, %v4369_v2  ;;  %v4579_v14 = vld [vmem:[#allocation2] sm:$0xff]  ;;  %v34_v63 = vld [vmem:[%s7214_s0 + $0x98] sm:$0xff]  ;;  %vm3957_vm9 = vcmask 58368  }
   0xd   :  { %v574_v9 = vsel %vm491_vm3, %v572_v5, %v573_v7  ;;  %89 = vst.msk [vmem:[#allocation2 + $0x40] sm:$0x3] %vm82_vm2, %v4369_v2  ;;  %v4581_v15 = vld [vmem:[#allocation2 + $0x8] sm:$0xff]  ;;  %v492_v17 = vrot.slane %v4579_v14, 1  ;;  %v65_v5 = vld [vmem:[%s7214_s0 + $0x190] sm:$0xff]  ;;  %v18_v12 = vld [vmem:[%s7214_s0 + $0x18] sm:$0xff] }
   0xe   :  { %v576_v10 = vsel %vm491_vm3, %v573_v7, %v575_v8  ;;  %90 = vst.msk [vmem:[#allocation2 + $0x48] sm:$0xff] %vm79_vm1, %v4369_v2  ;;  %v4583_v16 = vld [vmem:[#allocation2 + $0x10] sm:$0x3]  ;;  %v493_v18 = vrot.slane %v4581_v15, 1  ;;  %v66_v8 = vld [vmem:[%s7214_s0 + $0x198] sm:$0xff]  ;;  %v51_v24 = vld [vmem:[%s7214_s0 + $0x120] sm:$0xff] }
   0xf   :  { %v732_v11 = vpack.c.bf16 %v576_v10, %v574_v9  ;;  %91 = vst.msk [vmem:[#allocation2 + $0x50] sm:$0xff] %vm79_vm1, %v4369_v2  ;;  %v495_v19 = vrot.slane %v4583_v16, 1 }
  0x10   :  { %92 = vst.msk [vmem:[#allocation2 + $0x58] sm:$0x3] %vm82_vm2, %v4369_v2  ;;  %v494_v20 = vsel %vm491_vm3, %v492_v17, %v493_v18 }
  0x11   :  { %3996 = vmatmul.msk.bf16.vlgmr.msra.gmra.mxu2 %vm79_vm1, %v732_v11  ;;  %93 = vst.msk [vmem:[#allocation2 + $0x60] sm:$0xff] %vm79_vm1, %v4369_v2  ;;  %v496_v21 = vsel %vm491_vm3, %v493_v18, %v495_v19  ;;  %v17_v11 = vld [vmem:[%s7214_s0 + $0x10] sm:$0xff] }
  0x12   :  { %94 = vst.msk [vmem:[#allocation2 + $0x68] sm:$0xff] %vm79_vm1, %v4369_v2  ;;  %v716_v22 = vpack.c.bf16 %v496_v21, %v494_v20 }
  0x13   :  { %95 = vst.msk [vmem:[#allocation2 + $0x70] sm:$0x3] %vm82_vm2, %v4369_v2 }
  0x14   :  { %96 = vst.msk [vmem:[#allocation2 + $0x78] sm:$0xff] %vm79_vm1, %v4369_v2  ;;  %3980 = vmatmul.msk.bf16.vlgmr.msra.gmra.mxu0 %vm79_vm1, %v716_v22 }
  0x15   :  { %97 = vst.msk [vmem:[#allocation2 + $0x80] sm:$0xff] %vm79_vm1, %v4369_v2 }
  0x16   :  { %98 = vst.msk [vmem:[#allocation2 + $0x88] sm:$0x3] %vm82_vm2, %v4369_v2 }
  0x17   :  { %99 = vst.msk [vmem:[#allocation2 + $0x90] sm:$0xff] %vm79_vm1, %v4369_v2 }
  0x18   :  { %100 = vst.msk [vmem:[#allocation2 + $0x98] sm:$0xff] %vm79_vm1, %v4369_v2 }
  0x19   :  { %101 = vst.msk [vmem:[#allocation2 + $0xa0] sm:$0x3] %vm82_vm2, %v4369_v2 }
  0x1a   :  { %102 = vst.msk [vmem:[#allocation2 + $0xa8] sm:$0xff] %vm79_vm1, %v4369_v2 }
  0x1b   :  { %103 = vst.msk [vmem:[#allocation2 + $0xb0] sm:$0xff] %vm79_vm1, %v4369_v2 }
  0x1c   :  { %104 = vst.msk [vmem:[#allocation2 + $0xb8] sm:$0x3] %vm82_vm2, %v4369_v2 }
  0x1d   :  { %105 = vst.msk [vmem:[#allocation2 + $0xc0] sm:$0xff] %vm79_vm1, %v4369_v2 }
  0x1e   :  { %106 = vst.msk [vmem:[#allocation2 + $0xc8] sm:$0xff] %vm79_vm1, %v4369_v2 }
  0x1f   :  { %107 = vst.msk [vmem:[#allocation2 + $0xd0] sm:$0x3] %vm82_vm2, %v4369_v2 }
  0x20   :  { %108 = vst.msk [vmem:[#allocation2 + $0xd8] sm:$0xff] %vm79_vm1, %v4369_v2 }
  0x21   :  { %109 = vst.msk [vmem:[#allocation2 + $0xe0] sm:$0xff] %vm79_vm1, %v4369_v2 }
  0x22   :  { %110 = vst.msk [vmem:[#allocation2 + $0xe8] sm:$0x3] %vm82_vm2, %v4369_v2 }
  0x23   :  { %111 = vst.msk [vmem:[#allocation2 + $0xf0] sm:$0xff] %vm79_vm1, %v4369_v2 }
  0x24   :  { %112 = vst.msk [vmem:[#allocation2 + $0xf8] sm:$0xff] %vm79_vm1, %v4369_v2 }
  0x25   :  { %113 = vst.msk [vmem:[#allocation2 + $0x100] sm:$0x3] %vm82_vm2, %v4369_v2 }
  0x26   :  { %114 = vst.msk [vmem:[#allocation2 + $0x108] sm:$0xff] %vm79_vm1, %v4369_v2 }
  0x27   :  { %115 = vst.msk [vmem:[#allocation2 + $0x110] sm:$0xff] %vm79_vm1, %v4369_v2 }
  0x28   :  { %116 = vst.msk [vmem:[#allocation2 + $0x118] sm:$0x3] %vm82_vm2, %v4369_v2 }
  0x29   :  { %117 = vst.msk [vmem:[#allocation2 + $0x120] sm:$0xff] %vm79_vm1, %v4369_v2 }
  0x2a   :  { %118 = vst.msk [vmem:[#allocation2 + $0x128] sm:$0xff] %vm79_vm1, %v4369_v2 }
  0x2b   :  { %119 = vst.msk [vmem:[#allocation2 + $0x130] sm:$0x3] %vm82_vm2, %v4369_v2 }
  0x2c   :  { %120 = vst.msk [vmem:[#allocation2 + $0x138] sm:$0xff] %vm79_vm1, %v4369_v2 }
  0x2d   :  { %121 = vst.msk [vmem:[#allocation2 + $0x140] sm:$0xff] %vm79_vm1, %v4369_v2 }
  0x2e   :  { %122 = vst.msk [vmem:[#allocation2 + $0x148] sm:$0x3] %vm82_vm2, %v4369_v2 }
  0x2f   :  { %123 = vst.msk [vmem:[#allocation2 + $0x150] sm:$0xff] %vm79_vm1, %v4369_v2 }
  0x30   :  { %124 = vst.msk [vmem:[#allocation2 + $0x158] sm:$0xff] %vm79_vm1, %v4369_v2 }
  0x31   :  { %125 = vst.msk [vmem:[#allocation2 + $0x160] sm:$0x3] %vm82_vm2, %v4369_v2 }
  0x32   :  { %126 = vst.msk [vmem:[#allocation2 + $0x168] sm:$0xff] %vm79_vm1, %v4369_v2 }
  0x33   :  { %127 = vst.msk [vmem:[#allocation2 + $0x170] sm:$0xff] %vm79_vm1, %v4369_v2 }
  0x34   :  { %128 = vst.msk [vmem:[#allocation2 + $0x178] sm:$0x3] %vm82_vm2, %v4369_v2 }
  0x35   :  { %129 = vst.msk [vmem:[#allocation2 + $0x180] sm:$0xff] %vm79_vm1, %v4369_v2 }
  0x36   :  { %130 = vst.msk [vmem:[#allocation2 + $0x188] sm:$0xff] %vm79_vm1, %v4369_v2 }
  0x37   :  { %131 = vst.msk [vmem:[#allocation2 + $0x190] sm:$0x3] %vm82_vm2, %v4369_v2 }
  0x38   :  { %132 = vst.msk [vmem:[#allocation2 + $0x198] sm:$0xff] %vm79_vm1, %v4369_v2 }
  0x39   :  { %133 = vst.msk [vmem:[#allocation2 + $0x1a0] sm:$0xff] %vm79_vm1, %v4369_v2 }
  0x3a   :  { %134 = vst.msk [vmem:[#allocation2 + $0x1a8] sm:$0x3] %vm82_vm2, %v4369_v2 }
  0x3b   :  { %138 = vst.msk [vmem:[#allocation2 + $0x1c8] sm:$0xff] %vm79_vm1, %v4369_v2 }
  0x3c   :  { %139 = vst.msk [vmem:[#allocation2 + $0x1d0] sm:$0xff] %vm79_vm1, %v4369_v2 }
  0x3d   :  { %140 = vst.msk [vmem:[#allocation2 + $0x1d8] sm:$0x3] %vm82_vm2, %v4369_v2 }
  0x3e   :  { %141 = vst.msk [vmem:[#allocation2 + $0x1e0] sm:$0xff] %vm79_vm1, %v4369_v2 }
  0x3f   :  { %142 = vst.msk [vmem:[#allocation2 + $0x1e8] sm:$0xff] %vm79_vm1, %v4369_v2 }
  0x40   :  { %143 = vst.msk [vmem:[#allocation2 + $0x1f0] sm:$0x3] %vm82_vm2, %v4369_v2 }
  0x41   :  { %144 = vst.msk [vmem:[#allocation2 + $0x1f8] sm:$0xff] %vm79_vm1, %v4369_v2 }
  0x42   :  { %145 = vst.msk [vmem:[#allocation2 + $0x200] sm:$0xff] %vm79_vm1, %v4369_v2 }
  0x43   :  { %146 = vst.msk [vmem:[#allocation2 + $0x208] sm:$0x3] %vm82_vm2, %v4369_v2 }
  0x44   :  { %147 = vst.msk [vmem:[#allocation2 + $0x210] sm:$0xff] %vm79_vm1, %v4369_v2 }
  0x45   :  { %148 = vst.msk [vmem:[#allocation2 + $0x218] sm:$0xff] %vm79_vm1, %v4369_v2 }
  0x46   :  { %149 = vst.msk [vmem:[#allocation2 + $0x220] sm:$0x3] %vm82_vm2, %v4369_v2 }
  0x47   :  { %150 = vst.msk [vmem:[#allocation2 + $0x228] sm:$0xff] %vm79_vm1, %v4369_v2 }
  0x48   :  { %151 = vst.msk [vmem:[#allocation2 + $0x230] sm:$0xff] %vm79_vm1, %v4369_v2 }
  0x49   :  { %152 = vst.msk [vmem:[#allocation2 + $0x238] sm:$0x3] %vm82_vm2, %v4369_v2 }
  0x4a   :  { %153 = vst.msk [vmem:[#allocation2 + $0x240] sm:$0xff] %vm79_vm1, %v4369_v2 }
  0x4b   :  { %154 = vst.msk [vmem:[#allocation2 + $0x248] sm:$0xff] %vm79_vm1, %v4369_v2 }
  0x4c   :  { %155 = vst.msk [vmem:[#allocation2 + $0x250] sm:$0x3] %vm82_vm2, %v4369_v2 }
  0x4d   :  { %156 = vst.msk [vmem:[#allocation2 + $0x258] sm:$0xff] %vm79_vm1, %v4369_v2 }
  0x4e   :  { %157 = vst.msk [vmem:[#allocation2 + $0x260] sm:$0xff] %vm79_vm1, %v4369_v2 }
  0x4f   :  { %158 = vst.msk [vmem:[#allocation2 + $0x268] sm:$0x3] %vm82_vm2, %v4369_v2 }
  0x50   :  { %159 = vst.msk [vmem:[#allocation2 + $0x270] sm:$0xff] %vm79_vm1, %v4369_v2 }
  0x51   :  { %160 = vst.msk [vmem:[#allocation2 + $0x278] sm:$0xff] %vm79_vm1, %v4369_v2 }
  0x52   :  { %161 = vst.msk [vmem:[#allocation2 + $0x280] sm:$0x3] %vm82_vm2, %v4369_v2 }
  0x53   :  { %162 = vst.msk [vmem:[#allocation2 + $0x288] sm:$0xff] %vm79_vm1, %v4369_v2 }
  0x54   :  { %163 = vst.msk [vmem:[#allocation2 + $0x290] sm:$0xff] %vm79_vm1, %v4369_v2 }
  0x55   :  { %164 = vst.msk [vmem:[#allocation2 + $0x298] sm:$0x3] %vm82_vm2, %v4369_v2 }
  0x56   :  { %165 = vst.msk [vmem:[#allocation2 + $0x2a0] sm:$0xff] %vm79_vm1, %v4369_v2 }
  0x57   :  { %166 = vst.msk [vmem:[#allocation2 + $0x2a8] sm:$0xff] %vm79_vm1, %v4369_v2 }
  0x58   :  { %167 = vst.msk [vmem:[#allocation2 + $0x2b0] sm:$0x3] %vm82_vm2, %v4369_v2 }
  0x59   :  { %168 = vst.msk [vmem:[#allocation2 + $0x2b8] sm:$0xff] %vm79_vm1, %v4369_v2 }
  0x5a   :  { %169 = vst.msk [vmem:[#allocation2 + $0x2c0] sm:$0xff] %vm79_vm1, %v4369_v2 }
  0x5b   :  { %170 = vst.msk [vmem:[#allocation2 + $0x2c8] sm:$0x3] %vm82_vm2, %v4369_v2 }
  0x5c   :  { %171 = vst.msk [vmem:[#allocation2 + $0x2d0] sm:$0xff] %vm79_vm1, %v4369_v2 }
  0x5d   :  { %172 = vst.msk [vmem:[#allocation2 + $0x2d8] sm:$0xff] %vm79_vm1, %v4369_v2 }
  0x5e   :  { %173 = vst.msk [vmem:[#allocation2 + $0x2e0] sm:$0x3] %vm82_vm2, %v4369_v2 }
  0x5f   :  { %174 = vst.msk [vmem:[#allocation2 + $0x2e8] sm:$0xff] %vm79_vm1, %v4369_v2 }
  0x60   :  { %175 = vst.msk [vmem:[#allocation2 + $0x2f0] sm:$0xff] %vm79_vm1, %v4369_v2 }
  0x61   :  { %176 = vst.msk [vmem:[#allocation2 + $0x2f8] sm:$0x3] %vm82_vm2, %v4369_v2 }
  0x62   :  { %177 = vst.msk [vmem:[#allocation2 + $0x300] sm:$0xff] %vm79_vm1, %v4369_v2 }
  0x63   :  { %178 = vst.msk [vmem:[#allocation2 + $0x308] sm:$0xff] %vm79_vm1, %v4369_v2 }
  0x64   :  { %179 = vst.msk [vmem:[#allocation2 + $0x310] sm:$0x3] %vm82_vm2, %v4369_v2 }
  0x65   :  { %180 = vst.msk [vmem:[#allocation2 + $0x318] sm:$0xff] %vm79_vm1, %v4369_v2 }
  0x66   :  { %181 = vst.msk [vmem:[#allocation2 + $0x320] sm:$0xff] %vm79_vm1, %v4369_v2 }
  0x67   :  { %182 = vst.msk [vmem:[#allocation2 + $0x328] sm:$0x3] %vm82_vm2, %v4369_v2 }
  0x68   :  { %183 = vst.msk [vmem:[#allocation2 + $0x330] sm:$0xff] %vm79_vm1, %v4369_v2 }
  0x69   :  { %184 = vst.msk [vmem:[#allocation2 + $0x338] sm:$0xff] %vm79_vm1, %v4369_v2 }
  0x6a   :  { %185 = vst.msk [vmem:[#allocation2 + $0x340] sm:$0x3] %vm82_vm2, %v4369_v2 }
  0x6b   :  { %186 = vst.msk [vmem:[#allocation2 + $0x348] sm:$0xff] %vm79_vm1, %v4369_v2 }
  0x6c   :  { %187 = vst.msk [vmem:[#allocation2 + $0x350] sm:$0xff] %vm79_vm1, %v4369_v2 }
  0x6d   :  { %188 = vst.msk [vmem:[#allocation2 + $0x358] sm:$0x3] %vm82_vm2, %v4369_v2 }
  0x6e   :  { %204 = vst.msk [vmem:[#allocation2 + $0xc1] sm:$0xff] %vm79_vm1, %v29_v29 }
  0x6f   :  { %205 = vst.msk [vmem:[#allocation2 + $0xc9] sm:$0xff] %vm79_vm1, %v30_v30 }
  0x70   :  { %236 = vst.msk [vmem:[#allocation2 + $0x271] sm:$0xff] %vm79_vm1, %v61_v31 }
  0x71   :  { %237 = vst.msk [vmem:[#allocation2 + $0x279] sm:$0xff] %vm79_vm1, %v62_v32 }
  0x72   :  { %222 = vst.msk [vmem:[#allocation2 + $0x1c9] sm:$0xff] %vm79_vm1, %v47_v33  ;;  %v35_v33 = vld [vmem:[%s7214_s0 + $0xa0] sm:$0xff] }
  0x73   :  { %223 = vst.msk [vmem:[#allocation2 + $0x1d1] sm:$0xff] %vm79_vm1, %v48_v34 }
  0x74   :  { %206 = vst.msk [vmem:[#allocation2 + $0xd9] sm:$0xff] %vm79_vm1, %v31_v35 }
  0x75   :  { %v278_v39 = vld [vmem:[#allocation2 + $0xc0] sm:$0xff]  ;;  %207 = vst.msk [vmem:[#allocation2 + $0xe1] sm:$0xff] %vm79_vm1, %v32_v36 }
  0x76   :  { %v279_v41 = vld [vmem:[#allocation2 + $0xc8] sm:$0xff]  ;;  %v280_v42 = vld [vmem:[#allocation2 + $0xd0] sm:$0x3]  ;;  %v532_v43 = vrot.slane %v278_v39, 1  ;;  %238 = vst.msk [vmem:[#allocation2 + $0x289] sm:$0xff] %vm79_vm1, %v63_v37 }
  0x77   :  { %v533_v45 = vrot.slane %v279_v41, 1  ;;  %v535_v46 = vrot.slane %v280_v42, 1  ;;  %v332_v47 = vld [vmem:[#allocation2 + $0x270] sm:$0xff]  ;;  %239 = vst.msk [vmem:[#allocation2 + $0x291] sm:$0xff] %vm79_vm1, %v64_v38  ;;  %v36_v37 = vld [vmem:[%s7214_s0 + $0xa8] sm:$0xff]  ;;  %v67_v42 = vld [vmem:[%s7214_s0 + $0x1a0] sm:$0xff] }
  0x78   :  { %v333_v49 = vld [vmem:[#allocation2 + $0x278] sm:$0xff]  ;;  %v334_v50 = vld [vmem:[#allocation2 + $0x280] sm:$0x3]  ;;  %v612_v51 = vrot.slane %v332_v47, 1  ;;  %190 = vst.msk [vmem:[#allocation2 + $0x19] sm:$0xff] %vm79_vm1, %v15_v40 }
  0x79   :  { %v534_v53 = vsel %vm491_vm3, %v532_v43, %v533_v45  ;;  %v536_v54 = vsel %vm491_vm3, %v533_v45, %v535_v46  ;;  %v613_v55 = vrot.slane %v333_v49, 1  ;;  %v615_v56 = vrot.slane %v334_v50, 1  ;;  %v311_v57 = vld [vmem:[#allocation2 + $0x1c8] sm:$0xff]  ;;  %191 = vst.msk [vmem:[#allocation2 + $0x21] sm:$0xff] %vm79_vm1, %v16_v44  ;;  %v19_v50 = vld [vmem:[%s7214_s0 + $0x20] sm:$0xff] }
  0x7a   :  { %v4702_v59 = vpack.c.bf16 %v536_v54, %v534_v53  ;;  %v312_v60 = vld [vmem:[#allocation2 + $0x1d0] sm:$0xff]  ;;  %v313_v61 = vld [vmem:[#allocation2 + $0x1d8] sm:$0x3]  ;;  %v577_v62 = vrot.slane %v311_v57, 1  ;;  %224 = vst.msk [vmem:[#allocation2 + $0x1e1] sm:$0xff] %vm79_vm1, %v49_v48  ;;  %v68_v45 = vld [vmem:[%s7214_s0 + $0x1a8] sm:$0xff] }
  0x7b   :  { %v614_v0 = vsel %vm491_vm3, %v612_v51, %v613_v55  ;;  %v616_v1 = vsel %vm491_vm3, %v613_v55, %v615_v56  ;;  %v578_v2 = vrot.slane %v312_v60, 1  ;;  %v580_v3 = vrot.slane %v313_v61, 1  ;;  %v281_v4 = vld [vmem:[#allocation2 + $0xd8] sm:$0xff]  ;;  %225 = vst.msk [vmem:[#allocation2 + $0x1e9] sm:$0xff] %vm79_vm1, %v50_v52  ;;  %v20_v51 = vld [vmem:[%s7214_s0 + $0x28] sm:$0xff] }
  0x7c   :  { %7354 = vst [vmem:[#allocation6_spill] sm:$0xff] %v4702_v59  ;;  %3988 = vmatmul.msk.bf16.vlgmr.msra.gmra.mxu1 %vm79_vm1, %v4702_v59  ;;  %v4716_v6 = vpack.c.bf16 %v616_v1, %v614_v0  ;;  %v282_v7 = vld [vmem:[#allocation2 + $0xe0] sm:$0xff]  ;;  %v283_v17 = vld [vmem:[#allocation2 + $0xe8] sm:$0x3]  ;;  %v537_v18 = vrot.slane %v281_v4, 1 }
  0x7d   :  { %208 = vst.msk [vmem:[#allocation2 + $0xf1] sm:$0xff] %vm79_vm1, %v33_v58  ;;  %v579_v9 = vsel %vm491_vm3, %v577_v62, %v578_v2  ;;  %v581_v10 = vsel %vm491_vm3, %v578_v2, %v580_v3  ;;  %v335_v19 = vld [vmem:[#allocation2 + $0x288] sm:$0xff]  ;;  %v538_v21 = vrot.slane %v282_v7, 1  ;;  %v540_v29 = vrot.slane %v283_v17, 1 }
  0x7e   :  { %7355 = vst [vmem:[#allocation7_spill] sm:$0xff] %v4716_v6  ;;  %4004 = vmatmul.msk.bf16.vlgmr.msra.gmra.mxu3 %vm79_vm1, %v4716_v6  ;;  %v4733_v13 = vpack.c.bf16 %v581_v10, %v579_v9  ;;  %v336_v20 = vld [vmem:[#allocation2 + $0x290] sm:$0xff]  ;;  %v337_v22 = vld [vmem:[#allocation2 + $0x298] sm:$0x3]  ;;  %v617_v34 = vrot.slane %v335_v19, 1 }
  0x7f   :  { %209 = vst.msk [vmem:[#allocation2 + $0xf9] sm:$0xff] %vm79_vm1, %v34_v63  ;;  %v4736_v23 = vld [vmem:[#allocation2 + $0x18] sm:$0xff]  ;;  %v618_v38 = vrot.slane %v336_v20, 1  ;;  %v620_v39 = vrot.slane %v337_v22, 1  ;;  %v539_v43 = vsel %vm491_vm3, %v537_v18, %v538_v21  ;;  %v541_v46 = vsel %vm491_vm3, %v538_v21, %v540_v29  ;;  %v37_v21 = vld [vmem:[%s7214_s0 + $0xb0] sm:$0xff] }
  0x80   :  { %7356 = vst [vmem:[#allocation8_spill] sm:$0xff] %v4733_v13  ;;  %3997 = vmatmul.msk.bf16.gmra.mxu2 %vm79_vm1, %v4733_v13  ;;  %v4744_v25 = vld [vmem:[#allocation2 + $0x20] sm:$0xff]  ;;  %v4746_v26 = vld [vmem:[#allocation2 + $0x28] sm:$0x3]  ;;  %v497_v27 = vrot.slane %v4736_v23, 1  ;;  %v4790_v54 = vpack.c.bf16 %v541_v46, %v539_v43  ;;  %v38_v22 = vld [vmem:[%s7214_s0 + $0xb8] sm:$0xff] }
  0x81   :  { %240 = vst.msk [vmem:[#allocation2 + $0x2a1] sm:$0xff] %vm79_vm1, %v65_v5  ;;  %v498_v30 = vrot.slane %v4744_v25, 1  ;;  %v500_v31 = vrot.slane %v4746_v26, 1  ;;  %v314_v32 = vld [vmem:[#allocation2 + $0x1e0] sm:$0xff]  ;;  %v619_v52 = vsel %vm491_vm3, %v617_v34, %v618_v38  ;;  %v621_v53 = vsel %vm491_vm3, %v618_v38, %v620_v39  ;;  %v53_v5 = vld [vmem:[%s7214_s0 + $0x130] sm:$0xff] }
  0x82   :  { %241 = vst.msk [vmem:[#allocation2 + $0x2a9] sm:$0xff] %vm79_vm1, %v66_v8  ;;  %v315_v35 = vld [vmem:[#allocation2 + $0x1e8] sm:$0xff]  ;;  %v316_v36 = vld [vmem:[#allocation2 + $0x1f0] sm:$0x3]  ;;  %v582_v47 = vrot.slane %v314_v32, 1  ;;  %v4802_v61 = vpack.c.bf16 %v621_v53, %v619_v52 }
  0x83   :  { %192 = vst.msk [vmem:[#allocation2 + $0x31] sm:$0xff] %vm79_vm1, %v17_v11  ;;  %v499_v40 = vsel %vm491_vm3, %v497_v27, %v498_v30  ;;  %v501_v41 = vsel %vm491_vm3, %v498_v30, %v500_v31  ;;  %v583_v48 = vrot.slane %v315_v35, 1  ;;  %v585_v49 = vrot.slane %v316_v36, 1  ;;  %v54_v11 = vld [vmem:[%s7214_s0 + $0x138] sm:$0xff]  ;;  %v21_v34 = vld [vmem:[%s7214_s0 + $0x30] sm:$0xff] }
  0x84   :  { %193 = vst.msk [vmem:[#allocation2 + $0x39] sm:$0xff] %vm79_vm1, %v18_v12  ;;  %v4770_v44 = vpack.c.bf16 %v501_v41, %v499_v40  ;;  %v4811_v2 = vld [vmem:[#allocation2 + $0xf0] sm:$0xff]  ;;  %v70_v30 = vld [vmem:[%s7214_s0 + $0x1b8] sm:$0xff] }
  0x85   :  { %226 = vst.msk [vmem:[#allocation2 + $0x1f9] sm:$0xff] %vm79_vm1, %v51_v24  ;;  %v584_v58 = vsel %vm491_vm3, %v582_v47, %v583_v48  ;;  %v586_v60 = vsel %vm491_vm3, %v583_v48, %v585_v49  ;;  %v542_v7 = vrot.slane %v4811_v2, 1  ;;  %v69_v24 = vld [vmem:[%s7214_s0 + $0x1b0] sm:$0xff]  ;;  %v22_v36 = vld [vmem:[%s7214_s0 + $0x38] sm:$0xff] }
  0x86   :  { %227 = vst.msk [vmem:[#allocation2 + $0x201] sm:$0xff] %vm79_vm1, %v52_v28  ;;  %3981 = vmatmul.msk.bf16.gmra.mxu0 %vm79_vm1, %v4770_v44  ;;  %v4809_v1 = vpack.c.bf16 %v586_v60, %v584_v58  ;;  %v4813_v3 = vld [vmem:[#allocation2 + $0xf8] sm:$0xff]  ;;  %v4817_v4 = vld [vmem:[#allocation2 + $0x100] sm:$0x3] }
  0x87   :  { %210 = vst.msk [vmem:[#allocation2 + $0x109] sm:$0xff] %vm79_vm1, %v35_v33  ;;  %v543_v12 = vrot.slane %v4813_v3, 1  ;;  %v545_v20 = vrot.slane %v4817_v4, 1 }
  0x88   :  { %211 = vst.msk [vmem:[#allocation2 + $0x111] sm:$0xff] %vm79_vm1, %v36_v37  ;;  %v338_v8 = vld [vmem:[#allocation2 + $0x2a0] sm:$0xff] }
  0x89   :  { %242 = vst.msk [vmem:[#allocation2 + $0x2b9] sm:$0xff] %vm79_vm1, %v67_v42  ;;  %v339_v17 = vld [vmem:[#allocation2 + $0x2a8] sm:$0xff]  ;;  %v340_v18 = vld [vmem:[#allocation2 + $0x2b0] sm:$0x3]  ;;  %v622_v31 = vrot.slane %v338_v8, 1  ;;  %v544_v35 = vsel %vm491_vm3, %v542_v7, %v543_v12  ;;  %v546_v37 = vsel %vm491_vm3, %v543_v12, %v545_v20  ;;  %v71_v20 = vld [vmem:[%s7214_s0 + $0x1c0] sm:$0xff] }
  0x8a   :  { %243 = vst.msk [vmem:[#allocation2 + $0x2c1] sm:$0xff] %vm79_vm1, %v68_v45  ;;  %v4792_v55 = vld [vmem:[#allocation2 + $0x30] sm:$0xff]  ;;  %v623_v32 = vrot.slane %v339_v17, 1  ;;  %v625_v33 = vrot.slane %v340_v18, 1  ;;  %v4866_v43 = vpack.c.bf16 %v546_v37, %v544_v35  ;;  %v39_v18 = vld [vmem:[%s7214_s0 + $0xc0] sm:$0xff]  ;;  %v24_v35 = vld [vmem:[%s7214_s0 + $0x48] sm:$0xff] }
  0x8b   :  { %7357 = vst [vmem:[#allocation9_spill] sm:$0xff] %v4790_v54  ;;  %v4794_v56 = vld [vmem:[#allocation2 + $0x38] sm:$0xff]  ;;  %v4796_v57 = vld [vmem:[#allocation2 + $0x40] sm:$0x3]  ;;  %v502_v62 = vrot.slane %v4792_v55, 1 }
  0x8c   :  { %194 = vst.msk [vmem:[#allocation2 + $0x49] sm:$0xff] %vm79_vm1, %v19_v50  ;;  %v503_v63 = vrot.slane %v4794_v56, 1  ;;  %v505_v0 = vrot.slane %v4796_v57, 1  ;;  %3989 = vmatmul.msk.bf16.gmra.mxu1 %vm79_vm1, %v4790_v54  ;;  %v317_v19 = vld [vmem:[#allocation2 + $0x1f8] sm:$0xff]  ;;  %v624_v41 = vsel %vm491_vm3, %v622_v31, %v623_v32  ;;  %v626_v42 = vsel %vm491_vm3, %v623_v32, %v625_v33  ;;  %v23_v31 = vld [vmem:[%s7214_s0 + $0x40] sm:$0xff] }
  0x8d   :  { %195 = vst.msk [vmem:[#allocation2 + $0x51] sm:$0xff] %vm79_vm1, %v20_v51  ;;  %v318_v28 = vld [vmem:[#allocation2 + $0x200] sm:$0xff]  ;;  %v319_v29 = vld [vmem:[#allocation2 + $0x208] sm:$0x3]  ;;  %v587_v38 = vrot.slane %v317_v19, 1  ;;  %v4876_v50 = vpack.c.bf16 %v626_v42, %v624_v41 }
  0x8e   :  { %7358 = vst [vmem:[#allocation10_spill] sm:$0xff] %v4802_v61  ;;  %4005 = vmatmul.msk.bf16.gmra.mxu3 %vm79_vm1, %v4802_v61  ;;  %v504_v9 = vsel %vm491_vm3, %v502_v62, %v503_v63  ;;  %v506_v10 = vsel %vm491_vm3, %v503_v63, %v505_v0  ;;  %v588_v39 = vrot.slane %v318_v28, 1  ;;  %v590_v40 = vrot.slane %v319_v29, 1  ;;  %v4885_v60 = vld [vmem:[#allocation2 + $0x108] sm:$0xff] }
  0x8f   :  { %7359 = vst [vmem:[#allocation11_spill] sm:$0xff] %v4809_v1  ;;  %v4843_v27 = vpack.c.bf16 %v506_v10, %v504_v9  ;;  %v4887_v62 = vld [vmem:[#allocation2 + $0x110] sm:$0xff]  ;;  %v4891_v63 = vld [vmem:[#allocation2 + $0x118] sm:$0x3]  ;;  %v547_v12 = vrot.slane %v4885_v60, 1  ;;  %v40_v19 = vld [vmem:[%s7214_s0 + $0xc8] sm:$0xff] }
  0x90   :  { %228 = vst.msk [vmem:[#allocation2 + $0x211] sm:$0xff] %vm79_vm1, %v53_v5  ;;  %3998 = vmatmul.msk.bf16.gmra.mxu2 %vm79_vm1, %v4809_v1  ;;  %v589_v48 = vsel %vm491_vm3, %v587_v38, %v588_v39  ;;  %v591_v49 = vsel %vm491_vm3, %v588_v39, %v590_v40  ;;  %v341_v0 = vld [vmem:[#allocation2 + $0x2b8] sm:$0xff]  ;;  %v55_v5 = vld [vmem:[%s7214_s0 + $0x140] sm:$0xff]  ;;  %v548_v17 = vrot.slane %v4887_v62, 1 }
  0x91   :  { %229 = vst.msk [vmem:[#allocation2 + $0x219] sm:$0xff] %vm79_vm1, %v54_v11  ;;  %v4883_v58 = vpack.c.bf16 %v591_v49, %v589_v48  ;;  %v342_v7 = vld [vmem:[#allocation2 + $0x2c0] sm:$0xff]  ;;  %v343_v8 = vld [vmem:[#allocation2 + $0x2c8] sm:$0x3]  ;;  %v627_v32 = vrot.slane %v341_v0, 1 }
  0x92   :  { %7360 = vst [vmem:[#allocation12_spill] sm:$0xff] %v4843_v27  ;;  %v56_v11 = vld [vmem:[%s7214_s0 + $0x148] sm:$0xff]  ;;  %v628_v33 = vrot.slane %v342_v7, 1 }
  0x93   :  { %212 = vst.msk [vmem:[#allocation2 + $0x121] sm:$0xff] %vm79_vm1, %v37_v21  ;;  %v4868_v45 = vld [vmem:[#allocation2 + $0x48] sm:$0xff]  ;;  %v550_v21 = vrot.slane %v4891_v63, 1 }
  0x94   :  { %213 = vst.msk [vmem:[#allocation2 + $0x129] sm:$0xff] %vm79_vm1, %v38_v22  ;;  %v4870_v46 = vld [vmem:[#allocation2 + $0x50] sm:$0xff]  ;;  %v4872_v47 = vld [vmem:[#allocation2 + $0x58] sm:$0x3]  ;;  %v507_v51 = vrot.slane %v4868_v45, 1  ;;  %v629_v41 = vsel %vm491_vm3, %v627_v32, %v628_v33 }
  0x95   :  { %244 = vst.msk [vmem:[#allocation2 + $0x2d1] sm:$0xff] %vm79_vm1, %v69_v24  ;;  %v508_v52 = vrot.slane %v4870_v46, 1  ;;  %v510_v53 = vrot.slane %v4872_v47, 1  ;;  %v72_v24 = vld [vmem:[%s7214_s0 + $0x1c8] sm:$0xff]  ;;  %v551_v37 = vsel %vm491_vm3, %v548_v17, %v550_v21  ;;  %v41_v32 = vld [vmem:[%s7214_s0 + $0xd0] sm:$0xff] }
  0x96   :  { %245 = vst.msk [vmem:[#allocation2 + $0x2d9] sm:$0xff] %vm79_vm1, %v70_v30  ;;  %3982 = vmatmul.msk.bf16.gmra.mxu0 %vm79_vm1, %v4843_v27 }
  0x97   :  { %196 = vst.msk [vmem:[#allocation2 + $0x61] sm:$0xff] %vm79_vm1, %v21_v34  ;;  %v509_v9 = vsel %vm491_vm3, %v507_v51, %v508_v52  ;;  %v511_v10 = vsel %vm491_vm3, %v508_v52, %v510_v53  ;;  %v320_v22 = vld [vmem:[#allocation2 + $0x210] sm:$0xff]  ;;  %v630_v34 = vrot.slane %v343_v8, 1 }
  0x98   :  { %197 = vst.msk [vmem:[#allocation2 + $0x69] sm:$0xff] %vm79_vm1, %v22_v36  ;;  %v4921_v28 = vpack.c.bf16 %v511_v10, %v509_v9  ;;  %v321_v29 = vld [vmem:[#allocation2 + $0x218] sm:$0xff]  ;;  %v322_v30 = vld [vmem:[#allocation2 + $0x220] sm:$0x3]  ;;  %v549_v36 = vsel %vm491_vm3, %v547_v12, %v548_v17  ;;  %v592_v38 = vrot.slane %v320_v22, 1 }
  0x99   :  { %7361 = vst [vmem:[#allocation13_spill] sm:$0xff] %v4866_v43  ;;  %v593_v39 = vrot.slane %v321_v29, 1  ;;  %v595_v40 = vrot.slane %v322_v30, 1  ;;  %v631_v42 = vsel %vm491_vm3, %v628_v33, %v630_v34  ;;  %v4940_v48 = vpack.c.bf16 %v551_v37, %v549_v36  ;;  %v42_v33 = vld [vmem:[%s7214_s0 + $0xd8] sm:$0xff]  ;;  %v73_v34 = vld [vmem:[%s7214_s0 + $0x1d0] sm:$0xff] }
  0x9a   :  { %7362 = vst [vmem:[#allocation14_spill] sm:$0xff] %v4876_v50  ;;  %v74_v37 = vld [vmem:[%s7214_s0 + $0x1d8] sm:$0xff] }
  0x9b   :  { %7363 = vst [vmem:[#allocation15_spill] sm:$0xff] %v4883_v58  ;;  %v594_v53 = vsel %vm491_vm3, %v592_v38, %v593_v39  ;;  %v596_v0 = vsel %vm491_vm3, %v593_v39, %v595_v40  ;;  %v4961_v12 = vld [vmem:[#allocation2 + $0x128] sm:$0xff]  ;;  %v4965_v17 = vld [vmem:[#allocation2 + $0x130] sm:$0x3] }
  0x9c   :  { %3990 = vmatmul.msk.bf16.gmra.mxu1 %vm79_vm1, %v4866_v43  ;;  %230 = vst.msk [vmem:[#allocation2 + $0x229] sm:$0xff] %vm79_vm1, %v55_v5  ;;  %v4950_v5 = vpack.c.bf16 %v631_v42, %v629_v41  ;;  %v4957_v10 = vpack.c.bf16 %v596_v0, %v594_v53  ;;  %v25_v41 = vld [vmem:[%s7214_s0 + $0x50] sm:$0xff] }
  0x9d   :  { %231 = vst.msk [vmem:[#allocation2 + $0x231] sm:$0xff] %vm79_vm1, %v56_v11  ;;  %v4959_v11 = vld [vmem:[#allocation2 + $0x120] sm:$0xff]  ;;  %v345_v21 = vld [vmem:[#allocation2 + $0x2d8] sm:$0xff] }
  0x9e   :  { %4006 = vmatmul.msk.bf16.gmra.mxu3 %vm79_vm1, %v4876_v50  ;;  %214 = vst.msk [vmem:[#allocation2 + $0x139] sm:$0xff] %vm79_vm1, %v39_v18  ;;  %v4942_v49 = vld [vmem:[#allocation2 + $0x60] sm:$0xff]  ;;  %v57_v18 = vld [vmem:[%s7214_s0 + $0x150] sm:$0xff]  ;;  %v552_v30 = vrot.slane %v4959_v11, 1  ;;  %v633_v53 = vrot.slane %v345_v21, 1 }
  0x9f   :  { %7364 = vst [vmem:[#allocation16_spill] sm:$0xff] %v4921_v28  ;;  %v4944_v51 = vld [vmem:[#allocation2 + $0x68] sm:$0xff]  ;;  %v4946_v52 = vld [vmem:[#allocation2 + $0x70] sm:$0x3]  ;;  %v512_v7 = vrot.slane %v4942_v49, 1 }
  0xa0   :  { %3999 = vmatmul.msk.bf16.gmra.mxu2 %vm79_vm1, %v4883_v58  ;;  %215 = vst.msk [vmem:[#allocation2 + $0x141] sm:$0xff] %vm79_vm1, %v40_v19  ;;  %v513_v8 = vrot.slane %v4944_v51, 1  ;;  %v515_v9 = vrot.slane %v4946_v52, 1  ;;  %v58_v19 = vld [vmem:[%s7214_s0 + $0x158] sm:$0xff]  ;;  %v346_v22 = vld [vmem:[#allocation2 + $0x2e0] sm:$0x3] }
  0xa1   :  { %246 = vst.msk [vmem:[#allocation2 + $0x2e9] sm:$0xff] %vm79_vm1, %v71_v20  ;;  %v344_v20 = vld [vmem:[#allocation2 + $0x2d0] sm:$0xff]  ;;  %v635_v0 = vrot.slane %v346_v22, 1 }
  0xa2   :  { %247 = vst.msk [vmem:[#allocation2 + $0x2f1] sm:$0xff] %vm79_vm1, %v72_v24  ;;  %v514_v24 = vsel %vm491_vm3, %v512_v7, %v513_v8  ;;  %v516_v29 = vsel %vm491_vm3, %v513_v8, %v515_v9  ;;  %v632_v42 = vrot.slane %v344_v20, 1  ;;  %v26_v7 = vld [vmem:[%s7214_s0 + $0x58] sm:$0xff] }
  0xa3   :  { %198 = vst.msk [vmem:[#allocation2 + $0x79] sm:$0xff] %vm79_vm1, %v23_v31  ;;  %v553_v31 = vrot.slane %v4961_v12, 1  ;;  %v323_v36 = vld [vmem:[#allocation2 + $0x228] sm:$0xff]  ;;  %v4995_v38 = vpack.c.bf16 %v516_v29, %v514_v24  ;;  %v636_v21 = vsel %vm491_vm3, %v633_v53, %v635_v0 }
  0xa4   :  { %199 = vst.msk [vmem:[#allocation2 + $0x81] sm:$0xff] %vm79_vm1, %v24_v35  ;;  %v555_v35 = vrot.slane %v4965_v17, 1  ;;  %v324_v39 = vld [vmem:[#allocation2 + $0x230] sm:$0xff]  ;;  %v325_v40 = vld [vmem:[#allocation2 + $0x238] sm:$0x3]  ;;  %v634_v20 = vsel %vm491_vm3, %v632_v42, %v633_v53  ;;  %v59_v53 = vld [vmem:[%s7214_s0 + $0x160] sm:$0xff] }
  0xa5   :  { %7365 = vst [vmem:[#allocation17_spill] sm:$0xff] %v4950_v5  ;;  %v554_v8 = vsel %vm491_vm3, %v552_v30, %v553_v31  ;;  %v600_v24 = vrot.slane %v325_v40, 1  ;;  %v5033_v40 = vld [vmem:[#allocation2 + $0x138] sm:$0xff]  ;;  %v60_v0 = vld [vmem:[%s7214_s0 + $0x168] sm:$0xff] }
  0xa6   :  { %3983 = vmatmul.msk.bf16.gmra.mxu0 %vm79_vm1, %v4921_v28  ;;  %7366 = vst [vmem:[#allocation18_spill] sm:$0xff] %v4957_v10  ;;  %v556_v9 = vsel %vm491_vm3, %v553_v31, %v555_v35 }
  0xa7   :  { %232 = vst.msk [vmem:[#allocation2 + $0x241] sm:$0xff] %vm79_vm1, %v57_v18  ;;  %v597_v18 = vrot.slane %v323_v36, 1  ;;  %v5014_v22 = vpack.c.bf16 %v556_v9, %v554_v8  ;;  %v5039_v42 = vld [vmem:[#allocation2 + $0x148] sm:$0x3] }
  0xa8   :  { %233 = vst.msk [vmem:[#allocation2 + $0x249] sm:$0xff] %vm79_vm1, %v58_v19  ;;  %v598_v19 = vrot.slane %v324_v39, 1 }
  0xa9   :  { %216 = vst.msk [vmem:[#allocation2 + $0x151] sm:$0xff] %vm79_vm1, %v41_v32  ;;  %v348_v8 = vld [vmem:[#allocation2 + $0x2f0] sm:$0xff]  ;;  %v349_v9 = vld [vmem:[#allocation2 + $0x2f8] sm:$0x3] }
  0xaa   :  { %7367 = vst [vmem:[#allocation19_spill] sm:$0xff] %v4995_v38  ;;  %v5016_v29 = vld [vmem:[#allocation2 + $0x78] sm:$0xff]  ;;  %v599_v32 = vsel %vm491_vm3, %v597_v18, %v598_v19  ;;  %v638_v61 = vrot.slane %v348_v8, 1  ;;  %v640_v6 = vrot.slane %v349_v9, 1 }
  0xab   :  { %217 = vst.msk [vmem:[#allocation2 + $0x159] sm:$0xff] %vm79_vm1, %v42_v33  ;;  %v5018_v30 = vld [vmem:[#allocation2 + $0x80] sm:$0xff]  ;;  %v5020_v31 = vld [vmem:[#allocation2 + $0x88] sm:$0x3]  ;;  %v601_v33 = vsel %vm491_vm3, %v598_v19, %v600_v24  ;;  %v517_v35 = vrot.slane %v5016_v29, 1  ;;  %v557_v24 = vrot.slane %v5033_v40, 1 }
  0xac   :  { %3991 = vmatmul.msk.bf16.gmra.mxu1 %vm79_vm1, %v4940_v48  ;;  %248 = vst.msk [vmem:[#allocation2 + $0x301] sm:$0xff] %vm79_vm1, %v73_v34  ;;  %v5024_v34 = vpack.c.bf16 %v636_v21, %v634_v20  ;;  %v518_v36 = vrot.slane %v5018_v30, 1  ;;  %v5031_v39 = vpack.c.bf16 %v601_v33, %v599_v32  ;;  %v43_v21 = vld [vmem:[%s7214_s0 + $0xe0] sm:$0xff]  ;;  %v44_v32 = vld [vmem:[%s7214_s0 + $0xe8] sm:$0xff]  ;;  %v641_v8 = vsel %vm491_vm3, %v638_v61, %v640_v6 }
  0xad   :  { %249 = vst.msk [vmem:[#allocation2 + $0x309] sm:$0xff] %vm79_vm1, %v74_v37  ;;  %v520_v37 = vrot.slane %v5020_v31, 1  ;;  %v75_v33 = vld [vmem:[%s7214_s0 + $0x1e0] sm:$0xff] }
  0xae   :  { %4007 = vmatmul.msk.bf16.gmra.mxu3 %vm79_vm1, %v4950_v5  ;;  %200 = vst.msk [vmem:[#allocation2 + $0x91] sm:$0xff] %vm79_vm1, %v25_v41  ;;  %v5035_v41 = vld [vmem:[#allocation2 + $0x140] sm:$0xff]  ;;  %v519_v18 = vsel %vm491_vm3, %v517_v35, %v518_v36  ;;  %v560_v35 = vrot.slane %v5039_v42, 1 }
  0xaf   :  { %201 = vst.msk [vmem:[#allocation2 + $0x99] sm:$0xff] %vm79_vm1, %v26_v7  ;;  %v347_v7 = vld [vmem:[#allocation2 + $0x2e8] sm:$0xff]  ;;  %v521_v19 = vsel %vm491_vm3, %v518_v36, %v520_v37  ;;  %v558_v20 = vrot.slane %v5035_v41, 1  ;;  %v326_v36 = vld [vmem:[#allocation2 + $0x240] sm:$0xff] }
  0xb0   :  { %4000 = vmatmul.msk.bf16.gmra.mxu2 %vm79_vm1, %v4957_v10  ;;  %7368 = vst [vmem:[#allocation20_spill] sm:$0xff] %v5024_v34  ;;  %v76_v37 = vld [vmem:[%s7214_s0 + $0x1e8] sm:$0xff]  ;;  %v27_v5 = vld [vmem:[%s7214_s0 + $0x60] sm:$0xff]  ;;  %v637_v50 = vrot.slane %v347_v7, 1 }
  0xb1   :  { %7369 = vst [vmem:[#allocation21_spill] sm:$0xff] %v5031_v39 }
  0xb2   :  { %7370 = vst [vmem:[#allocation22_spill] sm:$0xff] %v5033_v40  ;;  %v639_v7 = vsel %vm491_vm3, %v637_v50, %v638_v61 }
  0xb3   :  { %7371 = vst [vmem:[#allocation23_spill] sm:$0xff] %v5035_v41 }
  0xb4   :  { %7372 = vst [vmem:[#allocation24_spill] sm:$0xff] %v5039_v42  ;;  %v1288_v42 = vrot.slane %v4579_v14, 2 }
  0xb5   :  { %234 = vst.msk [vmem:[#allocation2 + $0x259] sm:$0xff] %vm79_vm1, %v59_v53  ;;  %v5069_v53 = vpack.c.bf16 %v521_v19, %v519_v18  ;;  %v559_v18 = vsel %vm491_vm3, %v557_v24, %v558_v20  ;;  %v561_v19 = vsel %vm491_vm3, %v558_v20, %v560_v35  ;;  %v5090_v24 = vld [vmem:[#allocation2 + $0x90] sm:$0xff]  ;;  %v5098_v35 = vpack.c.bf16 %v641_v8, %v639_v7  ;;  %v351_v7 = vld [vmem:[#allocation2 + $0x308] sm:$0xff] }
  0xb6   :  { %3984 = vmatmul.msk.bf16.gmra.mxu0 %vm79_vm1, %v4995_v38  ;;  %235 = vst.msk [vmem:[#allocation2 + $0x261] sm:$0xff] %vm79_vm1, %v60_v0  ;;  %v327_v0 = vld [vmem:[#allocation2 + $0x248] sm:$0xff]  ;;  %v5088_v9 = vpack.c.bf16 %v561_v19, %v559_v18  ;;  %v5094_v20 = vld [vmem:[#allocation2 + $0xa0] sm:$0x3]  ;;  %v352_v8 = vld [vmem:[#allocation2 + $0x310] sm:$0x3] }
  0xb7   :  { %218 = vst.msk [vmem:[#allocation2 + $0x169] sm:$0xff] %vm79_vm1, %v43_v21  ;;  %v28_v21 = vld [vmem:[%s7214_s0 + $0x68] sm:$0xff]  ;;  %v525_v6 = vrot.slane %v5094_v20, 1  ;;  %v643_v13 = vrot.slane %v351_v7, 1 }
  0xb8   :  { %7373 = vst [vmem:[#allocation25_spill] sm:$0xff] %v5069_v53 }
  0xb9   :  { %219 = vst.msk [vmem:[#allocation2 + $0x171] sm:$0xff] %vm79_vm1, %v44_v32  ;;  %v602_v32 = vrot.slane %v326_v36, 1  ;;  %v522_v36 = vrot.slane %v5090_v24, 1 }
  0xba   :  { %250 = vst.msk [vmem:[#allocation2 + $0x319] sm:$0xff] %vm79_vm1, %v75_v33  ;;  %v5092_v33 = vld [vmem:[#allocation2 + $0x98] sm:$0xff] }
  0xbb   :  { %251 = vst.msk [vmem:[#allocation2 + $0x321] sm:$0xff] %vm79_vm1, %v76_v37  ;;  %v523_v50 = vrot.slane %v5092_v33, 1  ;;  %v5107_v37 = vld [vmem:[#allocation2 + $0x150] sm:$0xff] }
  0xbc   :  { %3992 = vmatmul.msk.bf16.gmra.mxu1 %vm79_vm1, %v5014_v22  ;;  %202 = vst.msk [vmem:[#allocation2 + $0xa9] sm:$0xff] %vm79_vm1, %v27_v5  ;;  %v562_v18 = vrot.slane %v5107_v37, 1 }
  0xbd   :  { %203 = vst.msk [vmem:[#allocation2 + $0xb1] sm:$0xff] %vm79_vm1, %v28_v21  ;;  %v526_v21 = vsel %vm491_vm3, %v523_v50, %v525_v6  ;;  %v330_v58 = vld [vmem:[#allocation2 + $0x260] sm:$0xff]  ;;  %v331_v1 = vld [vmem:[#allocation2 + $0x268] sm:$0x3] }
  0xbe   :  { %4008 = vmatmul.msk.bf16.gmra.mxu3 %vm79_vm1, %v5024_v34  ;;  %v328_v34 = vld [vmem:[#allocation2 + $0x250] sm:$0x3]  ;;  %7374 = vst [vmem:[#allocation26_spill] sm:$0xff] %v5088_v9 }
  0xbf   :  { %v605_v10 = vrot.slane %v328_v34, 1  ;;  %7375 = vst [vmem:[#allocation27_spill] sm:$0xff] %v5098_v35 }
  0xc0   :  { %4001 = vmatmul.msk.bf16.gmra.mxu2 %vm79_vm1, %v5031_v39  ;;  %v603_v39 = vrot.slane %v327_v0, 1  ;;  %7377 = vst [vmem:[#allocation29_spill] sm:$0xff] %v5107_v37  ;;  %v5109_v0 = vld [vmem:[#allocation2 + $0x158] sm:$0xff] }
  0xc1   :  { %7378 = vst [vmem:[#allocation30_spill] sm:$0xff] %v5109_v0  ;;  %v563_v19 = vrot.slane %v5109_v0, 1  ;;  %v610_v0 = vrot.slane %v331_v1, 1  ;;  %v4176_v1 = vld [vmem:[%s7215_s1 + $0xc] sm:$0x3] }
  0xc2   :  { %v604_v34 = vsel %vm491_vm3, %v602_v32, %v603_v39  ;;  %v606_v5 = vsel %vm491_vm3, %v603_v39, %v605_v10  ;;  %v5113_v10 = vld [vmem:[#allocation2 + $0x160] sm:$0x3]  ;;  %v524_v39 = vsel %vm491_vm3, %v522_v36, %v523_v50  ;;  %v645_v50 = vrot.slane %v352_v8, 1 }
  0xc3   :  { %v5105_v61 = vpack.c.bf16 %v606_v5, %v604_v34  ;;  %7379 = vst [vmem:[#allocation31_spill] sm:$0xff] %v5113_v10  ;;  %v350_v32 = vld [vmem:[#allocation2 + $0x300] sm:$0xff]  ;;  %v565_v34 = vrot.slane %v5113_v10, 1  ;;  %v5122_v5 = vpack.c.bf16 %v526_v21, %v524_v39  ;;  %v564_v6 = vsel %vm491_vm3, %v562_v18, %v563_v19  ;;  %v5132_v41 = vld [vmem:[#allocation2 + $0xa8] sm:$0xff] }
  0xc4   :  { %v642_v36 = vrot.slane %v350_v32, 1  ;;  %v646_v39 = vsel %vm491_vm3, %v643_v13, %v645_v50  ;;  %v5134_v32 = vld [vmem:[#allocation2 + $0xb0] sm:$0xff]  ;;  %v5136_v7 = vld [vmem:[#allocation2 + $0xb8] sm:$0x3] }
  0xc5   :  { %7376 = vst [vmem:[#allocation28_spill] sm:$0xff] %v5105_v61  ;;  %v530_v8 = vrot.slane %v5136_v7, 1 }
  0xc6   :  { %3985 = vmatmul.msk.bf16.gmra.mxu0 %vm79_vm1, %v5069_v53  ;;  %7380 = vst [vmem:[#allocation32_spill] sm:$0xff] %v5122_v5  ;;  %v644_v10 = vsel %vm491_vm3, %v642_v36, %v643_v13  ;;  %v2661_v13 = vsel %vm846_vm0, %v4176_v1, 0  ;;  %v355_v1 = vld [vmem:[#allocation2 + $0x328] sm:$0x3] }
  0xc7   :  { %2670 = vmatpush.bf16.msra.mxu2 %v2661_v13 }
  0xcc   :  { %3993 = vmatmul.msk.bf16.gmra.mxu1 %vm79_vm1, %v5088_v9  ;;  %v608_v9 = vrot.slane %v330_v58, 1 }
  0xce   :  { %4009 = vmatmul.msk.bf16.gmra.mxu3 %vm79_vm1, %v5098_v35  ;;  %v329_v35 = vld [vmem:[#allocation2 + $0x258] sm:$0xff]  ;;  %v611_v58 = vsel %vm491_vm3, %v608_v9, %v610_v0  ;;  %v5157_v0 = vld [vmem:[#allocation2 + $0x170] sm:$0xff] }
  0xcf   :  { %v607_v37 = vrot.slane %v329_v35, 1  ;;  %v5143_v35 = vpack.c.bf16 %v646_v39, %v644_v10  ;;  %7385 = vst [vmem:[#allocation37_spill] sm:$0xff] %v5157_v0  ;;  %v5159_v10 = vld [vmem:[#allocation2 + $0x178] sm:$0x3]  ;;  %v568_v13 = vrot.slane %v5157_v0, 1  ;;  %v1291_v0 = vrot.slane %v4583_v16, 2 }
  0xd0   :  { %4002 = vmatmul.msk.bf16.gmra.mxu2 %vm79_vm1, %v5105_v61  ;;  %v566_v61 = vsel %vm491_vm3, %v563_v19, %v565_v34  ;;  %v528_v19 = vrot.slane %v5134_v32, 1  ;;  %7386 = vst [vmem:[#allocation38_spill] sm:$0xff] %v5159_v10  ;;  %v4209_v34 = vld [vmem:[%s7215_s1 + $0xe] sm:$0x3] }
  0xd1   :  { %v5130_v21 = vpack.c.bf16 %v566_v61, %v564_v6  ;;  %v609_v18 = vsel %vm491_vm3, %v607_v37, %v608_v9  ;;  %7382 = vst [vmem:[#allocation34_spill] sm:$0xff] %v5143_v35  ;;  %v527_v61 = vrot.slane %v5132_v41, 1  ;;  %v5153_v9 = vld [vmem:[#allocation2 + $0x168] sm:$0xff]  ;;  %v2927_v6 = vsel %vm846_vm0, %v4209_v34, 0 }
  0xd2   :  { %v5151_v37 = vpack.c.bf16 %v611_v58, %v609_v18  ;;  %7384 = vst [vmem:[#allocation36_spill] sm:$0xff] %v5153_v9  ;;  %v531_v50 = vsel %vm491_vm3, %v528_v19, %v530_v8  ;;  %v567_v39 = vrot.slane %v5153_v9, 1  ;;  %v353_v18 = vld [vmem:[#allocation2 + $0x318] sm:$0xff]  ;;  %v354_v58 = vld [vmem:[#allocation2 + $0x320] sm:$0xff]  ;;  %2936 = vmatpush.bf16.msra.mxu3 %v2927_v6 }
  0xd3   :  { %7381 = vst [vmem:[#allocation33_spill] sm:$0xff] %v5130_v21  ;;  %v529_v36 = vsel %vm491_vm3, %v527_v61, %v528_v19  ;;  %v4143_v61 = vld [vmem:[%s7215_s1 + $0xa] sm:$0x3]  ;;  %v4242_v19 = vld [vmem:[%s7215_s1 + $0x10] sm:$0x3]  ;;  %v647_v9 = vrot.slane %v353_v18, 1 }
  0xd4   :  { %7383 = vst [vmem:[#allocation35_spill] sm:$0xff] %v5151_v37  ;;  %v5178_v8 = vpack.c.bf16 %v531_v50, %v529_v36  ;;  %v2415_v34 = vsel %vm846_vm0, %v4143_v61, 0  ;;  %v648_v6 = vrot.slane %v354_v58, 1  ;;  %v1289_v36 = vrot.slane %v4581_v15, 2 }
  0xd5   :  { %2424 = vmatpush.bf16.msra.mxu1 %v2415_v34 }
  0xd6   :  { %3986 = vmatmul.msk.bf16.gmra.mxu0 %vm79_vm1, %v5122_v5  ;;  %7387 = vst [vmem:[#allocation39_spill] sm:$0xff] %v5178_v8  ;;  %v649_v50 = vsel %vm491_vm3, %v647_v9, %v648_v6  ;;  %v1290_v16 = vsel %vm1287_vm4, %v1288_v42, %v1289_v36  ;;  %v5203_v9 = vpop.f32.mrf.mxu2  ;;  %v1294_v42 = vrot.slane %v4744_v25, 2 }
  0xd7   :  { %7390 = vst [vmem:[#allocation42_spill] sm:$0xff] %v5203_v9 }
  0xdc   :  { %3994 = vmatmul.msk.bf16.gmra.mxu1 %vm79_vm1, %v5130_v21  ;;  %v650_v21 = vrot.slane %v355_v1, 1  ;;  %v5201_v1 = vpop.f32.mrf.mxu0 }
  0xde   :  { %4010 = vmatmul.msk.bf16.gmra.mxu3 %vm79_vm1, %v5143_v35  ;;  %v570_v35 = vrot.slane %v5159_v10, 1  ;;  %v569_v10 = vsel %vm491_vm3, %v567_v39, %v568_v13  ;;  %v651_v18 = vsel %vm491_vm3, %v648_v6, %v650_v21  ;;  %v1296_v21 = vrot.slane %v4746_v26, 2  ;;  %v5217_v61 = vpop.f32.mrf.mxu2 }
  0xdf   :  { %v5195_v39 = vpack.c.bf16 %v651_v18, %v649_v50  ;;  %7391 = vst [vmem:[#allocation43_spill] sm:$0xff] %v5217_v61  ;;  %v363_v6 = vpack.c.bf16 %v4744_v25, %v4736_v23  ;;  %v1298_v50 = vrot.slane %v4792_v55, 2  ;;  %v1301_v25 = vrot.slane %v4796_v57, 2 }
  0xe0   :  { %4003 = vmatmul.msk.bf16.gmra.mxu2 %vm79_vm1, %v5151_v37  ;;  %v3187_v37 = vsel %vm846_vm0, %v4242_v19, 0  ;;  %v571_v40 = vsel %vm491_vm3, %v568_v13, %v570_v35  ;;  %v1297_v34 = vsel %vm1287_vm4, %v1294_v42, %v1296_v21 }
  0xe1   :  { %3196 = vmatpush.bf16.msra.mxu0 %v3187_v37  ;;  %v5191_v58 = vpack.c.bf16 %v571_v40, %v569_v10  ;;  %v1292_v37 = vsel %vm1287_vm4, %v1289_v36, %v1291_v0  ;;  %7389 = vst [vmem:[#allocation41_spill] sm:$0xff] %v5195_v39  ;;  %v1293_v40 = vrot.slane %v4736_v23, 2  ;;  %v362_v0 = vpack.c.bf16 %v4581_v15, %v4579_v14 }
  0xe2   :  { %v1512_v35 = vpack.c.bf16 %v1292_v37, %v1290_v16  ;;  %v1299_v23 = vrot.slane %v4794_v56, 2 }
  0xe3   :  { %7388 = vst [vmem:[#allocation40_spill] sm:$0xff] %v5191_v58  ;;  %v1295_v19 = vsel %vm1287_vm4, %v1293_v40, %v1294_v42  ;;  %v5250_v40 = vpack.c.bf16 %v4794_v56, %v4792_v55 }
  0xe4   :  { %v5213_v10 = vpop.f32.mrf.mxu0  ;;  %v5224_v26 = vpack.c.bf16 %v1297_v34, %v1295_v19  ;;  %v1300_v37 = vsel %vm1287_vm4, %v1298_v50, %v1299_v23  ;;  %v1303_v34 = vrot.slane %v4868_v45, 2  ;;  %v1306_v50 = vrot.slane %v4872_v47, 2 }
  0xe5   :  { %7396 = vst [vmem:[#allocation48_spill] sm:$0xff] %v5250_v40 }
  0xe6   :  { %3987 = vmatmul.msk.bf16.gmra.mxu0 %vm79_vm1, %v5178_v8  ;;  %7392 = vst [vmem:[#allocation44_spill] sm:$0xff] %v5224_v26 }
  0xec   :  { %3995 = vmatmul.msk.bf16.gmra.mxu1 %vm79_vm1, %v5191_v58 }
  0xee   :  { %4011 = vmatmul.msk.bf16.gmra.mxu3 %vm79_vm1, %v5195_v39  ;;  %v5389_v39 = vpack.c.bf16 %v5092_v33, %v5090_v24 }
  0xf0   :  { %4045 = vmatmul.msk.bf16.vlgmr.msrb.gmra.mxu2 %vm79_vm1, %v1512_v35  ;;  %v1302_v35 = vsel %vm1287_vm4, %v1299_v23, %v1301_v25  ;;  %7420 = vst [vmem:[#allocation72_spill] sm:$0xff] %v5389_v39 }
  0xf1   :  { %v5257_v57 = vpack.c.bf16 %v1302_v35, %v1300_v37 }
  0xf3   :  { %7398 = vst [vmem:[#allocation50_spill] sm:$0xff] %v5257_v57 }
  0xf6   :  { %4111 = vmatmul.msk.bf16.vlgmr.msrb.gmra.mxu0 %vm79_vm1, %v4770_v44 }
  0xf9   :  { %v5215_v13 = vpop.f32.mrf.mxu1 }
  0xfc   :  { %4012 = vmatmul.msk.bf16.vlgmr.msrb.gmra.mxu1 %vm79_vm1, %v362_v0 }
  0xfe   :  { %4078 = vmatmul.msk.bf16.vlgmr.msrb.gmra.mxu3 %vm79_vm1, %v363_v6 }
 0x100   :  { %4046 = vmatmul.msk.bf16.gmra.mxu2 %vm79_vm1, %v5224_v26  ;;  %v5319_v26 = vpack.c.bf16 %v4944_v51, %v4942_v49 }
 0x101   :  { %v5229_v14 = vpop.f32.mrf.mxu3  ;;  %v5231_v15 = vpop.f32.mrf.mxu1 }
 0x102   :  { %7393 = vst [vmem:[#allocation45_spill] sm:$0xff] %v5229_v14 }
 0x103   :  { %v5233_v44 = vpop.f32.mrf.mxu0  ;;  %v5235_v36 = vpop.f32.mrf.mxu2  ;;  %7408 = vst [vmem:[#allocation60_spill] sm:$0xff] %v5319_v26 }
 0x104   :  { %7394 = vst [vmem:[#allocation46_spill] sm:$0xff] %v5235_v36 }
 0x106   :  { %4112 = vmatmul.msk.bf16.gmra.mxu0 %vm79_vm1, %v4843_v27 }
 0x109   :  { %v5242_v18 = vpop.f32.mrf.mxu3  ;;  %v5244_v16 = vpop.f32.mrf.mxu1 }
 0x10a   :  { %7395 = vst [vmem:[#allocation47_spill] sm:$0xff] %v5242_v18 }
 0x10b   :  { %v5252_v42 = vpop.f32.mrf.mxu0  ;;  %v5254_v21 = vpop.f32.mrf.mxu2 }
 0x10c   :  { %7397 = vst [vmem:[#allocation49_spill] sm:$0xff] %v5254_v21  ;;  %4013 = vmatmul.msk.bf16.gmra.mxu1 %vm79_vm1, %v363_v6  ;;  %v1304_v6 = vrot.slane %v4870_v46, 2 }
 0x10e   :  { %4079 = vmatmul.msk.bf16.gmra.mxu3 %vm79_vm1, %v5250_v40  ;;  %v1305_v37 = vsel %vm1287_vm4, %v1303_v34, %v1304_v6  ;;  %v1307_v35 = vsel %vm1287_vm4, %v1304_v6, %v1306_v50  ;;  %v1311_v50 = vrot.slane %v4946_v52, 2 }
 0x10f   :  { %v5292_v47 = vpack.c.bf16 %v1307_v35, %v1305_v37  ;;  %v1309_v37 = vrot.slane %v4944_v51, 2 }
 0x110   :  { %4047 = vmatmul.msk.bf16.gmra.mxu2 %vm79_vm1, %v5257_v57  ;;  %v5354_v57 = vpack.c.bf16 %v5018_v30, %v5016_v29 }
 0x111   :  { %v5263_v0 = vpop.f32.mrf.mxu3  ;;  %v5265_v19 = vpop.f32.mrf.mxu1  ;;  %7404 = vst [vmem:[#allocation56_spill] sm:$0xff] %v5292_v47 }
 0x112   :  { %7399 = vst [vmem:[#allocation51_spill] sm:$0xff] %v5263_v0  ;;  %v5284_v0 = vpack.c.bf16 %v4870_v46, %v4868_v45 }
 0x113   :  { %v5267_v55 = vpop.f32.mrf.mxu0  ;;  %v5269_v56 = vpop.f32.mrf.mxu2  ;;  %7414 = vst [vmem:[#allocation66_spill] sm:$0xff] %v5354_v57 }
 0x114   :  { %7400 = vst [vmem:[#allocation52_spill] sm:$0xff] %v5269_v56 }
 0x115   :  { %7402 = vst [vmem:[#allocation54_spill] sm:$0xff] %v5284_v0 }
 0x116   :  { %4113 = vmatmul.msk.bf16.gmra.mxu0 %vm79_vm1, %v4921_v28 }
 0x119   :  { %v5276_v23 = vpop.f32.mrf.mxu3  ;;  %v5278_v25 = vpop.f32.mrf.mxu1 }
 0x11a   :  { %7401 = vst [vmem:[#allocation53_spill] sm:$0xff] %v5276_v23  ;;  %v1308_v23 = vrot.slane %v4942_v49, 2 }
 0x11b   :  { %v5286_v18 = vpop.f32.mrf.mxu0  ;;  %v5288_v27 = vpop.f32.mrf.mxu2 }
 0x11c   :  { %7403 = vst [vmem:[#allocation55_spill] sm:$0xff] %v5288_v27  ;;  %4014 = vmatmul.msk.bf16.gmra.mxu1 %vm79_vm1, %v5250_v40  ;;  %v4288_v27 = vld [vmem:[#allocation2 + $0xe0] sm:$0xff] }
 0x11e   :  { %4080 = vmatmul.msk.bf16.gmra.mxu3 %vm79_vm1, %v5284_v0 }
 0x120   :  { %4048 = vmatmul.msk.bf16.gmra.mxu2 %vm79_vm1, %v5292_v47  ;;  %v1312_v47 = vsel %vm1287_vm4, %v1309_v37, %v1311_v50 }
 0x121   :  { %v5298_v34 = vpop.f32.mrf.mxu3  ;;  %v5300_v6 = vpop.f32.mrf.mxu1 }
 0x122   :  { %7405 = vst [vmem:[#allocation57_spill] sm:$0xff] %v5298_v34  ;;  %v1310_v34 = vsel %vm1287_vm4, %v1308_v23, %v1309_v37  ;;  %v1316_v37 = vrot.slane %v5020_v31, 2 }
 0x123   :  { %v5302_v45 = vpop.f32.mrf.mxu0  ;;  %v5304_v46 = vpop.f32.mrf.mxu2 }
 0x124   :  { %7406 = vst [vmem:[#allocation58_spill] sm:$0xff] %v5304_v46 }
 0x126   :  { %4114 = vmatmul.msk.bf16.gmra.mxu0 %vm79_vm1, %v4995_v38  ;;  %v5327_v38 = vpack.c.bf16 %v1312_v47, %v1310_v34  ;;  %v1314_v47 = vrot.slane %v5018_v30, 2 }
 0x128   :  { %7410 = vst [vmem:[#allocation62_spill] sm:$0xff] %v5327_v38 }
 0x129   :  { %v5311_v35 = vpop.f32.mrf.mxu3  ;;  %v5313_v28 = vpop.f32.mrf.mxu1 }
 0x12a   :  { %7407 = vst [vmem:[#allocation59_spill] sm:$0xff] %v5311_v35  ;;  %v1313_v35 = vrot.slane %v5016_v29, 2 }
 0x12b   :  { %v5321_v52 = vpop.f32.mrf.mxu0  ;;  %v5323_v14 = vpop.f32.mrf.mxu2 }
 0x12c   :  { %7409 = vst [vmem:[#allocation61_spill] sm:$0xff] %v5323_v14  ;;  %4015 = vmatmul.msk.bf16.gmra.mxu1 %vm79_vm1, %v5284_v0  ;;  %v1317_v0 = vsel %vm1287_vm4, %v1314_v47, %v1316_v37 }
 0x12e   :  { %4081 = vmatmul.msk.bf16.gmra.mxu3 %vm79_vm1, %v5319_v26 }
 0x130   :  { %4049 = vmatmul.msk.bf16.gmra.mxu2 %vm79_vm1, %v5327_v38 }
 0x131   :  { %v5333_v23 = vpop.f32.mrf.mxu3  ;;  %v5335_v50 = vpop.f32.mrf.mxu1 }
 0x132   :  { %7411 = vst [vmem:[#allocation63_spill] sm:$0xff] %v5333_v23  ;;  %v1315_v23 = vsel %vm1287_vm4, %v1313_v35, %v1314_v47  ;;  %v1321_v47 = vrot.slane %v5094_v20, 2 }
 0x133   :  { %v5337_v49 = vpop.f32.mrf.mxu0  ;;  %v5339_v51 = vpop.f32.mrf.mxu2 }
 0x134   :  { %7412 = vst [vmem:[#allocation64_spill] sm:$0xff] %v5339_v51 }
 0x136   :  { %4115 = vmatmul.msk.bf16.gmra.mxu0 %vm79_vm1, %v5069_v53  ;;  %v5362_v53 = vpack.c.bf16 %v1317_v0, %v1315_v23  ;;  %v1319_v0 = vrot.slane %v5092_v33, 2 }
 0x138   :  { %7416 = vst [vmem:[#allocation68_spill] sm:$0xff] %v5362_v53 }
 0x139   :  { %v5346_v34 = vpop.f32.mrf.mxu3  ;;  %v5348_v38 = vpop.f32.mrf.mxu1 }
 0x13a   :  { %7413 = vst [vmem:[#allocation65_spill] sm:$0xff] %v5346_v34  ;;  %v1318_v34 = vrot.slane %v5090_v24, 2 }
 0x13b   :  { %v5356_v31 = vpop.f32.mrf.mxu0  ;;  %v5358_v40 = vpop.f32.mrf.mxu2 }
 0x13c   :  { %7415 = vst [vmem:[#allocation67_spill] sm:$0xff] %v5358_v40  ;;  %4016 = vmatmul.msk.bf16.gmra.mxu1 %vm79_vm1, %v5319_v26  ;;  %v1322_v26 = vsel %vm1287_vm4, %v1319_v0, %v1321_v47 }
 0x13e   :  { %4082 = vmatmul.msk.bf16.gmra.mxu3 %vm79_vm1, %v5354_v57 }
 0x140   :  { %4050 = vmatmul.msk.bf16.gmra.mxu2 %vm79_vm1, %v5362_v53 }
 0x141   :  { %v5368_v35 = vpop.f32.mrf.mxu3  ;;  %v5370_v37 = vpop.f32.mrf.mxu1 }
 0x142   :  { %7417 = vst [vmem:[#allocation69_spill] sm:$0xff] %v5368_v35  ;;  %v1320_v35 = vsel %vm1287_vm4, %v1318_v34, %v1319_v0  ;;  %v1326_v0 = vrot.slane %v5136_v7, 2 }
 0x143   :  { %v5372_v29 = vpop.f32.mrf.mxu0  ;;  %v5374_v30 = vpop.f32.mrf.mxu2 }
 0x144   :  { %7418 = vst [vmem:[#allocation70_spill] sm:$0xff] %v5374_v30 }
 0x146   :  { %4116 = vmatmul.msk.bf16.gmra.mxu0 %vm79_vm1, %v5122_v5  ;;  %v5397_v5 = vpack.c.bf16 %v1322_v26, %v1320_v35  ;;  %v1324_v26 = vrot.slane %v5134_v32, 2 }
 0x148   :  { %7422 = vst [vmem:[#allocation74_spill] sm:$0xff] %v5397_v5 }
 0x149   :  { %v5381_v23 = vpop.f32.mrf.mxu3  ;;  %v5383_v53 = vpop.f32.mrf.mxu1 }
 0x14a   :  { %7419 = vst [vmem:[#allocation71_spill] sm:$0xff] %v5381_v23  ;;  %v1323_v23 = vrot.slane %v5132_v41, 2 }
 0x14b   :  { %v5391_v20 = vpop.f32.mrf.mxu0  ;;  %v5393_v30 = vpop.f32.mrf.mxu2 }
 0x14c   :  { %7421 = vst [vmem:[#allocation73_spill] sm:$0xff] %v5393_v30  ;;  %4017 = vmatmul.msk.bf16.gmra.mxu1 %vm79_vm1, %v5354_v57  ;;  %v1327_v57 = vsel %vm1287_vm4, %v1324_v26, %v1326_v0 }
 0x14e   :  { %4083 = vmatmul.msk.bf16.gmra.mxu3 %vm79_vm1, %v5389_v39 }
 0x150   :  { %4051 = vmatmul.msk.bf16.gmra.mxu2 %vm79_vm1, %v5397_v5 }
 0x151   :  { %v5403_v34 = vpop.f32.mrf.mxu3  ;;  %v5405_v47 = vpop.f32.mrf.mxu1 }
 0x152   :  { %7423 = vst [vmem:[#allocation75_spill] sm:$0xff] %v5403_v34  ;;  %v1325_v34 = vsel %vm1287_vm4, %v1323_v23, %v1324_v26  ;;  %v4283_v26 = vld [vmem:[#allocation2 + $0xd0] sm:$0x3] }
 0x153   :  { %v5407_v24 = vpop.f32.mrf.mxu0  ;;  %v5409_v33 = vpop.f32.mrf.mxu2 }
 0x154   :  { %7424 = vst [vmem:[#allocation76_spill] sm:$0xff] %v5409_v33  ;;  %v5424_v33 = vpack.c.bf16 %v5134_v32, %v5132_v41 }
 0x156   :  { %4117 = vmatmul.msk.bf16.gmra.mxu0 %vm79_vm1, %v5178_v8  ;;  %7426 = vst [vmem:[#allocation78_spill] sm:$0xff] %v5424_v33  ;;  %v5432_v8 = vpack.c.bf16 %v1327_v57, %v1325_v34  ;;  %v4285_v57 = vld [vmem:[#allocation2 + $0xc8] sm:$0xff] }
 0x157   :  { %v1329_v34 = vrot.slane %v4285_v57, 2 }
 0x158   :  { %7428 = vst [vmem:[#allocation80_spill] sm:$0xff] %v5432_v8 }
 0x159   :  { %v5416_v35 = vpop.f32.mrf.mxu3  ;;  %v5418_v5 = vpop.f32.mrf.mxu1 }
 0x15a   :  { %7425 = vst [vmem:[#allocation77_spill] sm:$0xff] %v5416_v35  ;;  %v1331_v35 = vrot.slane %v4283_v26, 2 }
 0x15b   :  { %v5426_v7 = vpop.f32.mrf.mxu0  ;;  %v5428_v30 = vpop.f32.mrf.mxu2 }
 0x15c   :  { %7427 = vst [vmem:[#allocation79_spill] sm:$0xff] %v5428_v30  ;;  %4018 = vmatmul.msk.bf16.gmra.mxu1 %vm79_vm1, %v5389_v39  ;;  %v4284_v30 = vld [vmem:[#allocation2 + $0xc0] sm:$0xff]  ;;  %v1332_v51 = vsel %vm1287_vm4, %v1329_v34, %v1331_v35 }
 0x15d   :  { %v1328_v39 = vrot.slane %v4284_v30, 2  ;;  %v5454_v14 = vpack.c.bf16 %v4285_v57, %v4284_v30 }
 0x15e   :  { %4084 = vmatmul.msk.bf16.gmra.mxu3 %vm79_vm1, %v5424_v33 }
 0x160   :  { %4052 = vmatmul.msk.bf16.gmra.mxu2 %vm79_vm1, %v5432_v8 }
 0x161   :  { %v5438_v23 = vpop.f32.mrf.mxu3  ;;  %v5440_v0 = vpop.f32.mrf.mxu1 }
 0x162   :  { %7429 = vst [vmem:[#allocation81_spill] sm:$0xff] %v5438_v23  ;;  %v1330_v23 = vsel %vm1287_vm4, %v1328_v39, %v1329_v34  ;;  %v4286_v34 = vld [vmem:[#allocation2 + $0xe8] sm:$0x3] }
 0x163   :  { %v5442_v41 = vpop.f32.mrf.mxu0  ;;  %v5444_v32 = vpop.f32.mrf.mxu2  ;;  %v5462_v46 = vpack.c.bf16 %v1332_v51, %v1330_v23 }
 0x164   :  { %7430 = vst [vmem:[#allocation82_spill] sm:$0xff] %v5444_v32 }
 0x165   :  { %7433 = vst [vmem:[#allocation85_spill] sm:$0xff] %v5462_v46 }
 0x166   :  { %4118 = vmatmul.msk.bf16.gmra.mxu0 %vm79_vm1, %v4702_v59  ;;  %v4287_v59 = vld [vmem:[#allocation2 + $0xd8] sm:$0xff] }
 0x167   :  { %v5479_v21 = vpack.c.bf16 %v4288_v27, %v4287_v59 }
 0x169   :  { %v5448_v40 = vpop.f32.mrf.mxu3  ;;  %v5450_v8 = vpop.f32.mrf.mxu1 }
 0x16a   :  { %7431 = vst [vmem:[#allocation83_spill] sm:$0xff] %v5448_v40  ;;  %v1336_v40 = vrot.slane %v4286_v34, 2 }
 0x16b   :  { %v5456_v32 = vpop.f32.mrf.mxu0  ;;  %v5458_v26 = vpop.f32.mrf.mxu2 }
 0x16c   :  { %7432 = vst [vmem:[#allocation84_spill] sm:$0xff] %v5458_v26  ;;  %4019 = vmatmul.msk.bf16.gmra.mxu1 %vm79_vm1, %v5424_v33  ;;  %v1333_v26 = vrot.slane %v4287_v59, 2  ;;  %v1334_v33 = vrot.slane %v4288_v27, 2 }
 0x16e   :  { %4085 = vmatmul.msk.bf16.gmra.mxu3 %vm79_vm1, %v5454_v14 }
 0x170   :  { %4053 = vmatmul.msk.bf16.gmra.mxu2 %vm79_vm1, %v5462_v46  ;;  %v1335_v46 = vsel %vm1287_vm4, %v1333_v26, %v1334_v33 }
 0x171   :  { %v5468_v39 = vpop.f32.mrf.mxu3  ;;  %v5470_v35 = vpop.f32.mrf.mxu1 }
 0x172   :  { %7434 = vst [vmem:[#allocation86_spill] sm:$0xff] %v5468_v39  ;;  %v1337_v39 = vsel %vm1287_vm4, %v1334_v33, %v1336_v40 }
 0x173   :  { %v2166_v30 = vpop.f32.mrf.mxu0  ;;  %v1654_v57 = vpop.f32.mrf.mxu2  ;;  %v5483_v9 = vpack.c.bf16 %v1337_v39, %v1335_v46  ;;  %v1338_v46 = vrot.slane %v4811_v2, 2  ;;  %v1339_v39 = vrot.slane %v4813_v3, 2 }
 0x176   :  { %4119 = vmatmul.msk.bf16.gmra.mxu0 %vm79_vm1, %v4790_v54 }
 0x179   :  { %v5474_v51 = vpop.f32.mrf.mxu3  ;;  %v1127_v23 = vpop.f32.mrf.mxu1 }
 0x17a   :  { %7435 = vst [vmem:[#allocation87_spill] sm:$0xff] %v5474_v51  ;;  %v1128_v56 = vadd.f32 %v1127_v23, %v5201_v1 }
 0x17b   :  { %v2168_v36 = vpop.f32.mrf.mxu0  ;;  %v1656_v34 = vpop.f32.mrf.mxu2 }
 0x17c   :  { %4020 = vmatmul.msk.bf16.gmra.mxu1 %vm79_vm1, %v5454_v14  ;;  %v1814_v61 = vadd.f32 %v1654_v57, %v1128_v56  ;;  %v1341_v56 = vrot.slane %v4817_v4, 2 }
 0x17e   :  { %4086 = vmatmul.msk.bf16.gmra.mxu3 %vm79_vm1, %v5479_v21 }
 0x180   :  { %4054 = vmatmul.msk.bf16.gmra.mxu2 %vm79_vm1, %v5483_v9 }
 0x181   :  { %v1900_v26 = vpop.f32.mrf.mxu3  ;;  %v1129_v40 = vpop.f32.mrf.mxu1 }
 0x182   :  { %v2060_v33 = vadd.f32 %v1900_v26, %v1814_v61  ;;  %v1130_v59 = vadd.f32 %v1129_v40, %v5213_v10  ;;  %v1340_v61 = vsel %vm1287_vm4, %v1338_v46, %v1339_v39  ;;  %v1342_v10 = vsel %vm1287_vm4, %v1339_v39, %v1341_v56 }
 0x183   :  { %v2171_v27 = vpop.f32.mrf.mxu0  ;;  %v1659_v1 = vpop.f32.mrf.mxu2 }
 0x184   :  { %v1815_v23 = vadd.f32 %v1656_v34, %v1130_v59  ;;  %v5490_v51 = vadd.f32 %v2166_v30, %v2060_v33  ;;  %v5502_v30 = vpack.c.bf16 %v4813_v3, %v4811_v2  ;;  %v5506_v59 = vpack.c.bf16 %v1342_v10, %v1340_v61 }
 0x186   :  { %4120 = vmatmul.msk.bf16.gmra.mxu0 %vm79_vm1, %v4866_v43 }
 0x189   :  { %v1902_v57 = vpop.f32.mrf.mxu3  ;;  %v1132_v54 = vpop.f32.mrf.mxu1 }
 0x18a   :  { %v2061_v26 = vadd.f32 %v1902_v57, %v1815_v23  ;;  %v1133_v34 = vadd.f32 %v1132_v54, %v5233_v44  ;;  %v1344_v57 = vrot.slane %v4887_v62, 2 }
 0x18b   :  { %v2173_v4 = vpop.f32.mrf.mxu0  ;;  %v1661_v40 = vpop.f32.mrf.mxu2 }
 0x18c   :  { %4021 = vmatmul.msk.bf16.gmra.mxu1 %vm79_vm1, %v5479_v21  ;;  %v1816_v33 = vadd.f32 %v1659_v1, %v1133_v34  ;;  %v5508_v43 = vadd.f32 %v2168_v36, %v2061_v26  ;;  %v1346_v1 = vrot.slane %v4891_v63, 2  ;;  %v1343_v36 = vrot.slane %v4885_v60, 2 }
 0x18e   :  { %4087 = vmatmul.msk.bf16.gmra.mxu3 %vm79_vm1, %v5502_v30  ;;  %v1345_v26 = vsel %vm1287_vm4, %v1343_v36, %v1344_v57 }
 0x190   :  { %4055 = vmatmul.msk.bf16.gmra.mxu2 %vm79_vm1, %v5506_v59 }
 0x191   :  { %v1905_v54 = vpop.f32.mrf.mxu3  ;;  %v1134_v44 = vpop.f32.mrf.mxu1 }
 0x192   :  { %v2062_v2 = vadd.f32 %v1905_v54, %v1816_v33  ;;  %v1135_v3 = vadd.f32 %v1134_v44, %v5252_v42  ;;  %v1347_v42 = vsel %vm1287_vm4, %v1344_v57, %v1346_v1 }
 0x193   :  { %v2176_v23 = vpop.f32.mrf.mxu0  ;;  %v1664_v56 = vpop.f32.mrf.mxu2  ;;  %v5531_v44 = vpack.c.bf16 %v1347_v42, %v1345_v26 }
 0x194   :  { %v1817_v46 = vadd.f32 %v1661_v40, %v1135_v3  ;;  %v5515_v39 = vadd.f32 %v2171_v27, %v2062_v2  ;;  %v5527_v27 = vpack.c.bf16 %v4887_v62, %v4885_v60 }
 0x196   :  { %4121 = vmatmul.msk.bf16.gmra.mxu0 %vm79_vm1, %v4940_v48 }
 0x199   :  { %v1907_v61 = vpop.f32.mrf.mxu3  ;;  %v1137_v10 = vpop.f32.mrf.mxu1 }
 0x19a   :  { %v2063_v34 = vadd.f32 %v1907_v61, %v1817_v46  ;;  %v1138_v40 = vadd.f32 %v1137_v10, %v5267_v55  ;;  %v1349_v61 = vrot.slane %v4961_v12, 2 }
 0x19b   :  { %v2178_v63 = vpop.f32.mrf.mxu0  ;;  %v1666_v33 = vpop.f32.mrf.mxu2 }
 0x19c   :  { %4022 = vmatmul.msk.bf16.gmra.mxu1 %vm79_vm1, %v5502_v30  ;;  %v1818_v54 = vadd.f32 %v1664_v56, %v1138_v40  ;;  %v5533_v2 = vadd.f32 %v2173_v4, %v2063_v34  ;;  %v1351_v56 = vrot.slane %v4965_v17, 2  ;;  %v1348_v4 = vrot.slane %v4959_v11, 2 }
 0x19e   :  { %4088 = vmatmul.msk.bf16.gmra.mxu3 %vm79_vm1, %v5527_v27  ;;  %v1350_v42 = vsel %vm1287_vm4, %v1348_v4, %v1349_v61 }
 0x1a0   :  { %4056 = vmatmul.msk.bf16.gmra.mxu2 %vm79_vm1, %v5531_v44 }
 0x1a1   :  { %v1910_v55 = vpop.f32.mrf.mxu3  ;;  %v1139_v3 = vpop.f32.mrf.mxu1 }
 0x1a2   :  { %v2064_v60 = vadd.f32 %v1910_v55, %v1818_v54  ;;  %v1140_v62 = vadd.f32 %v1139_v3, %v5286_v18  ;;  %v1352_v18 = vsel %vm1287_vm4, %v1349_v61, %v1351_v56 }
 0x1a3   :  { %v2181_v46 = vpop.f32.mrf.mxu0  ;;  %v1669_v1 = vpop.f32.mrf.mxu2  ;;  %v5556_v55 = vpack.c.bf16 %v1352_v18, %v1350_v42  ;;  %v7441_v18 = vld [vmem:[#allocation26_spill] sm:$0xff] }
 0x1a4   :  { %v1819_v36 = vadd.f32 %v1666_v33, %v1140_v62  ;;  %v5540_v57 = vadd.f32 %v2176_v23, %v2064_v60  ;;  %v5552_v23 = vpack.c.bf16 %v4961_v12, %v4959_v11 }
 0x1a6   :  { %4122 = vmatmul.msk.bf16.gmra.mxu0 %vm79_vm1, %v5014_v22 }
 0x1a9   :  { %v1912_v10 = vpop.f32.mrf.mxu3  ;;  %v1142_v26 = vpop.f32.mrf.mxu1 }
 0x1aa   :  { %v2065_v34 = vadd.f32 %v1912_v10, %v1819_v36  ;;  %v1143_v40 = vadd.f32 %v1142_v26, %v5302_v45  ;;  %v7440_v26 = vld [vmem:[#allocation23_spill] sm:$0xff] }
 0x1ab   :  { %v2183_v17 = vpop.f32.mrf.mxu0  ;;  %v1671_v33 = vpop.f32.mrf.mxu2  ;;  %v1354_v42 = vrot.slane %v7440_v26, 2 }
 0x1ac   :  { %4023 = vmatmul.msk.bf16.gmra.mxu1 %vm79_vm1, %v5527_v27  ;;  %v1820_v54 = vadd.f32 %v1669_v1, %v1143_v40  ;;  %v5558_v3 = vadd.f32 %v2178_v63, %v2065_v34  ;;  %v7438_v1 = vld [vmem:[#allocation24_spill] sm:$0xff]  ;;  %v7439_v63 = vld [vmem:[#allocation22_spill] sm:$0xff] }
 0x1ad   :  { %v1356_v61 = vrot.slane %v7438_v1, 2  ;;  %v1353_v10 = vrot.slane %v7439_v63, 2 }
 0x1ae   :  { %7436 = vst [vmem:[#allocation88_spill] sm:$0xff] %v5558_v3  ;;  %4089 = vmatmul.msk.bf16.gmra.mxu3 %vm79_vm1, %v5552_v23 }
 0x1b0   :  { %4057 = vmatmul.msk.bf16.gmra.mxu2 %vm79_vm1, %v5556_v55 }
 0x1b1   :  { %v1915_v45 = vpop.f32.mrf.mxu3  ;;  %v1144_v60 = vpop.f32.mrf.mxu1 }
 0x1b2   :  { %v2066_v11 = vadd.f32 %v1915_v45, %v1820_v54  ;;  %v1145_v12 = vadd.f32 %v1144_v60, %v5321_v52  ;;  %v1355_v54 = vsel %vm1287_vm4, %v1353_v10, %v1354_v42  ;;  %v1357_v52 = vsel %vm1287_vm4, %v1354_v42, %v1356_v61  ;;  %v45_v61 = vld [vmem:[%s7214_s0 + $0xf0] sm:$0xff] }
 0x1b3   :  { %v2186_v62 = vpop.f32.mrf.mxu0  ;;  %v1674_v36 = vpop.f32.mrf.mxu2  ;;  %v5581_v1 = vpack.c.bf16 %v1357_v52, %v1355_v54  ;;  %220 = vst.msk [vmem:[#allocation2 + $0x181] sm:$0xff] %vm79_vm1, %v45_v61  ;;  %v7446_v52 = vld [vmem:[#allocation29_spill] sm:$0xff] }
 0x1b4   :  { %v1821_v56 = vadd.f32 %v1671_v33, %v1145_v12  ;;  %v5565_v4 = vadd.f32 %v2181_v46, %v2066_v11  ;;  %v5577_v46 = vpack.c.bf16 %v7440_v26, %v7439_v63 }
 0x1b5   :  { %7442 = vst [vmem:[#allocation24_spill] sm:$0xff] %v5581_v1 }
 0x1b6   :  { %7437 = vst [vmem:[#allocation89_spill] sm:$0xff] %v5565_v4  ;;  %4123 = vmatmul.msk.bf16.gmra.mxu0 %vm79_vm1, %v7441_v18  ;;  %v7448_v4 = vld [vmem:[#allocation33_spill] sm:$0xff] }
 0x1b9   :  { %v1917_v34 = vpop.f32.mrf.mxu3  ;;  %v1147_v40 = vpop.f32.mrf.mxu1 }
 0x1ba   :  { %v2067_v45 = vadd.f32 %v1917_v34, %v1821_v56  ;;  %v1148_v33 = vadd.f32 %v1147_v40, %v5337_v49  ;;  %v7445_v40 = vld [vmem:[#allocation31_spill] sm:$0xff] }
 0x1bb   :  { %v2188_v60 = vpop.f32.mrf.mxu0  ;;  %v1676_v11 = vpop.f32.mrf.mxu2  ;;  %v1361_v54 = vrot.slane %v7445_v40, 2 }
 0x1bc   :  { %4024 = vmatmul.msk.bf16.gmra.mxu1 %vm79_vm1, %v5552_v23  ;;  %v1822_v12 = vadd.f32 %v1674_v36, %v1148_v33  ;;  %v5583_v18 = vadd.f32 %v2183_v17, %v2067_v45  ;;  %v46_v36 = vld [vmem:[%s7214_s0 + $0xf8] sm:$0xff]  ;;  %v1358_v45 = vrot.slane %v7446_v52, 2  ;;  %v7447_v33 = vld [vmem:[#allocation30_spill] sm:$0xff] }
 0x1bd   :  { %221 = vst.msk [vmem:[#allocation2 + $0x189] sm:$0xff] %vm79_vm1, %v46_v36 }
 0x1be   :  { %7443 = vst [vmem:[#allocation22_spill] sm:$0xff] %v5583_v18  ;;  %4090 = vmatmul.msk.bf16.gmra.mxu3 %vm79_vm1, %v5577_v46  ;;  %v1359_v18 = vrot.slane %v7447_v33, 2 }
 0x1c0   :  { %4058 = vmatmul.msk.bf16.gmra.mxu2 %vm79_vm1, %v5581_v1 }
 0x1c1   :  { %v1920_v49 = vpop.f32.mrf.mxu3  ;;  %v1149_v56 = vpop.f32.mrf.mxu1 }
 0x1c2   :  { %v2068_v63 = vadd.f32 %v1920_v49, %v1822_v12  ;;  %v1150_v17 = vadd.f32 %v1149_v56, %v5356_v31  ;;  %v1360_v49 = vsel %vm1287_vm4, %v1358_v45, %v1359_v18  ;;  %v1362_v56 = vsel %vm1287_vm4, %v1359_v18, %v1361_v54 }
 0x1c3   :  { %v2191_v10 = vpop.f32.mrf.mxu0  ;;  %v1679_v26 = vpop.f32.mrf.mxu2  ;;  %v5614_v40 = vpack.c.bf16 %v1362_v56, %v1360_v49  ;;  %v7454_v56 = vld [vmem:[#allocation37_spill] sm:$0xff] }
 0x1c4   :  { %v1823_v42 = vadd.f32 %v1676_v11, %v1150_v17  ;;  %v5598_v34 = vadd.f32 %v2186_v62, %v2068_v63  ;;  %v5610_v62 = vpack.c.bf16 %v7447_v33, %v7446_v52 }
 0x1c5   :  { %7449 = vst [vmem:[#allocation31_spill] sm:$0xff] %v5614_v40 }
 0x1c6   :  { %7444 = vst [vmem:[#allocation23_spill] sm:$0xff] %v5598_v34  ;;  %4124 = vmatmul.msk.bf16.gmra.mxu0 %vm79_vm1, %v7448_v4  ;;  %v304_v34 = vld [vmem:[#allocation2 + $0x190] sm:$0x3] }
 0x1c9   :  { %v1922_v12 = vpop.f32.mrf.mxu3  ;;  %v1152_v31 = vpop.f32.mrf.mxu1 }
 0x1ca   :  { %v2069_v61 = vadd.f32 %v1922_v12, %v1823_v42  ;;  %v1153_v11 = vadd.f32 %v1152_v31, %v5372_v29 }
 0x1cb   :  { %v2193_v36 = vpop.f32.mrf.mxu0  ;;  %v1681_v63 = vpop.f32.mrf.mxu2 }
 0x1cc   :  { %4025 = vmatmul.msk.bf16.gmra.mxu1 %vm79_vm1, %v5577_v46  ;;  %v1824_v17 = vadd.f32 %v1679_v26, %v1153_v11  ;;  %v5616_v4 = vadd.f32 %v2188_v60, %v2069_v61  ;;  %v7452_v26 = vld [vmem:[#allocation38_spill] sm:$0xff]  ;;  %v7453_v60 = vld [vmem:[#allocation36_spill] sm:$0xff]  ;;  %v1364_v61 = vrot.slane %v7454_v56, 2 }
 0x1cd   :  { %v1366_v31 = vrot.slane %v7452_v26, 2  ;;  %v1363_v49 = vrot.slane %v7453_v60, 2  ;;  %v302_v11 = vld [vmem:[#allocation2 + $0x180] sm:$0xff] }
 0x1ce   :  { %7450 = vst [vmem:[#allocation29_spill] sm:$0xff] %v5616_v4  ;;  %4091 = vmatmul.msk.bf16.gmra.mxu3 %vm79_vm1, %v5610_v62  ;;  %v303_v4 = vld [vmem:[#allocation2 + $0x188] sm:$0xff] }
 0x1d0   :  { %4059 = vmatmul.msk.bf16.gmra.mxu2 %vm79_vm1, %v5614_v40  ;;  %v2133_v40 = vrot.slane %v304_v34, 1 }
 0x1d1   :  { %v1925_v29 = vpop.f32.mrf.mxu3  ;;  %v1154_v18 = vpop.f32.mrf.mxu1 }
 0x1d2   :  { %v2070_v42 = vadd.f32 %v1925_v29, %v1824_v17  ;;  %v1155_v54 = vadd.f32 %v1154_v18, %v5391_v20  ;;  %v1365_v20 = vsel %vm1287_vm4, %v1363_v49, %v1364_v61 }
 0x1d3   :  { %v2196_v52 = vpop.f32.mrf.mxu0  ;;  %v1684_v45 = vpop.f32.mrf.mxu2 }
 0x1d4   :  { %v1825_v33 = vadd.f32 %v1681_v63, %v1155_v54  ;;  %v5623_v12 = vadd.f32 %v2191_v10, %v2070_v42  ;;  %v1367_v63 = vsel %vm1287_vm4, %v1364_v61, %v1366_v31  ;;  %v5635_v42 = vpack.c.bf16 %v7454_v56, %v7453_v60 }
 0x1d5   :  { %v5639_v3 = vpack.c.bf16 %v1367_v63, %v1365_v20  ;;  %v4289_v20 = vld [vmem:[#allocation2 + $0x1c0] sm:$0x3] }
 0x1d6   :  { %7451 = vst [vmem:[#allocation30_spill] sm:$0xff] %v5623_v12  ;;  %4125 = vmatmul.msk.bf16.gmra.mxu0 %vm79_vm1, %v5191_v58  ;;  %v2130_v12 = vrot.slane %v302_v11, 1  ;;  %v2131_v58 = vrot.slane %v303_v4, 1  ;;  %v1371_v63 = vrot.slane %v4289_v20, 2 }
 0x1d9   :  { %v1927_v17 = vpop.f32.mrf.mxu3  ;;  %v1157_v29 = vpop.f32.mrf.mxu1 }
 0x1da   :  { %v2071_v10 = vadd.f32 %v1927_v17, %v1825_v33  ;;  %v1158_v18 = vadd.f32 %v1157_v29, %v5407_v24  ;;  %v2132_v24 = vsel %vm491_vm3, %v2130_v12, %v2131_v58  ;;  %v2134_v33 = vsel %vm491_vm3, %v2131_v58, %v2133_v40  ;;  %v4290_v12 = vld [vmem:[#allocation2 + $0x1b0] sm:$0xff]  ;;  %v4291_v58 = vld [vmem:[#allocation2 + $0x1b8] sm:$0xff] }
 0x1db   :  { %v2198_v54 = vpop.f32.mrf.mxu0  ;;  %v1686_v26 = vpop.f32.mrf.mxu2  ;;  %v1369_v40 = vrot.slane %v4291_v58, 2 }
 0x1dc   :  { %4026 = vmatmul.msk.bf16.gmra.mxu1 %vm79_vm1, %v5610_v62  ;;  %v1826_v1 = vadd.f32 %v1684_v45, %v1158_v18  ;;  %v5641_v49 = vadd.f32 %v2193_v36, %v2071_v10  ;;  %v5650_v45 = vpack.c.bf16 %v2134_v33, %v2132_v24  ;;  %v1368_v10 = vrot.slane %v4290_v12, 2 }
 0x1dd   :  { %v1372_v24 = vsel %vm1287_vm4, %v1369_v40, %v1371_v63 }
 0x1de   :  { %4092 = vmatmul.msk.bf16.gmra.mxu3 %vm79_vm1, %v5635_v42  ;;  %7455 = vst [vmem:[#allocation38_spill] sm:$0xff] %v5650_v45 }
 0x1e0   :  { %4060 = vmatmul.msk.bf16.gmra.mxu2 %vm79_vm1, %v5639_v3 }
 0x1e1   :  { %v1930_v31 = vpop.f32.mrf.mxu3  ;;  %v1159_v34 = vpop.f32.mrf.mxu1 }
 0x1e2   :  { %v2072_v60 = vadd.f32 %v1930_v31, %v1826_v1  ;;  %v1160_v56 = vadd.f32 %v1159_v34, %v5426_v7  ;;  %v1370_v7 = vsel %vm1287_vm4, %v1368_v10, %v1369_v40 }
 0x1e3   :  { %v2201_v61 = vpop.f32.mrf.mxu0  ;;  %v1689_v36 = vpop.f32.mrf.mxu2 }
 0x1e4   :  { %v1827_v17 = vadd.f32 %v1686_v26, %v1160_v56  ;;  %v5652_v29 = vadd.f32 %v2196_v52, %v2072_v60  ;;  %v5659_v52 = vpack.c.bf16 %v303_v4, %v302_v11  ;;  %v1528_v56 = vpack.c.bf16 %v1372_v24, %v1370_v7  ;;  %v4293_v7 = vld [vmem:[#allocation2 + $0x1c8] sm:$0xff]  ;;  %v4294_v24 = vld [vmem:[#allocation2 + $0x1d0] sm:$0xff] }
 0x1e6   :  { %4126 = vmatmul.msk.bf16.gmra.mxu0 %vm79_vm1, %v5650_v45 }
 0x1e9   :  { %v1932_v18 = vpop.f32.mrf.mxu3  ;;  %v1162_v1 = vpop.f32.mrf.mxu1 }
 0x1ea   :  { %v2073_v33 = vadd.f32 %v1932_v18, %v1827_v17  ;;  %v1163_v26 = vadd.f32 %v1162_v1, %v5442_v41  ;;  %v4292_v1 = vld [vmem:[#allocation2 + $0x1d8] sm:$0x3] }
 0x1eb   :  { %v2203_v31 = vpop.f32.mrf.mxu0  ;;  %v1691_v34 = vpop.f32.mrf.mxu2 }
 0x1ec   :  { %4027 = vmatmul.msk.bf16.gmra.mxu1 %vm79_vm1, %v5635_v42  ;;  %v1828_v60 = vadd.f32 %v1689_v36, %v1163_v26  ;;  %v5663_v20 = vadd.f32 %v2198_v54, %v2073_v33  ;;  %v1376_v36 = vrot.slane %v4292_v1, 2  ;;  %v1373_v54 = vrot.slane %v4293_v7, 2  ;;  %v7458_v26 = vld [vmem:[#allocation8_spill] sm:$0xff] }
 0x1ed   :  { %v1374_v33 = vrot.slane %v4294_v24, 2 }
 0x1ee   :  { %7456 = vst [vmem:[#allocation36_spill] sm:$0xff] %v5663_v20  ;;  %4093 = vmatmul.msk.bf16.gmra.mxu3 %vm79_vm1, %v5659_v52 }
 0x1f0   :  { %4061 = vmatmul.msk.bf16.gmra.mxu2 %vm79_vm1, %v1528_v56  ;;  %v378_v56 = vpack.c.bf16 %v4291_v58, %v4290_v12 }
 0x1f1   :  { %v1935_v63 = vpop.f32.mrf.mxu3  ;;  %v1164_v17 = vpop.f32.mrf.mxu1 }
 0x1f2   :  { %v2074_v10 = vadd.f32 %v1935_v63, %v1828_v60  ;;  %v1165_v41 = vadd.f32 %v1164_v17, %v5456_v32  ;;  %v1375_v60 = vsel %vm1287_vm4, %v1373_v54, %v1374_v33  ;;  %v1377_v32 = vsel %vm1287_vm4, %v1374_v33, %v1376_v36  ;;  %v4297_v33 = vld [vmem:[#allocation2 + $0x1e8] sm:$0xff] }
 0x1f3   :  { %v2206_v4 = vpop.f32.mrf.mxu0  ;;  %v1694_v11 = vpop.f32.mrf.mxu2  ;;  %v5677_v1 = vpack.c.bf16 %v1377_v32, %v1375_v60 }
 0x1f4   :  { %v1829_v40 = vadd.f32 %v1691_v34, %v1165_v41  ;;  %v5669_v18 = vadd.f32 %v2201_v61, %v2074_v10  ;;  %v379_v34 = vpack.c.bf16 %v4294_v24, %v4293_v7  ;;  %v4296_v24 = vld [vmem:[#allocation2 + $0x1e0] sm:$0xff] }
 0x1f6   :  { %7457 = vst [vmem:[#allocation37_spill] sm:$0xff] %v5669_v18  ;;  %4127 = vmatmul.msk.bf16.gmra.mxu0 %vm79_vm1, %v7458_v26  ;;  %v1379_v26 = vrot.slane %v4297_v33, 2 }
 0x1f9   :  { %v1937_v20 = vpop.f32.mrf.mxu3  ;;  %v1167_v45 = vpop.f32.mrf.mxu1 }
 0x1fa   :  { %v2075_v63 = vadd.f32 %v1937_v20, %v1829_v40  ;;  %v1168_v61 = vadd.f32 %v1167_v45, %v5215_v13 }
 0x1fb   :  { %v2208_v17 = vpop.f32.mrf.mxu0  ;;  %v1696_v10 = vpop.f32.mrf.mxu2 }
 0x1fc   :  { %4028 = vmatmul.msk.bf16.gmra.mxu1 %vm79_vm1, %v378_v56  ;;  %v1830_v41 = vadd.f32 %v1694_v11, %v1168_v61  ;;  %v5679_v18 = vadd.f32 %v2203_v31, %v2075_v63  ;;  %v4295_v11 = vld [vmem:[#allocation2 + $0x1f0] sm:$0x3]  ;;  %v1378_v31 = vrot.slane %v4296_v24, 2 }
 0x1fd   :  { %v1381_v54 = vrot.slane %v4295_v11, 2  ;;  %v7459_v56 = vld [vmem:[#allocation11_spill] sm:$0xff] }
 0x1fe   :  { %4094 = vmatmul.msk.bf16.gmra.mxu3 %vm79_vm1, %v379_v34  ;;  %v1380_v63 = vsel %vm1287_vm4, %v1378_v31, %v1379_v26 }
 0x200   :  { %4062 = vmatmul.msk.bf16.gmra.mxu2 %vm79_vm1, %v5677_v1 }
 0x201   :  { %v1940_v12 = vpop.f32.mrf.mxu3  ;;  %v1169_v58 = vpop.f32.mrf.mxu1 }
 0x202   :  { %v2076_v20 = vadd.f32 %v1940_v12, %v1830_v41  ;;  %v1170_v13 = vadd.f32 %v1169_v58, %v5231_v15  ;;  %v1382_v15 = vsel %vm1287_vm4, %v1379_v26, %v1381_v54 }
 0x203   :  { %v2211_v45 = vpop.f32.mrf.mxu0  ;;  %v1699_v40 = vpop.f32.mrf.mxu2 }
 0x204   :  { %v1831_v36 = vadd.f32 %v1696_v10, %v1170_v13  ;;  %v5685_v7 = vadd.f32 %v2206_v4, %v2076_v20  ;;  %v5692_v4 = vpack.c.bf16 %v4297_v33, %v4296_v24  ;;  %v5695_v20 = vpack.c.bf16 %v1382_v15, %v1380_v63  ;;  %v7461_v15 = vld [vmem:[#allocation15_spill] sm:$0xff] }
 0x206   :  { %4128 = vmatmul.msk.bf16.gmra.mxu0 %vm79_vm1, %v7459_v56 }
 0x209   :  { %v1942_v60 = vpop.f32.mrf.mxu3  ;;  %v1172_v32 = vpop.f32.mrf.mxu1 }
 0x20a   :  { %v2077_v61 = vadd.f32 %v1942_v60, %v1831_v36  ;;  %v1173_v10 = vadd.f32 %v1172_v32, %v5244_v16  ;;  %v4300_v32 = vld [vmem:[#allocation2 + $0x200] sm:$0xff] }
 0x20b   :  { %v2213_v41 = vpop.f32.mrf.mxu0  ;;  %v1701_v12 = vpop.f32.mrf.mxu2  ;;  %v1384_v63 = vrot.slane %v4300_v32, 2 }
 0x20c   :  { %4029 = vmatmul.msk.bf16.gmra.mxu1 %vm79_vm1, %v379_v34  ;;  %v1832_v58 = vadd.f32 %v1699_v40, %v1173_v10  ;;  %v5697_v13 = vadd.f32 %v2208_v17, %v2077_v61  ;;  %v4298_v40 = vld [vmem:[#allocation2 + $0x208] sm:$0x3]  ;;  %v4299_v17 = vld [vmem:[#allocation2 + $0x1f8] sm:$0xff] }
 0x20d   :  { %v1386_v26 = vrot.slane %v4298_v40, 2  ;;  %v1383_v60 = vrot.slane %v4299_v17, 2 }
 0x20e   :  { %4095 = vmatmul.msk.bf16.gmra.mxu3 %vm79_vm1, %v5692_v4 }
 0x210   :  { %4063 = vmatmul.msk.bf16.gmra.mxu2 %vm79_vm1, %v5695_v20 }
 0x211   :  { %v1945_v36 = vpop.f32.mrf.mxu3  ;;  %v1174_v11 = vpop.f32.mrf.mxu1 }
 0x212   :  { %v2078_v16 = vadd.f32 %v1945_v36, %v1832_v58  ;;  %v1175_v54 = vadd.f32 %v1174_v11, %v5265_v19  ;;  %v1385_v58 = vsel %vm1287_vm4, %v1383_v60, %v1384_v63  ;;  %v1387_v19 = vsel %vm1287_vm4, %v1384_v63, %v1386_v26 }
 0x213   :  { %v2216_v24 = vpop.f32.mrf.mxu0  ;;  %v1704_v31 = vpop.f32.mrf.mxu2  ;;  %v5715_v40 = vpack.c.bf16 %v1387_v19, %v1385_v58  ;;  %v4303_v19 = vld [vmem:[#allocation2 + $0x218] sm:$0xff] }
 0x214   :  { %v1833_v33 = vadd.f32 %v1701_v12, %v1175_v54  ;;  %v5704_v34 = vadd.f32 %v2211_v45, %v2078_v16  ;;  %v5711_v45 = vpack.c.bf16 %v4300_v32, %v4299_v17 }
 0x216   :  { %7460 = vst [vmem:[#allocation8_spill] sm:$0xff] %v5704_v34  ;;  %4129 = vmatmul.msk.bf16.gmra.mxu0 %vm79_vm1, %v7461_v15 }
 0x219   :  { %v1947_v61 = vpop.f32.mrf.mxu3  ;;  %v1177_v10 = vpop.f32.mrf.mxu1 }
 0x21a   :  { %v2079_v36 = vadd.f32 %v1947_v61, %v1833_v33  ;;  %v1178_v12 = vadd.f32 %v1177_v10, %v5278_v25 }
 0x21b   :  { %v2218_v11 = vpop.f32.mrf.mxu0  ;;  %v1706_v16 = vpop.f32.mrf.mxu2 }
 0x21c   :  { %4030 = vmatmul.msk.bf16.gmra.mxu1 %vm79_vm1, %v5692_v4  ;;  %v1834_v54 = vadd.f32 %v1704_v31, %v1178_v12  ;;  %v5717_v15 = vadd.f32 %v2213_v41, %v2079_v36  ;;  %v4301_v31 = vld [vmem:[#allocation2 + $0x220] sm:$0x3]  ;;  %v4302_v41 = vld [vmem:[#allocation2 + $0x210] sm:$0xff]  ;;  %v1389_v36 = vrot.slane %v4303_v19, 2  ;;  %v7464_v12 = vld [vmem:[#allocation18_spill] sm:$0xff] }
 0x21d   :  { %v1391_v10 = vrot.slane %v4301_v31, 2  ;;  %v1388_v58 = vrot.slane %v4302_v41, 2 }
 0x21e   :  { %7462 = vst [vmem:[#allocation11_spill] sm:$0xff] %v5717_v15  ;;  %4096 = vmatmul.msk.bf16.gmra.mxu3 %vm79_vm1, %v5711_v45 }
 0x220   :  { %4064 = vmatmul.msk.bf16.gmra.mxu2 %vm79_vm1, %v5715_v40 }
 0x221   :  { %v1950_v33 = vpop.f32.mrf.mxu3  ;;  %v1179_v25 = vpop.f32.mrf.mxu1 }
 0x222   :  { %v2080_v26 = vadd.f32 %v1950_v33, %v1834_v54  ;;  %v1180_v17 = vadd.f32 %v1179_v25, %v5300_v6  ;;  %v1390_v54 = vsel %vm1287_vm4, %v1388_v58, %v1389_v36  ;;  %v1392_v6 = vsel %vm1287_vm4, %v1389_v36, %v1391_v10 }
 0x223   :  { %v2221_v60 = vpop.f32.mrf.mxu0  ;;  %v1709_v32 = vpop.f32.mrf.mxu2  ;;  %v5735_v31 = vpack.c.bf16 %v1392_v6, %v1390_v54  ;;  %v4306_v6 = vld [vmem:[#allocation2 + $0x230] sm:$0xff] }
 0x224   :  { %v1835_v63 = vadd.f32 %v1706_v16, %v1180_v17  ;;  %v5724_v61 = vadd.f32 %v2216_v24, %v2080_v26  ;;  %v5731_v24 = vpack.c.bf16 %v4303_v19, %v4302_v41 }
 0x226   :  { %7463 = vst [vmem:[#allocation90_spill] sm:$0xff] %v5724_v61  ;;  %4130 = vmatmul.msk.bf16.gmra.mxu0 %vm79_vm1, %v7464_v12 }
 0x229   :  { %v1952_v15 = vpop.f32.mrf.mxu3  ;;  %v1182_v34 = vpop.f32.mrf.mxu1 }
 0x22a   :  { %v2081_v33 = vadd.f32 %v1952_v15, %v1835_v63  ;;  %v1183_v16 = vadd.f32 %v1182_v34, %v5313_v28 }
 0x22b   :  { %v2223_v25 = vpop.f32.mrf.mxu0  ;;  %v1711_v26 = vpop.f32.mrf.mxu2 }
 0x22c   :  { %4031 = vmatmul.msk.bf16.gmra.mxu1 %vm79_vm1, %v5711_v45  ;;  %v1836_v17 = vadd.f32 %v1709_v32, %v1183_v16  ;;  %v5737_v12 = vadd.f32 %v2218_v11, %v2081_v33  ;;  %v4304_v32 = vld [vmem:[#allocation2 + $0x238] sm:$0x3]  ;;  %v4305_v11 = vld [vmem:[#allocation2 + $0x228] sm:$0xff]  ;;  %v1394_v33 = vrot.slane %v4306_v6, 2  ;;  %v7467_v16 = vld [vmem:[#allocation21_spill] sm:$0xff] }
 0x22d   :  { %v1396_v36 = vrot.slane %v4304_v32, 2  ;;  %v1393_v54 = vrot.slane %v4305_v11, 2 }
 0x22e   :  { %7465 = vst [vmem:[#allocation91_spill] sm:$0xff] %v5737_v12  ;;  %4097 = vmatmul.msk.bf16.gmra.mxu3 %vm79_vm1, %v5731_v24 }
 0x230   :  { %4065 = vmatmul.msk.bf16.gmra.mxu2 %vm79_vm1, %v5735_v31 }
 0x231   :  { %v1955_v15 = vpop.f32.mrf.mxu3  ;;  %v1184_v28 = vpop.f32.mrf.mxu1 }
 0x232   :  { %v2082_v34 = vadd.f32 %v1955_v15, %v1836_v17  ;;  %v1185_v63 = vadd.f32 %v1184_v28, %v5335_v50  ;;  %v1395_v17 = vsel %vm1287_vm4, %v1393_v54, %v1394_v33  ;;  %v1397_v50 = vsel %vm1287_vm4, %v1394_v33, %v1396_v36 }
 0x233   :  { %v2226_v10 = vpop.f32.mrf.mxu0  ;;  %v1714_v41 = vpop.f32.mrf.mxu2  ;;  %v5755_v32 = vpack.c.bf16 %v1397_v50, %v1395_v17  ;;  %v4309_v50 = vld [vmem:[#allocation2 + $0x248] sm:$0xff] }
 0x234   :  { %v1837_v58 = vadd.f32 %v1711_v26, %v1185_v63  ;;  %v5744_v19 = vadd.f32 %v2221_v60, %v2082_v34  ;;  %v5751_v60 = vpack.c.bf16 %v4306_v6, %v4305_v11 }
 0x235   :  { %7468 = vst [vmem:[#allocation93_spill] sm:$0xff] %v5755_v32 }
 0x236   :  { %7466 = vst [vmem:[#allocation92_spill] sm:$0xff] %v5744_v19  ;;  %4131 = vmatmul.msk.bf16.gmra.mxu0 %vm79_vm1, %v7467_v16 }
 0x239   :  { %v1957_v12 = vpop.f32.mrf.mxu3  ;;  %v1187_v61 = vpop.f32.mrf.mxu1 }
 0x23a   :  { %v2083_v15 = vadd.f32 %v1957_v12, %v1837_v58  ;;  %v1188_v26 = vadd.f32 %v1187_v61, %v5348_v38 }
 0x23b   :  { %v2228_v28 = vpop.f32.mrf.mxu0  ;;  %v1716_v34 = vpop.f32.mrf.mxu2 }
 0x23c   :  { %4032 = vmatmul.msk.bf16.gmra.mxu1 %vm79_vm1, %v5731_v24  ;;  %v1838_v63 = vadd.f32 %v1714_v41, %v1188_v26  ;;  %v5757_v16 = vadd.f32 %v2223_v25, %v2083_v15  ;;  %v4307_v41 = vld [vmem:[#allocation2 + $0x250] sm:$0x3]  ;;  %v4308_v25 = vld [vmem:[#allocation2 + $0x240] sm:$0xff]  ;;  %v1399_v15 = vrot.slane %v4309_v50, 2  ;;  %v7471_v26 = vld [vmem:[#allocation28_spill] sm:$0xff] }
 0x23d   :  { %v1401_v33 = vrot.slane %v4307_v41, 2  ;;  %v1398_v17 = vrot.slane %v4308_v25, 2 }
 0x23e   :  { %7469 = vst [vmem:[#allocation94_spill] sm:$0xff] %v5757_v16  ;;  %4098 = vmatmul.msk.bf16.gmra.mxu3 %vm79_vm1, %v5751_v60 }
 0x240   :  { %4066 = vmatmul.msk.bf16.gmra.mxu2 %vm79_vm1, %v5755_v32 }
 0x241   :  { %v1960_v12 = vpop.f32.mrf.mxu3  ;;  %v1189_v38 = vpop.f32.mrf.mxu1 }
 0x242   :  { %v2084_v61 = vadd.f32 %v1960_v12, %v1838_v63  ;;  %v1190_v58 = vadd.f32 %v1189_v38, %v5370_v37  ;;  %v1400_v63 = vsel %vm1287_vm4, %v1398_v17, %v1399_v15  ;;  %v1402_v37 = vsel %vm1287_vm4, %v1399_v15, %v1401_v33 }
 0x243   :  { %v2231_v36 = vpop.f32.mrf.mxu0  ;;  %v1719_v11 = vpop.f32.mrf.mxu2  ;;  %v5775_v41 = vpack.c.bf16 %v1402_v37, %v1400_v63  ;;  %v4312_v37 = vld [vmem:[#allocation2 + $0x260] sm:$0xff] }
 0x244   :  { %v1839_v54 = vadd.f32 %v1716_v34, %v1190_v58  ;;  %v5764_v6 = vadd.f32 %v2226_v10, %v2084_v61  ;;  %v5771_v10 = vpack.c.bf16 %v4309_v50, %v4308_v25 }
 0x245   :  { %7473 = vst [vmem:[#allocation97_spill] sm:$0xff] %v5775_v41 }
 0x246   :  { %7470 = vst [vmem:[#allocation95_spill] sm:$0xff] %v5764_v6  ;;  %4132 = vmatmul.msk.bf16.gmra.mxu0 %vm79_vm1, %v7471_v26 }
 0x247   :  { %7472 = vst [vmem:[#allocation96_spill] sm:$0xff] %v5771_v10 }
 0x249   :  { %v1962_v16 = vpop.f32.mrf.mxu3  ;;  %v1192_v19 = vpop.f32.mrf.mxu1 }
 0x24a   :  { %v2085_v12 = vadd.f32 %v1962_v16, %v1839_v54  ;;  %v1193_v34 = vadd.f32 %v1192_v19, %v5383_v53 }
 0x24b   :  { %v2233_v38 = vpop.f32.mrf.mxu0  ;;  %v1721_v61 = vpop.f32.mrf.mxu2 }
 0x24c   :  { %4033 = vmatmul.msk.bf16.gmra.mxu1 %vm79_vm1, %v5751_v60  ;;  %v1840_v58 = vadd.f32 %v1719_v11, %v1193_v34  ;;  %v5777_v26 = vadd.f32 %v2228_v28, %v2085_v12  ;;  %v4310_v11 = vld [vmem:[#allocation2 + $0x268] sm:$0x3]  ;;  %v4311_v28 = vld [vmem:[#allocation2 + $0x258] sm:$0xff]  ;;  %v1404_v12 = vrot.slane %v4312_v37, 2  ;;  %v7476_v34 = vld [vmem:[#allocation35_spill] sm:$0xff] }
 0x24d   :  { %v1406_v15 = vrot.slane %v4310_v11, 2  ;;  %v1403_v63 = vrot.slane %v4311_v28, 2 }
 0x24e   :  { %7474 = vst [vmem:[#allocation98_spill] sm:$0xff] %v5777_v26  ;;  %4099 = vmatmul.msk.bf16.gmra.mxu3 %vm79_vm1, %v5771_v10 }
 0x250   :  { %4067 = vmatmul.msk.bf16.gmra.mxu2 %vm79_vm1, %v5775_v41 }
 0x251   :  { %v1965_v16 = vpop.f32.mrf.mxu3  ;;  %v1194_v53 = vpop.f32.mrf.mxu1 }
 0x252   :  { %v2086_v19 = vadd.f32 %v1965_v16, %v1840_v58  ;;  %v1195_v54 = vadd.f32 %v1194_v53, %v5405_v47  ;;  %v1405_v58 = vsel %vm1287_vm4, %v1403_v63, %v1404_v12  ;;  %v1407_v47 = vsel %vm1287_vm4, %v1404_v12, %v1406_v15 }
 0x253   :  { %v2236_v33 = vpop.f32.mrf.mxu0  ;;  %v1724_v25 = vpop.f32.mrf.mxu2  ;;  %v5795_v11 = vpack.c.bf16 %v1407_v47, %v1405_v58  ;;  %v4315_v47 = vld [vmem:[#allocation2 + $0x278] sm:$0xff] }
 0x254   :  { %v1841_v17 = vadd.f32 %v1721_v61, %v1195_v54  ;;  %v5784_v50 = vadd.f32 %v2231_v36, %v2086_v19  ;;  %v5791_v36 = vpack.c.bf16 %v4312_v37, %v4311_v28 }
 0x255   :  { %7478 = vst [vmem:[#allocation101_spill] sm:$0xff] %v5795_v11 }
 0x256   :  { %7475 = vst [vmem:[#allocation99_spill] sm:$0xff] %v5784_v50  ;;  %4133 = vmatmul.msk.bf16.gmra.mxu0 %vm79_vm1, %v7476_v34 }
 0x257   :  { %7477 = vst [vmem:[#allocation100_spill] sm:$0xff] %v5791_v36 }
 0x259   :  { %v1967_v26 = vpop.f32.mrf.mxu3  ;;  %v1197_v6 = vpop.f32.mrf.mxu1 }
 0x25a   :  { %v2087_v16 = vadd.f32 %v1967_v26, %v1841_v17  ;;  %v1198_v61 = vadd.f32 %v1197_v6, %v5418_v5 }
 0x25b   :  { %v2238_v53 = vpop.f32.mrf.mxu0  ;;  %v1726_v19 = vpop.f32.mrf.mxu2 }
 0x25c   :  { %4034 = vmatmul.msk.bf16.gmra.mxu1 %vm79_vm1, %v5771_v10  ;;  %v1842_v54 = vadd.f32 %v1724_v25, %v1198_v61  ;;  %v5797_v34 = vadd.f32 %v2233_v38, %v2087_v16  ;;  %v4313_v25 = vld [vmem:[#allocation2 + $0x280] sm:$0x3]  ;;  %v4314_v38 = vld [vmem:[#allocation2 + $0x270] sm:$0xff]  ;;  %v1409_v16 = vrot.slane %v4315_v47, 2 }
 0x25d   :  { %v1411_v12 = vrot.slane %v4313_v25, 2  ;;  %v1408_v58 = vrot.slane %v4314_v38, 2  ;;  %v7481_v61 = vld [vmem:[#allocation7_spill] sm:$0xff] }
 0x25e   :  { %7479 = vst [vmem:[#allocation102_spill] sm:$0xff] %v5797_v34  ;;  %4100 = vmatmul.msk.bf16.gmra.mxu3 %vm79_vm1, %v5791_v36 }
 0x260   :  { %4068 = vmatmul.msk.bf16.gmra.mxu2 %vm79_vm1, %v5795_v11 }
 0x261   :  { %v1970_v26 = vpop.f32.mrf.mxu3  ;;  %v1199_v5 = vpop.f32.mrf.mxu1 }
 0x262   :  { %v2088_v6 = vadd.f32 %v1970_v26, %v1842_v54  ;;  %v1200_v17 = vadd.f32 %v1199_v5, %v5440_v0  ;;  %v1410_v54 = vsel %vm1287_vm4, %v1408_v58, %v1409_v16  ;;  %v1412_v0 = vsel %vm1287_vm4, %v1409_v16, %v1411_v12 }
 0x263   :  { %v2241_v15 = vpop.f32.mrf.mxu0  ;;  %v1729_v28 = vpop.f32.mrf.mxu2  ;;  %v5815_v25 = vpack.c.bf16 %v1412_v0, %v1410_v54  ;;  %v4318_v0 = vld [vmem:[#allocation2 + $0x290] sm:$0xff] }
 0x264   :  { %v1843_v63 = vadd.f32 %v1726_v19, %v1200_v17  ;;  %v5804_v37 = vadd.f32 %v2236_v33, %v2088_v6  ;;  %v5811_v33 = vpack.c.bf16 %v4315_v47, %v4314_v38 }
 0x265   :  { %7483 = vst [vmem:[#allocation105_spill] sm:$0xff] %v5815_v25 }
 0x266   :  { %7480 = vst [vmem:[#allocation103_spill] sm:$0xff] %v5804_v37  ;;  %4134 = vmatmul.msk.bf16.gmra.mxu0 %vm79_vm1, %v7481_v61 }
 0x267   :  { %7482 = vst [vmem:[#allocation104_spill] sm:$0xff] %v5811_v33 }
 0x269   :  { %v1972_v34 = vpop.f32.mrf.mxu3  ;;  %v1202_v50 = vpop.f32.mrf.mxu1 }
 0x26a   :  { %v2089_v26 = vadd.f32 %v1972_v34, %v1843_v63  ;;  %v1203_v19 = vadd.f32 %v1202_v50, %v5450_v8 }
 0x26b   :  { %v2243_v5 = vpop.f32.mrf.mxu0  ;;  %v1731_v6 = vpop.f32.mrf.mxu2 }
 0x26c   :  { %4035 = vmatmul.msk.bf16.gmra.mxu1 %vm79_vm1, %v5791_v36  ;;  %v1844_v17 = vadd.f32 %v1729_v28, %v1203_v19  ;;  %v5817_v61 = vadd.f32 %v2238_v53, %v2089_v26  ;;  %v4316_v28 = vld [vmem:[#allocation2 + $0x298] sm:$0x3]  ;;  %v4317_v53 = vld [vmem:[#allocation2 + $0x288] sm:$0xff]  ;;  %v1414_v26 = vrot.slane %v4318_v0, 2 }
 0x26d   :  { %v1416_v16 = vrot.slane %v4316_v28, 2  ;;  %v1413_v54 = vrot.slane %v4317_v53, 2  ;;  %v7486_v19 = vld [vmem:[#allocation10_spill] sm:$0xff] }
 0x26e   :  { %7484 = vst [vmem:[#allocation106_spill] sm:$0xff] %v5817_v61  ;;  %4101 = vmatmul.msk.bf16.gmra.mxu3 %vm79_vm1, %v5811_v33 }
 0x270   :  { %4069 = vmatmul.msk.bf16.gmra.mxu2 %vm79_vm1, %v5815_v25 }
 0x271   :  { %v1975_v34 = vpop.f32.mrf.mxu3  ;;  %v1204_v8 = vpop.f32.mrf.mxu1 }
 0x272   :  { %v2090_v50 = vadd.f32 %v1975_v34, %v1844_v17  ;;  %v1205_v63 = vadd.f32 %v1204_v8, %v5470_v35  ;;  %v1415_v17 = vsel %vm1287_vm4, %v1413_v54, %v1414_v26  ;;  %v1417_v35 = vsel %vm1287_vm4, %v1414_v26, %v1416_v16  ;;  %v7487_v8 = vld [vmem:[#allocation42_spill] sm:$0xff]  ;;  %v7491_v16 = vld [vmem:[#allocation43_spill] sm:$0xff] }
 0x273   :  { %v2246_v12 = vpop.f32.mrf.mxu0  ;;  %v1734_v38 = vpop.f32.mrf.mxu2 }
 0x274   :  { %v1845_v58 = vadd.f32 %v1731_v6, %v1205_v63  ;;  %v5824_v47 = vadd.f32 %v2241_v15, %v2090_v50  ;;  %v5831_v15 = vpack.c.bf16 %v4318_v0, %v4317_v53 }
 0x276   :  { %7485 = vst [vmem:[#allocation107_spill] sm:$0xff] %v5824_v47  ;;  %4135 = vmatmul.msk.bf16.gmra.mxu0 %vm79_vm1, %v7486_v19  ;;  %v5835_v47 = vpack.c.bf16 %v1417_v35, %v1415_v17 }
 0x277   :  { %7488 = vst [vmem:[#allocation42_spill] sm:$0xff] %v5831_v15 }
 0x278   :  { %7489 = vst [vmem:[#allocation108_spill] sm:$0xff] %v5835_v47 }
 0x279   :  { %v1977_v61 = vpop.f32.mrf.mxu3  ;;  %v1207_v37 = vpop.f32.mrf.mxu1 }
 0x27a   :  { %v2091_v34 = vadd.f32 %v1977_v61, %v1845_v58  ;;  %v1208_v6 = vadd.f32 %v1207_v37, %v7487_v8 }
 0x27b   :  { %v2248_v50 = vpop.f32.mrf.mxu0  ;;  %v1736_v63 = vpop.f32.mrf.mxu2 }
 0x27c   :  { %4036 = vmatmul.msk.bf16.gmra.mxu1 %vm79_vm1, %v5811_v33  ;;  %v1846_v28 = vadd.f32 %v1734_v38, %v1208_v6  ;;  %v5837_v19 = vadd.f32 %v2243_v5, %v2091_v34  ;;  %v4319_v38 = vld [vmem:[#allocation2 + $0x2b0] sm:$0x3]  ;;  %v4320_v5 = vld [vmem:[#allocation2 + $0x2a0] sm:$0xff]  ;;  %v4321_v34 = vld [vmem:[#allocation2 + $0x2a8] sm:$0xff] }
 0x27d   :  { %v1421_v17 = vrot.slane %v4319_v38, 2  ;;  %v1418_v35 = vrot.slane %v4320_v5, 2  ;;  %v1419_v6 = vrot.slane %v4321_v34, 2 }
 0x27e   :  { %7490 = vst [vmem:[#allocation109_spill] sm:$0xff] %v5837_v19  ;;  %4102 = vmatmul.msk.bf16.gmra.mxu3 %vm79_vm1, %v5831_v15  ;;  %v7493_v19 = vld [vmem:[#allocation14_spill] sm:$0xff] }
 0x280   :  { %4070 = vmatmul.msk.bf16.gmra.mxu2 %vm79_vm1, %v5835_v47 }
 0x281   :  { %v1980_v61 = vpop.f32.mrf.mxu3  ;;  %v1209_v37 = vpop.f32.mrf.mxu1 }
 0x282   :  { %v2092_v58 = vadd.f32 %v1980_v61, %v1846_v28  ;;  %v1210_v53 = vadd.f32 %v1209_v37, %v7491_v16  ;;  %v1420_v28 = vsel %vm1287_vm4, %v1418_v35, %v1419_v6  ;;  %v1422_v61 = vsel %vm1287_vm4, %v1419_v6, %v1421_v17  ;;  %v7494_v16 = vld [vmem:[#allocation46_spill] sm:$0xff]  ;;  %v7498_v17 = vld [vmem:[#allocation49_spill] sm:$0xff] }
 0x283   :  { %v2251_v54 = vpop.f32.mrf.mxu0  ;;  %v1739_v0 = vpop.f32.mrf.mxu2 }
 0x284   :  { %v1847_v26 = vadd.f32 %v1736_v63, %v1210_v53  ;;  %v5844_v8 = vadd.f32 %v2246_v12, %v2092_v58  ;;  %v5851_v12 = vpack.c.bf16 %v4321_v34, %v4320_v5 }
 0x286   :  { %7492 = vst [vmem:[#allocation43_spill] sm:$0xff] %v5844_v8  ;;  %4136 = vmatmul.msk.bf16.gmra.mxu0 %vm79_vm1, %v7493_v19  ;;  %v5855_v8 = vpack.c.bf16 %v1422_v61, %v1420_v28 }
 0x287   :  { %7495 = vst [vmem:[#allocation46_spill] sm:$0xff] %v5851_v12 }
 0x288   :  { %7496 = vst [vmem:[#allocation110_spill] sm:$0xff] %v5855_v8 }
 0x289   :  { %v1982_v47 = vpop.f32.mrf.mxu3  ;;  %v1212_v25 = vpop.f32.mrf.mxu1 }
 0x28a   :  { %v2093_v37 = vadd.f32 %v1982_v47, %v1847_v26  ;;  %v1213_v63 = vadd.f32 %v1212_v25, %v7494_v16 }
 0x28b   :  { %v2253_v58 = vpop.f32.mrf.mxu0  ;;  %v1741_v53 = vpop.f32.mrf.mxu2 }
 0x28c   :  { %4037 = vmatmul.msk.bf16.gmra.mxu1 %vm79_vm1, %v5831_v15  ;;  %v1848_v38 = vadd.f32 %v1739_v0, %v1213_v63  ;;  %v5857_v19 = vadd.f32 %v2248_v50, %v2093_v37  ;;  %v4322_v0 = vld [vmem:[#allocation2 + $0x2c8] sm:$0x3]  ;;  %v4323_v50 = vld [vmem:[#allocation2 + $0x2b8] sm:$0xff]  ;;  %v4324_v37 = vld [vmem:[#allocation2 + $0x2c0] sm:$0xff] }
 0x28d   :  { %v1426_v28 = vrot.slane %v4322_v0, 2  ;;  %v1423_v61 = vrot.slane %v4323_v50, 2  ;;  %v1424_v63 = vrot.slane %v4324_v37, 2 }
 0x28e   :  { %7497 = vst [vmem:[#allocation111_spill] sm:$0xff] %v5857_v19  ;;  %4103 = vmatmul.msk.bf16.gmra.mxu3 %vm79_vm1, %v5851_v12  ;;  %v7500_v19 = vld [vmem:[#allocation17_spill] sm:$0xff] }
 0x290   :  { %4071 = vmatmul.msk.bf16.gmra.mxu2 %vm79_vm1, %v5855_v8 }
 0x291   :  { %v1985_v47 = vpop.f32.mrf.mxu3  ;;  %v1214_v25 = vpop.f32.mrf.mxu1 }
 0x292   :  { %v2094_v26 = vadd.f32 %v1985_v47, %v1848_v38  ;;  %v1215_v5 = vadd.f32 %v1214_v25, %v7498_v17  ;;  %v1425_v38 = vsel %vm1287_vm4, %v1423_v61, %v1424_v63  ;;  %v1427_v47 = vsel %vm1287_vm4, %v1424_v63, %v1426_v28  ;;  %v7501_v17 = vld [vmem:[#allocation52_spill] sm:$0xff]  ;;  %v7505_v28 = vld [vmem:[#allocation55_spill] sm:$0xff] }
 0x293   :  { %v2256_v35 = vpop.f32.mrf.mxu0  ;;  %v1744_v34 = vpop.f32.mrf.mxu2 }
 0x294   :  { %v1849_v6 = vadd.f32 %v1741_v53, %v1215_v5  ;;  %v5864_v16 = vadd.f32 %v2251_v54, %v2094_v26  ;;  %v5871_v54 = vpack.c.bf16 %v4324_v37, %v4323_v50 }
 0x296   :  { %7499 = vst [vmem:[#allocation49_spill] sm:$0xff] %v5864_v16  ;;  %4137 = vmatmul.msk.bf16.gmra.mxu0 %vm79_vm1, %v7500_v19  ;;  %v5875_v16 = vpack.c.bf16 %v1427_v47, %v1425_v38 }
 0x297   :  { %7502 = vst [vmem:[#allocation52_spill] sm:$0xff] %v5871_v54 }
 0x298   :  { %7503 = vst [vmem:[#allocation112_spill] sm:$0xff] %v5875_v16 }
 0x299   :  { %v1987_v8 = vpop.f32.mrf.mxu3  ;;  %v1217_v15 = vpop.f32.mrf.mxu1 }
 0x29a   :  { %v2095_v25 = vadd.f32 %v1987_v8, %v1849_v6  ;;  %v1218_v53 = vadd.f32 %v1217_v15, %v7501_v17 }
 0x29b   :  { %v2258_v26 = vpop.f32.mrf.mxu0  ;;  %v1746_v5 = vpop.f32.mrf.mxu2 }
 0x29c   :  { %4038 = vmatmul.msk.bf16.gmra.mxu1 %vm79_vm1, %v5851_v12  ;;  %v1850_v0 = vadd.f32 %v1744_v34, %v1218_v53  ;;  %v5877_v19 = vadd.f32 %v2253_v58, %v2095_v25  ;;  %v4325_v34 = vld [vmem:[#allocation2 + $0x2e0] sm:$0x3]  ;;  %v4326_v58 = vld [vmem:[#allocation2 + $0x2d0] sm:$0xff]  ;;  %v4327_v25 = vld [vmem:[#allocation2 + $0x2d8] sm:$0xff] }
 0x29d   :  { %v1431_v38 = vrot.slane %v4325_v34, 2  ;;  %v1428_v47 = vrot.slane %v4326_v58, 2  ;;  %v1429_v53 = vrot.slane %v4327_v25, 2 }
 0x29e   :  { %7504 = vst [vmem:[#allocation113_spill] sm:$0xff] %v5877_v19  ;;  %4104 = vmatmul.msk.bf16.gmra.mxu3 %vm79_vm1, %v5871_v54  ;;  %v7507_v19 = vld [vmem:[#allocation20_spill] sm:$0xff] }
 0x2a0   :  { %4072 = vmatmul.msk.bf16.gmra.mxu2 %vm79_vm1, %v5875_v16 }
 0x2a1   :  { %v1990_v8 = vpop.f32.mrf.mxu3  ;;  %v1219_v15 = vpop.f32.mrf.mxu1 }
 0x2a2   :  { %v2096_v6 = vadd.f32 %v1990_v8, %v1850_v0  ;;  %v1220_v50 = vadd.f32 %v1219_v15, %v7505_v28  ;;  %v1430_v0 = vsel %vm1287_vm4, %v1428_v47, %v1429_v53  ;;  %v1432_v8 = vsel %vm1287_vm4, %v1429_v53, %v1431_v38  ;;  %v7508_v28 = vld [vmem:[#allocation58_spill] sm:$0xff]  ;;  %v7512_v38 = vld [vmem:[#allocation61_spill] sm:$0xff] }
 0x2a3   :  { %v2261_v61 = vpop.f32.mrf.mxu0  ;;  %v1749_v37 = vpop.f32.mrf.mxu2 }
 0x2a4   :  { %v1851_v63 = vadd.f32 %v1746_v5, %v1220_v50  ;;  %v5884_v17 = vadd.f32 %v2256_v35, %v2096_v6  ;;  %v5891_v35 = vpack.c.bf16 %v4327_v25, %v4326_v58 }
 0x2a6   :  { %7506 = vst [vmem:[#allocation55_spill] sm:$0xff] %v5884_v17  ;;  %4138 = vmatmul.msk.bf16.gmra.mxu0 %vm79_vm1, %v7507_v19  ;;  %v5895_v17 = vpack.c.bf16 %v1432_v8, %v1430_v0 }
 0x2a7   :  { %7509 = vst [vmem:[#allocation58_spill] sm:$0xff] %v5891_v35 }
 0x2a8   :  { %7510 = vst [vmem:[#allocation114_spill] sm:$0xff] %v5895_v17 }
 0x2a9   :  { %v1992_v16 = vpop.f32.mrf.mxu3  ;;  %v1222_v12 = vpop.f32.mrf.mxu1 }
 0x2aa   :  { %v2097_v15 = vadd.f32 %v1992_v16, %v1851_v63  ;;  %v1223_v5 = vadd.f32 %v1222_v12, %v7508_v28 }
 0x2ab   :  { %v2263_v6 = vpop.f32.mrf.mxu0  ;;  %v1751_v50 = vpop.f32.mrf.mxu2 }
 0x2ac   :  { %4039 = vmatmul.msk.bf16.gmra.mxu1 %vm79_vm1, %v5871_v54  ;;  %v1852_v34 = vadd.f32 %v1749_v37, %v1223_v5  ;;  %v5897_v19 = vadd.f32 %v2258_v26, %v2097_v15  ;;  %v4328_v37 = vld [vmem:[#allocation2 + $0x2f8] sm:$0x3]  ;;  %v4329_v26 = vld [vmem:[#allocation2 + $0x2e8] sm:$0xff]  ;;  %v4330_v15 = vld [vmem:[#allocation2 + $0x2f0] sm:$0xff] }
 0x2ad   :  { %v1436_v0 = vrot.slane %v4328_v37, 2  ;;  %v1433_v8 = vrot.slane %v4329_v26, 2  ;;  %v1434_v5 = vrot.slane %v4330_v15, 2 }
 0x2ae   :  { %7511 = vst [vmem:[#allocation115_spill] sm:$0xff] %v5897_v19  ;;  %4105 = vmatmul.msk.bf16.gmra.mxu3 %vm79_vm1, %v5891_v35  ;;  %v7514_v19 = vld [vmem:[#allocation27_spill] sm:$0xff] }
 0x2b0   :  { %4073 = vmatmul.msk.bf16.gmra.mxu2 %vm79_vm1, %v5895_v17 }
 0x2b1   :  { %v1995_v16 = vpop.f32.mrf.mxu3  ;;  %v1224_v12 = vpop.f32.mrf.mxu1 }
 0x2b2   :  { %v2098_v63 = vadd.f32 %v1995_v16, %v1852_v34  ;;  %v1225_v58 = vadd.f32 %v1224_v12, %v7512_v38  ;;  %v1435_v34 = vsel %vm1287_vm4, %v1433_v8, %v1434_v5  ;;  %v1437_v16 = vsel %vm1287_vm4, %v1434_v5, %v1436_v0  ;;  %v7515_v38 = vld [vmem:[#allocation64_spill] sm:$0xff] }
 0x2b3   :  { %v2266_v47 = vpop.f32.mrf.mxu0  ;;  %v1754_v25 = vpop.f32.mrf.mxu2 }
 0x2b4   :  { %v1853_v53 = vadd.f32 %v1751_v50, %v1225_v58  ;;  %v5904_v28 = vadd.f32 %v2261_v61, %v2098_v63  ;;  %v5911_v61 = vpack.c.bf16 %v4330_v15, %v4329_v26  ;;  %v7519_v26 = vld [vmem:[#allocation67_spill] sm:$0xff] }
 0x2b6   :  { %7513 = vst [vmem:[#allocation61_spill] sm:$0xff] %v5904_v28  ;;  %4139 = vmatmul.msk.bf16.gmra.mxu0 %vm79_vm1, %v7514_v19  ;;  %v5915_v28 = vpack.c.bf16 %v1437_v16, %v1435_v34  ;;  %v4331_v16 = vld [vmem:[#allocation2 + $0x310] sm:$0x3] }
 0x2b7   :  { %7516 = vst [vmem:[#allocation64_spill] sm:$0xff] %v5911_v61 }
 0x2b8   :  { %7517 = vst [vmem:[#allocation116_spill] sm:$0xff] %v5915_v28 }
 0x2b9   :  { %v1997_v17 = vpop.f32.mrf.mxu3  ;;  %v1227_v54 = vpop.f32.mrf.mxu1 }
 0x2ba   :  { %v2099_v12 = vadd.f32 %v1997_v17, %v1853_v53  ;;  %v1228_v50 = vadd.f32 %v1227_v54, %v7515_v38  ;;  %v77_v53 = vld [vmem:[%s7214_s0 + $0x1f0] sm:$0xff]  ;;  %v4332_v38 = vld [vmem:[#allocation2 + $0x300] sm:$0xff] }
 0x2bb   :  { %v2268_v63 = vpop.f32.mrf.mxu0  ;;  %v1756_v58 = vpop.f32.mrf.mxu2  ;;  %252 = vst.msk [vmem:[#allocation2 + $0x331] sm:$0xff] %vm79_vm1, %v77_v53 }
 0x2bc   :  { %4040 = vmatmul.msk.bf16.gmra.mxu1 %vm79_vm1, %v5891_v35  ;;  %v1854_v37 = vadd.f32 %v1754_v25, %v1228_v50  ;;  %v5917_v19 = vadd.f32 %v2263_v6, %v2099_v12  ;;  %v78_v25 = vld [vmem:[%s7214_s0 + $0x1f8] sm:$0xff]  ;;  %v1441_v12 = vrot.slane %v4331_v16, 2  ;;  %v1438_v50 = vrot.slane %v4332_v38, 2  ;;  %v7521_v35 = vld [vmem:[#allocation34_spill] sm:$0xff] }
 0x2bd   :  { %253 = vst.msk [vmem:[#allocation2 + $0x339] sm:$0xff] %vm79_vm1, %v78_v25  ;;  %v7522_v25 = vld [vmem:[#allocation70_spill] sm:$0xff] }
 0x2be   :  { %7518 = vst [vmem:[#allocation117_spill] sm:$0xff] %v5917_v19  ;;  %4106 = vmatmul.msk.bf16.gmra.mxu3 %vm79_vm1, %v5911_v61  ;;  %v4333_v19 = vld [vmem:[#allocation2 + $0x308] sm:$0xff] }
 0x2c0   :  { %4074 = vmatmul.msk.bf16.gmra.mxu2 %vm79_vm1, %v5915_v28  ;;  %v1439_v28 = vrot.slane %v4333_v19, 2 }
 0x2c1   :  { %v2000_v17 = vpop.f32.mrf.mxu3  ;;  %v1229_v54 = vpop.f32.mrf.mxu1 }
 0x2c2   :  { %v2100_v0 = vadd.f32 %v2000_v17, %v1854_v37  ;;  %v1230_v6 = vadd.f32 %v1229_v54, %v7519_v26  ;;  %v1440_v54 = vsel %vm1287_vm4, %v1438_v50, %v1439_v28  ;;  %v1442_v53 = vsel %vm1287_vm4, %v1439_v28, %v1441_v12  ;;  %v7525_v12 = vld [vmem:[#allocation73_spill] sm:$0xff] }
 0x2c3   :  { %v2271_v8 = vpop.f32.mrf.mxu0  ;;  %v1759_v15 = vpop.f32.mrf.mxu2 }
 0x2c4   :  { %v1855_v5 = vadd.f32 %v1756_v58, %v1230_v6  ;;  %v5932_v34 = vadd.f32 %v2266_v47, %v2100_v0  ;;  %v5939_v47 = vpack.c.bf16 %v4333_v19, %v4332_v38  ;;  %v358_v33 = vld [vmem:[#allocation2 + $0x340] sm:$0x3] }
 0x2c5   :  { %v2138_v41 = vrot.slane %v358_v33, 1 }
 0x2c6   :  { %7520 = vst [vmem:[#allocation67_spill] sm:$0xff] %v5932_v34  ;;  %4140 = vmatmul.msk.bf16.gmra.mxu0 %vm79_vm1, %v7521_v35  ;;  %v5943_v34 = vpack.c.bf16 %v1442_v53, %v1440_v54 }
 0x2c8   :  { %7523 = vst [vmem:[#allocation70_spill] sm:$0xff] %v5943_v34 }
 0x2c9   :  { %v2002_v37 = vpop.f32.mrf.mxu3  ;;  %v1232_v17 = vpop.f32.mrf.mxu1 }
 0x2ca   :  { %v2101_v26 = vadd.f32 %v2002_v37, %v1855_v5  ;;  %v1233_v58 = vadd.f32 %v1232_v17, %v7522_v25 }
 0x2cb   :  { %v2273_v0 = vpop.f32.mrf.mxu0  ;;  %v1761_v6 = vpop.f32.mrf.mxu2 }
 0x2cc   :  { %4041 = vmatmul.msk.bf16.gmra.mxu1 %vm79_vm1, %v5911_v61  ;;  %v1856_v16 = vadd.f32 %v1759_v15, %v1233_v58  ;;  %v5945_v35 = vadd.f32 %v2268_v63, %v2101_v26  ;;  %v4334_v15 = vld [vmem:[#allocation2 + $0x328] sm:$0x3]  ;;  %v4335_v63 = vld [vmem:[#allocation2 + $0x318] sm:$0xff]  ;;  %v4336_v26 = vld [vmem:[#allocation2 + $0x320] sm:$0xff] }
 0x2cd   :  { %v1446_v54 = vrot.slane %v4334_v15, 2  ;;  %v1443_v53 = vrot.slane %v4335_v63, 2  ;;  %v1444_v58 = vrot.slane %v4336_v26, 2  ;;  %v357_v61 = vld [vmem:[#allocation2 + $0x338] sm:$0xff] }
 0x2ce   :  { %7524 = vst [vmem:[#allocation118_spill] sm:$0xff] %v5945_v35  ;;  %4107 = vmatmul.msk.bf16.gmra.mxu3 %vm79_vm1, %v5939_v47  ;;  %v7527_v35 = vld [vmem:[#allocation41_spill] sm:$0xff]  ;;  %v2136_v36 = vrot.slane %v357_v61, 1 }
 0x2d0   :  { %4075 = vmatmul.msk.bf16.gmra.mxu2 %vm79_vm1, %v5943_v34  ;;  %v356_v34 = vld [vmem:[#allocation2 + $0x330] sm:$0xff] }
 0x2d1   :  { %v2005_v28 = vpop.f32.mrf.mxu3  ;;  %v1234_v5 = vpop.f32.mrf.mxu1  ;;  %v2135_v11 = vrot.slane %v356_v34, 1 }
 0x2d2   :  { %v2102_v19 = vadd.f32 %v2005_v28, %v1856_v16  ;;  %v1235_v38 = vadd.f32 %v1234_v5, %v7525_v12  ;;  %v1445_v5 = vsel %vm1287_vm4, %v1443_v53, %v1444_v58 }
 0x2d3   :  { %v2276_v50 = vpop.f32.mrf.mxu0  ;;  %v1764_v37 = vpop.f32.mrf.mxu2 }
 0x2d4   :  { %v1857_v17 = vadd.f32 %v1761_v6, %v1235_v38  ;;  %v5952_v25 = vadd.f32 %v2271_v8, %v2102_v19  ;;  %v1447_v6 = vsel %vm1287_vm4, %v1444_v58, %v1446_v54  ;;  %v7528_v19 = vld [vmem:[#allocation76_spill] sm:$0xff]  ;;  %v5959_v38 = vpack.c.bf16 %v4336_v26, %v4335_v63  ;;  %v7529_v26 = vld [vmem:[#allocation79_spill] sm:$0xff] }
 0x2d5   :  { %v5963_v10 = vpack.c.bf16 %v1447_v6, %v1445_v5  ;;  %v2139_v54 = vsel %vm491_vm3, %v2136_v36, %v2138_v41  ;;  %v7530_v6 = vld [vmem:[#allocation82_spill] sm:$0xff] }
 0x2d6   :  { %7526 = vst [vmem:[#allocation73_spill] sm:$0xff] %v5952_v25  ;;  %4141 = vmatmul.msk.bf16.gmra.mxu0 %vm79_vm1, %v7527_v35 }
 0x2d9   :  { %v2007_v16 = vpop.f32.mrf.mxu3  ;;  %v1237_v28 = vpop.f32.mrf.mxu1 }
 0x2da   :  { %v2103_v8 = vadd.f32 %v2007_v16, %v1857_v17  ;;  %v1238_v12 = vadd.f32 %v1237_v28, %v7528_v19  ;;  %v2137_v17 = vsel %vm491_vm3, %v2135_v11, %v2136_v36  ;;  %v5981_v19 = vpack.c.bf16 %v357_v61, %v356_v34 }
 0x2db   :  { %v2278_v15 = vpop.f32.mrf.mxu0  ;;  %v1766_v25 = vpop.f32.mrf.mxu2 }
 0x2dc   :  { %4042 = vmatmul.msk.bf16.gmra.mxu1 %vm79_vm1, %v5939_v47  ;;  %v1858_v35 = vadd.f32 %v1764_v37, %v1238_v12  ;;  %v5965_v32 = vadd.f32 %v2273_v0, %v2103_v8  ;;  %v5974_v37 = vpack.c.bf16 %v2139_v54, %v2137_v17 }
 0x2de   :  { %4108 = vmatmul.msk.bf16.gmra.mxu3 %vm79_vm1, %v5959_v38 }
 0x2e0   :  { %4076 = vmatmul.msk.bf16.gmra.mxu2 %vm79_vm1, %v5963_v10 }
 0x2e1   :  { %v2010_v63 = vpop.f32.mrf.mxu3  ;;  %v1239_v33 = vpop.f32.mrf.mxu1 }
 0x2e2   :  { %v2104_v53 = vadd.f32 %v2010_v63, %v1858_v35  ;;  %v1240_v58 = vadd.f32 %v1239_v33, %v7529_v26 }
 0x2e3   :  { %v2281_v16 = vpop.f32.mrf.mxu0  ;;  %v1769_v0 = vpop.f32.mrf.mxu2 }
 0x2e4   :  { %v1859_v28 = vadd.f32 %v1766_v25, %v1240_v58  ;;  %v5976_v5 = vadd.f32 %v2276_v50, %v2104_v53  ;;  %v7532_v50 = vld [vmem:[#allocation48_spill] sm:$0xff] }
 0x2e5   :  { %v7533_v53 = vld [vmem:[#allocation84_spill] sm:$0xff] }
 0x2e6   :  { %4142 = vmatmul.msk.bf16.gmra.mxu0 %vm79_vm1, %v5974_v37 }
 0x2e9   :  { %v2012_v11 = vpop.f32.mrf.mxu3  ;;  %v1242_v41 = vpop.f32.mrf.mxu1 }
 0x2ea   :  { %v2105_v36 = vadd.f32 %v2012_v11, %v1859_v28  ;;  %v1243_v8 = vadd.f32 %v1242_v41, %v7530_v6  ;;  %v7535_v11 = vld [vmem:[#allocation50_spill] sm:$0xff] }
 0x2eb   :  { %v2283_v35 = vpop.f32.mrf.mxu0  ;;  %v1771_v12 = vpop.f32.mrf.mxu2 }
 0x2ec   :  { %4043 = vmatmul.msk.bf16.gmra.mxu1 %vm79_vm1, %v5959_v38  ;;  %v1860_v17 = vadd.f32 %v1769_v0, %v1243_v8  ;;  %v5985_v54 = vadd.f32 %v2278_v15, %v2105_v36  ;;  %v7536_v36 = vld [vmem:[#allocation45_spill] sm:$0xff] }
 0x2ee   :  { %7531 = vst [vmem:[#allocation76_spill] sm:$0xff] %v5985_v54  ;;  %4109 = vmatmul.msk.bf16.gmra.mxu3 %vm79_vm1, %v5981_v19  ;;  %v7537_v54 = vld [vmem:[#allocation44_spill] sm:$0xff] }
 0x2f0   :  { %4177 = vmatmul.msk.bf16.vlgmr.msra.gmra.mxu2 %vm79_vm1, %v7532_v50 }
 0x2f1   :  { %v2015_v25 = vpop.f32.mrf.mxu3  ;;  %v1244_v63 = vpop.f32.mrf.mxu1 }
 0x2f2   :  { %v2106_v33 = vadd.f32 %v2015_v25, %v1860_v17  ;;  %v1245_v61 = vadd.f32 %v1244_v63, %v7533_v53  ;;  %v7539_v63 = vld [vmem:[#allocation12_spill] sm:$0xff] }
 0x2f3   :  { %v2286_v34 = vpop.f32.mrf.mxu0  ;;  %v1774_v26 = vpop.f32.mrf.mxu2 }
 0x2f4   :  { %v1861_v58 = vadd.f32 %v1771_v12, %v1245_v61  ;;  %v5992_v28 = vadd.f32 %v2281_v16, %v2106_v33  ;;  %v7540_v16 = vld [vmem:[#allocation54_spill] sm:$0xff]  ;;  %v7541_v61 = vld [vmem:[#allocation47_spill] sm:$0xff] }
 0x2f6   :  { %7534 = vst [vmem:[#allocation79_spill] sm:$0xff] %v5992_v28  ;;  %4243 = vmatmul.msk.bf16.vlgmr.msra.gmra.mxu0 %vm79_vm1, %v7535_v11 }
 0x2f9   :  { %v2017_v15 = vpop.f32.mrf.mxu3  ;;  %v1247_v0 = vpop.f32.mrf.mxu1 }
 0x2fa   :  { %v2107_v41 = vadd.f32 %v2017_v15, %v1861_v58  ;;  %v1248_v6 = vadd.f32 %v1247_v0, %v7536_v36 }
 0x2fb   :  { %v2288_v8 = vpop.f32.mrf.mxu0  ;;  %v1776_v50 = vpop.f32.mrf.mxu2 }
 0x2fc   :  { %4144 = vmatmul.msk.bf16.vlgmr.msra.gmra.mxu1 %vm79_vm1, %v7537_v54  ;;  %v1862_v17 = vadd.f32 %v1774_v26, %v1248_v6  ;;  %v5999_v25 = vadd.f32 %v2283_v35, %v2107_v41  ;;  %v7543_v54 = vld [vmem:[#allocation56_spill] sm:$0xff]  ;;  %v7544_v6 = vld [vmem:[#allocation51_spill] sm:$0xff] }
 0x2fe   :  { %7538 = vst [vmem:[#allocation82_spill] sm:$0xff] %v5999_v25  ;;  %4210 = vmatmul.msk.bf16.vlgmr.msra.gmra.mxu3 %vm79_vm1, %v7539_v63 }
 0x300   :  { %4178 = vmatmul.msk.bf16.gmra.mxu2 %vm79_vm1, %v7540_v16 }
 0x301   :  { %v2020_v12 = vpop.f32.mrf.mxu3  ;;  %v1249_v33 = vpop.f32.mrf.mxu1 }
 0x302   :  { %v2108_v53 = vadd.f32 %v2020_v12, %v1862_v17  ;;  %v1250_v58 = vadd.f32 %v1249_v33, %v7541_v61  ;;  %v7546_v33 = vld [vmem:[#allocation16_spill] sm:$0xff] }
 0x303   :  { %v2291_v15 = vpop.f32.mrf.mxu0  ;;  %v1779_v0 = vpop.f32.mrf.mxu2 }
 0x304   :  { %v1863_v36 = vadd.f32 %v1776_v50, %v1250_v58  ;;  %v6006_v28 = vadd.f32 %v2286_v34, %v2108_v53  ;;  %v7547_v34 = vld [vmem:[#allocation60_spill] sm:$0xff]  ;;  %v7548_v58 = vld [vmem:[#allocation53_spill] sm:$0xff] }
 0x306   :  { %7542 = vst [vmem:[#allocation48_spill] sm:$0xff] %v6006_v28  ;;  %4244 = vmatmul.msk.bf16.gmra.mxu0 %vm79_vm1, %v7543_v54 }
 0x309   :  { %v2022_v35 = vpop.f32.mrf.mxu3  ;;  %v1252_v26 = vpop.f32.mrf.mxu1 }
 0x30a   :  { %v2109_v41 = vadd.f32 %v2022_v35, %v1863_v36  ;;  %v1253_v63 = vadd.f32 %v1252_v26, %v7544_v6 }
 0x30b   :  { %v2293_v25 = vpop.f32.mrf.mxu0  ;;  %v1781_v16 = vpop.f32.mrf.mxu2 }
 0x30c   :  { %4145 = vmatmul.msk.bf16.gmra.mxu1 %vm79_vm1, %v7535_v11  ;;  %v1864_v17 = vadd.f32 %v1779_v0, %v1253_v63  ;;  %v6013_v12 = vadd.f32 %v2288_v8, %v2109_v41  ;;  %v7550_v11 = vld [vmem:[#allocation62_spill] sm:$0xff]  ;;  %v7551_v63 = vld [vmem:[#allocation57_spill] sm:$0xff] }
 0x30e   :  { %7545 = vst [vmem:[#allocation84_spill] sm:$0xff] %v6013_v12  ;;  %4211 = vmatmul.msk.bf16.gmra.mxu3 %vm79_vm1, %v7546_v33 }
 0x310   :  { %4179 = vmatmul.msk.bf16.gmra.mxu2 %vm79_vm1, %v7547_v34 }
 0x311   :  { %v2025_v50 = vpop.f32.mrf.mxu3  ;;  %v1254_v53 = vpop.f32.mrf.mxu1 }
 0x312   :  { %v2110_v61 = vadd.f32 %v2025_v50, %v1864_v17  ;;  %v1255_v36 = vadd.f32 %v1254_v53, %v7548_v58  ;;  %v7553_v53 = vld [vmem:[#allocation19_spill] sm:$0xff] }
 0x313   :  { %v2296_v35 = vpop.f32.mrf.mxu0  ;;  %v1784_v26 = vpop.f32.mrf.mxu2 }
 0x314   :  { %v1865_v6 = vadd.f32 %v1781_v16, %v1255_v36  ;;  %v6020_v28 = vadd.f32 %v2291_v15, %v2110_v61  ;;  %v7554_v15 = vld [vmem:[#allocation66_spill] sm:$0xff]  ;;  %v7555_v36 = vld [vmem:[#allocation59_spill] sm:$0xff] }
 0x316   :  { %7549 = vst [vmem:[#allocation50_spill] sm:$0xff] %v6020_v28  ;;  %4245 = vmatmul.msk.bf16.gmra.mxu0 %vm79_vm1, %v7550_v11 }
 0x319   :  { %v2027_v8 = vpop.f32.mrf.mxu3  ;;  %v1257_v0 = vpop.f32.mrf.mxu1 }
 0x31a   :  { %v2111_v41 = vadd.f32 %v2027_v8, %v1865_v6  ;;  %v1258_v33 = vadd.f32 %v1257_v0, %v7551_v63 }
 0x31b   :  { %v2298_v12 = vpop.f32.mrf.mxu0  ;;  %v1786_v34 = vpop.f32.mrf.mxu2 }
 0x31c   :  { %4146 = vmatmul.msk.bf16.gmra.mxu1 %vm79_vm1, %v7543_v54  ;;  %v1866_v17 = vadd.f32 %v1784_v26, %v1258_v33  ;;  %v6027_v50 = vadd.f32 %v2293_v25, %v2111_v41  ;;  %v7557_v54 = vld [vmem:[#allocation68_spill] sm:$0xff]  ;;  %v7558_v33 = vld [vmem:[#allocation63_spill] sm:$0xff] }
 0x31e   :  { %7552 = vst [vmem:[#allocation45_spill] sm:$0xff] %v6027_v50  ;;  %4212 = vmatmul.msk.bf16.gmra.mxu3 %vm79_vm1, %v7553_v53 }
 0x320   :  { %4180 = vmatmul.msk.bf16.gmra.mxu2 %vm79_vm1, %v7554_v15 }
 0x321   :  { %v2030_v16 = vpop.f32.mrf.mxu3  ;;  %v1259_v61 = vpop.f32.mrf.mxu1 }
 0x322   :  { %v2112_v58 = vadd.f32 %v2030_v16, %v1866_v17  ;;  %v1260_v6 = vadd.f32 %v1259_v61, %v7555_v36  ;;  %v7560_v61 = vld [vmem:[#allocation25_spill] sm:$0xff] }
 0x323   :  { %v2301_v8 = vpop.f32.mrf.mxu0  ;;  %v1789_v0 = vpop.f32.mrf.mxu2 }
 0x324   :  { %v1867_v63 = vadd.f32 %v1786_v34, %v1260_v6  ;;  %v6034_v28 = vadd.f32 %v2296_v35, %v2112_v58  ;;  %v7561_v35 = vld [vmem:[#allocation72_spill] sm:$0xff]  ;;  %v7562_v6 = vld [vmem:[#allocation65_spill] sm:$0xff] }
 0x326   :  { %7556 = vst [vmem:[#allocation44_spill] sm:$0xff] %v6034_v28  ;;  %4246 = vmatmul.msk.bf16.gmra.mxu0 %vm79_vm1, %v7557_v54 }
 0x329   :  { %v2032_v25 = vpop.f32.mrf.mxu3  ;;  %v1262_v26 = vpop.f32.mrf.mxu1 }
 0x32a   :  { %v2113_v41 = vadd.f32 %v2032_v25, %v1867_v63  ;;  %v1263_v53 = vadd.f32 %v1262_v26, %v7558_v33 }
 0x32b   :  { %v2303_v50 = vpop.f32.mrf.mxu0  ;;  %v1791_v15 = vpop.f32.mrf.mxu2 }
 0x32c   :  { %4147 = vmatmul.msk.bf16.gmra.mxu1 %vm79_vm1, %v7550_v11  ;;  %v1868_v17 = vadd.f32 %v1789_v0, %v1263_v53  ;;  %v6041_v16 = vadd.f32 %v2298_v12, %v2113_v41  ;;  %v7564_v11 = vld [vmem:[#allocation74_spill] sm:$0xff]  ;;  %v7565_v53 = vld [vmem:[#allocation69_spill] sm:$0xff] }
 0x32e   :  { %7559 = vst [vmem:[#allocation12_spill] sm:$0xff] %v6041_v16  ;;  %4213 = vmatmul.msk.bf16.gmra.mxu3 %vm79_vm1, %v7560_v61 }
 0x330   :  { %4181 = vmatmul.msk.bf16.gmra.mxu2 %vm79_vm1, %v7561_v35 }
 0x331   :  { %v2035_v34 = vpop.f32.mrf.mxu3  ;;  %v1264_v58 = vpop.f32.mrf.mxu1 }
 0x332   :  { %v2114_v36 = vadd.f32 %v2035_v34, %v1868_v17  ;;  %v1265_v63 = vadd.f32 %v1264_v58, %v7562_v6  ;;  %v7567_v58 = vld [vmem:[#allocation32_spill] sm:$0xff] }
 0x333   :  { %v2306_v25 = vpop.f32.mrf.mxu0  ;;  %v1794_v26 = vpop.f32.mrf.mxu2 }
 0x334   :  { %v1869_v33 = vadd.f32 %v1791_v15, %v1265_v63  ;;  %v6048_v28 = vadd.f32 %v2301_v8, %v2114_v36  ;;  %v7568_v8 = vld [vmem:[#allocation78_spill] sm:$0xff]  ;;  %v7569_v63 = vld [vmem:[#allocation71_spill] sm:$0xff] }
 0x336   :  { %7563 = vst [vmem:[#allocation54_spill] sm:$0xff] %v6048_v28  ;;  %4247 = vmatmul.msk.bf16.gmra.mxu0 %vm79_vm1, %v7564_v11 }
 0x339   :  { %v2037_v12 = vpop.f32.mrf.mxu3  ;;  %v1267_v0 = vpop.f32.mrf.mxu1 }
 0x33a   :  { %v2115_v41 = vadd.f32 %v2037_v12, %v1869_v33  ;;  %v1268_v61 = vadd.f32 %v1267_v0, %v7565_v53 }
 0x33b   :  { %v2308_v16 = vpop.f32.mrf.mxu0  ;;  %v1796_v35 = vpop.f32.mrf.mxu2 }
 0x33c   :  { %4148 = vmatmul.msk.bf16.gmra.mxu1 %vm79_vm1, %v7557_v54  ;;  %v1870_v17 = vadd.f32 %v1794_v26, %v1268_v61  ;;  %v6055_v34 = vadd.f32 %v2303_v50, %v2115_v41  ;;  %v7571_v54 = vld [vmem:[#allocation80_spill] sm:$0xff]  ;;  %v7572_v61 = vld [vmem:[#allocation75_spill] sm:$0xff] }
 0x33e   :  { %7566 = vst [vmem:[#allocation47_spill] sm:$0xff] %v6055_v34  ;;  %4214 = vmatmul.msk.bf16.gmra.mxu3 %vm79_vm1, %v7567_v58 }
 0x340   :  { %4182 = vmatmul.msk.bf16.gmra.mxu2 %vm79_vm1, %v7568_v8 }
 0x341   :  { %v2040_v15 = vpop.f32.mrf.mxu3  ;;  %v1269_v36 = vpop.f32.mrf.mxu1 }
 0x342   :  { %v2116_v6 = vadd.f32 %v2040_v15, %v1870_v17  ;;  %v1270_v33 = vadd.f32 %v1269_v36, %v7569_v63  ;;  %v7574_v36 = vld [vmem:[#allocation39_spill] sm:$0xff]  ;;  %v7575_v63 = vld [vmem:[#allocation77_spill] sm:$0xff] }
 0x343   :  { %v2311_v12 = vpop.f32.mrf.mxu0  ;;  %v1799_v0 = vpop.f32.mrf.mxu2 }
 0x344   :  { %v1871_v53 = vadd.f32 %v1796_v35, %v1270_v33  ;;  %v6062_v28 = vadd.f32 %v2306_v25, %v2116_v6 }
 0x346   :  { %7570 = vst [vmem:[#allocation56_spill] sm:$0xff] %v6062_v28  ;;  %4248 = vmatmul.msk.bf16.gmra.mxu0 %vm79_vm1, %v7571_v54  ;;  %v4341_v28 = vld [vmem:[#allocation2 + $0x338] sm:$0xff] }
 0x349   :  { %v2042_v50 = vpop.f32.mrf.mxu3  ;;  %v1272_v26 = vpop.f32.mrf.mxu1 }
 0x34a   :  { %v2117_v41 = vadd.f32 %v2042_v50, %v1871_v53  ;;  %v1273_v58 = vadd.f32 %v1272_v26, %v7572_v61 }
 0x34b   :  { %v2313_v34 = vpop.f32.mrf.mxu0  ;;  %v1801_v8 = vpop.f32.mrf.mxu2 }
 0x34c   :  { %4149 = vmatmul.msk.bf16.gmra.mxu1 %vm79_vm1, %v7564_v11  ;;  %v1872_v17 = vadd.f32 %v1799_v0, %v1273_v58  ;;  %v6069_v15 = vadd.f32 %v2308_v16, %v2117_v41  ;;  %v7577_v11 = vld [vmem:[#allocation85_spill] sm:$0xff] }
 0x34d   :  { %v7578_v58 = vld [vmem:[#allocation81_spill] sm:$0xff] }
 0x34e   :  { %7573 = vst [vmem:[#allocation51_spill] sm:$0xff] %v6069_v15  ;;  %4215 = vmatmul.msk.bf16.gmra.mxu3 %vm79_vm1, %v7574_v36 }
 0x350   :  { %4183 = vmatmul.msk.bf16.gmra.mxu2 %vm79_vm1, %v5454_v14 }
 0x351   :  { %v2045_v25 = vpop.f32.mrf.mxu3  ;;  %v1274_v35 = vpop.f32.mrf.mxu1 }
 0x352   :  { %v2118_v6 = vadd.f32 %v2045_v25, %v1872_v17  ;;  %v1275_v33 = vadd.f32 %v1274_v35, %v7575_v63  ;;  %v7580_v35 = vld [vmem:[#allocation6_spill] sm:$0xff]  ;;  %v7581_v63 = vld [vmem:[#allocation83_spill] sm:$0xff] }
 0x353   :  { %v2316_v53 = vpop.f32.mrf.mxu0  ;;  %v1804_v50 = vpop.f32.mrf.mxu2 }
 0x354   :  { %v1873_v26 = vadd.f32 %v1801_v8, %v1275_v33  ;;  %v6076_v61 = vadd.f32 %v2311_v12, %v2118_v6 }
 0x356   :  { %7576 = vst [vmem:[#allocation16_spill] sm:$0xff] %v6076_v61  ;;  %4249 = vmatmul.msk.bf16.gmra.mxu0 %vm79_vm1, %v7577_v11 }
 0x359   :  { %v2047_v16 = vpop.f32.mrf.mxu3  ;;  %v1277_v0 = vpop.f32.mrf.mxu1 }
 0x35a   :  { %v2119_v41 = vadd.f32 %v2047_v16, %v1873_v26  ;;  %v1278_v36 = vadd.f32 %v1277_v0, %v7578_v58 }
 0x35b   :  { %v2318_v15 = vpop.f32.mrf.mxu0  ;;  %v1806_v14 = vpop.f32.mrf.mxu2 }
 0x35c   :  { %4150 = vmatmul.msk.bf16.gmra.mxu1 %vm79_vm1, %v7571_v54  ;;  %v1874_v17 = vadd.f32 %v1804_v50, %v1278_v36  ;;  %v6083_v25 = vadd.f32 %v2313_v34, %v2119_v41  ;;  %v7583_v41 = vld [vmem:[#allocation86_spill] sm:$0xff] }
 0x35e   :  { %7579 = vst [vmem:[#allocation60_spill] sm:$0xff] %v6083_v25  ;;  %4216 = vmatmul.msk.bf16.gmra.mxu3 %vm79_vm1, %v7580_v35 }
 0x360   :  { %4184 = vmatmul.msk.bf16.gmra.mxu2 %vm79_vm1, %v5479_v21 }
 0x361   :  { %v2050_v12 = vpop.f32.mrf.mxu3  ;;  %v1279_v8 = vpop.f32.mrf.mxu1 }
 0x362   :  { %v2120_v6 = vadd.f32 %v2050_v12, %v1874_v17  ;;  %v1280_v33 = vadd.f32 %v1279_v8, %v7581_v63  ;;  %v7585_v8 = vld [vmem:[#allocation9_spill] sm:$0xff]  ;;  %v7586_v63 = vld [vmem:[#allocation87_spill] sm:$0xff] }
 0x363   :  { %v2321_v26 = vpop.f32.mrf.mxu0  ;;  %v1809_v16 = vpop.f32.mrf.mxu2 }
 0x364   :  { %v1875_v0 = vadd.f32 %v1806_v14, %v1280_v33  ;;  %v6090_v58 = vadd.f32 %v2316_v53, %v2120_v6 }
 0x366   :  { %7582 = vst [vmem:[#allocation53_spill] sm:$0xff] %v6090_v58  ;;  %4250 = vmatmul.msk.bf16.gmra.mxu0 %vm79_vm1, %v5483_v9 }
 0x369   :  { %v2052_v34 = vpop.f32.mrf.mxu3  ;;  %v1282_v54 = vpop.f32.mrf.mxu1 }
 0x36a   :  { %v2121_v50 = vadd.f32 %v2052_v34, %v1875_v0  ;;  %v1283_v36 = vadd.f32 %v1282_v54, %v7583_v41 }
 0x36b   :  { %v2323_v35 = vpop.f32.mrf.mxu0  ;;  %v1811_v21 = vpop.f32.mrf.mxu2 }
 0x36c   :  { %4151 = vmatmul.msk.bf16.gmra.mxu1 %vm79_vm1, %v7577_v11  ;;  %v1876_v17 = vadd.f32 %v1809_v16, %v1283_v36  ;;  %v6097_v12 = vadd.f32 %v2318_v15, %v2121_v50 }
 0x36e   :  { %7584 = vst [vmem:[#allocation62_spill] sm:$0xff] %v6097_v12  ;;  %4217 = vmatmul.msk.bf16.gmra.mxu3 %vm79_vm1, %v7585_v8  ;;  %v7589_v8 = vld [vmem:[#allocation13_spill] sm:$0xff] }
 0x370   :  { %4185 = vmatmul.msk.bf16.gmra.mxu2 %vm79_vm1, %v5502_v30 }
 0x371   :  { %v2055_v53 = vpop.f32.mrf.mxu3  ;;  %v1284_v14 = vpop.f32.mrf.mxu1 }
 0x372   :  { %v2122_v6 = vadd.f32 %v2055_v53, %v1876_v17  ;;  %v1285_v33 = vadd.f32 %v1284_v14, %v7586_v63 }
 0x373   :  { %v3198_v0 = vpop.f32.mrf.mxu0  ;;  %v2672_v34 = vpop.f32.mrf.mxu2 }
 0x374   :  { %v1877_v54 = vadd.f32 %v1811_v21, %v1285_v33  ;;  %v6104_v41 = vadd.f32 %v2321_v26, %v2122_v6 }
 0x376   :  { %7587 = vst [vmem:[#allocation57_spill] sm:$0xff] %v6104_v41  ;;  %4251 = vmatmul.msk.bf16.gmra.mxu0 %vm79_vm1, %v5506_v59 }
 0x379   :  { %v2057_v15 = vpop.f32.mrf.mxu3  ;;  %v2426_v11 = vpop.f32.mrf.mxu1 }
 0x37a   :  { %v2123_v16 = vadd.f32 %v2057_v15, %v1877_v54  ;;  %v2586_v30 = vadd.f32 %v2426_v11, %v5490_v51 }
 0x37b   :  { %v3200_v50 = vpop.f32.mrf.mxu0  ;;  %v2674_v36 = vpop.f32.mrf.mxu2 }
 0x37c   :  { %4152 = vmatmul.msk.bf16.gmra.mxu1 %vm79_vm1, %v5483_v9  ;;  %v6111_v17 = vadd.f32 %v2323_v35, %v2123_v16  ;;  %v2832_v26 = vadd.f32 %v2672_v34, %v2586_v30 }
 0x37e   :  { %7588 = vst [vmem:[#allocation19_spill] sm:$0xff] %v6111_v17  ;;  %4218 = vmatmul.msk.bf16.gmra.mxu3 %vm79_vm1, %v7589_v8 }
 0x380   :  { %4186 = vmatmul.msk.bf16.gmra.mxu2 %vm79_vm1, %v5527_v27 }
 0x381   :  { %v2938_v21 = vpop.f32.mrf.mxu3  ;;  %v2428_v53 = vpop.f32.mrf.mxu1 }
 0x382   :  { %v3098_v14 = vadd.f32 %v2938_v21, %v2832_v26  ;;  %v2587_v51 = vadd.f32 %v2428_v53, %v5508_v43 }
 0x383   :  { %v3203_v6 = vpop.f32.mrf.mxu0  ;;  %v2677_v63 = vpop.f32.mrf.mxu2 }
 0x384   :  { %v6117_v33 = vadd.f32 %v3198_v0, %v3098_v14  ;;  %v2833_v35 = vadd.f32 %v2674_v36, %v2587_v51 }
 0x386   :  { %v3422_v9 = vpack.c.bf16 %v6117_v33, %v6117_v33  ;;  %4252 = vmatmul.msk.bf16.gmra.mxu0 %vm79_vm1, %v5531_v44 }
 0x388   :  { %3487 = vst.msk [vmem:[%s7216_s2] sm:$0xf] %vm3486_vm5, %v3422_v9 }
 0x389   :  { %v2940_v27 = vpop.f32.mrf.mxu3  ;;  %v2431_v34 = vpop.f32.mrf.mxu1 }
 0x38a   :  { %v3099_v54 = vadd.f32 %v2940_v27, %v2833_v35  ;;  %v2588_v43 = vadd.f32 %v2431_v34, %v5515_v39 }
 0x38b   :  { %v3205_v0 = vpop.f32.mrf.mxu0  ;;  %v2679_v15 = vpop.f32.mrf.mxu2 }
 0x38c   :  { %v6128_v11 = vadd.f32 %v3200_v50, %v3099_v54  ;;  %4153 = vmatmul.msk.bf16.gmra.mxu1 %vm79_vm1, %v5506_v59  ;;  %v2834_v36 = vadd.f32 %v2677_v63, %v2588_v43  ;;  %v7590_v43 = vld [vmem:[#allocation88_spill] sm:$0xff] }
 0x38e   :  { %v3423_v16 = vpack.c.bf16 %v6128_v11, %v6128_v11  ;;  %4219 = vmatmul.msk.bf16.gmra.mxu3 %vm79_vm1, %v4940_v48 }
 0x390   :  { %3488 = vst.msk [vmem:[%s7216_s2 + $0x4] sm:$0xf] %vm3486_vm5, %v3423_v16  ;;  %4187 = vmatmul.msk.bf16.gmra.mxu2 %vm79_vm1, %v5552_v23 }
 0x391   :  { %v2943_v50 = vpop.f32.mrf.mxu3  ;;  %v2433_v39 = vpop.f32.mrf.mxu1 }
 0x392   :  { %v3100_v30 = vadd.f32 %v2943_v50, %v2834_v36  ;;  %v2589_v21 = vadd.f32 %v2433_v39, %v5533_v2  ;;  %v7591_v50 = vld [vmem:[#allocation24_spill] sm:$0xff] }
 0x393   :  { %v3208_v8 = vpop.f32.mrf.mxu0  ;;  %v2682_v59 = vpop.f32.mrf.mxu2 }
 0x394   :  { %v6143_v26 = vadd.f32 %v3203_v6, %v3100_v30  ;;  %v2835_v53 = vadd.f32 %v2679_v15, %v2589_v21 }
 0x396   :  { %v3424_v48 = vpack.c.bf16 %v6143_v26, %v6143_v26  ;;  %4253 = vmatmul.msk.bf16.gmra.mxu0 %vm79_vm1, %v5556_v55 }
 0x398   :  { %3489 = vst.msk [vmem:[%s7216_s2 + $0x8] sm:$0xf] %vm3486_vm5, %v3424_v48  ;;  %v7592_v48 = vld [vmem:[#allocation89_spill] sm:$0xff] }
 0x399   :  { %v2945_v23 = vpop.f32.mrf.mxu3  ;;  %v2436_v14 = vpop.f32.mrf.mxu1 }
 0x39a   :  { %v3101_v63 = vadd.f32 %v2945_v23, %v2835_v53  ;;  %v2590_v2 = vadd.f32 %v2436_v14, %v5540_v57  ;;  %v7593_v14 = vld [vmem:[#allocation26_spill] sm:$0xff] }
 0x39b   :  { %v3210_v51 = vpop.f32.mrf.mxu0  ;;  %v2684_v6 = vpop.f32.mrf.mxu2 }
 0x39c   :  { %v6154_v9 = vadd.f32 %v3205_v0, %v3101_v63  ;;  %4154 = vmatmul.msk.bf16.gmra.mxu1 %vm79_vm1, %v5531_v44  ;;  %v2836_v27 = vadd.f32 %v2682_v59, %v2590_v2 }
 0x39e   :  { %v3425_v35 = vpack.c.bf16 %v6154_v9, %v6154_v9  ;;  %4220 = vmatmul.msk.bf16.gmra.mxu3 %vm79_vm1, %v5014_v22 }
 0x3a0   :  { %3490 = vst.msk [vmem:[%s7216_s2 + $0xc] sm:$0xf] %vm3486_vm5, %v3425_v35  ;;  %4188 = vmatmul.msk.bf16.gmra.mxu2 %vm79_vm1, %v5577_v46 }
 0x3a1   :  { %v2948_v34 = vpop.f32.mrf.mxu3  ;;  %v2438_v57 = vpop.f32.mrf.mxu1 }
 0x3a2   :  { %v3102_v54 = vadd.f32 %v2948_v34, %v2836_v27  ;;  %v2591_v16 = vadd.f32 %v2438_v57, %v7590_v43  ;;  %v7594_v34 = vld [vmem:[#allocation22_spill] sm:$0xff]  ;;  %v7595_v43 = vld [vmem:[#allocation31_spill] sm:$0xff] }
 0x3a3   :  { %v3213_v0 = vpop.f32.mrf.mxu0  ;;  %v2687_v44 = vpop.f32.mrf.mxu2 }
 0x3a4   :  { %v6169_v15 = vadd.f32 %v3208_v8, %v3102_v54  ;;  %v2837_v36 = vadd.f32 %v2684_v6, %v2591_v16  ;;  %v4337_v16 = vld [vmem:[#allocation2 + $0x180] sm:$0xff] }
 0x3a6   :  { %v3426_v22 = vpack.c.bf16 %v6169_v15, %v6169_v15  ;;  %4254 = vmatmul.msk.bf16.gmra.mxu0 %vm79_vm1, %v7591_v50 }
 0x3a8   :  { %3491 = vst.msk [vmem:[%s7216_s2 + $0x10] sm:$0xf] %vm3486_vm5, %v3426_v22  ;;  %v2390_v22 = vrot.slane %v4337_v16, 2 }
 0x3a9   :  { %v2950_v46 = vpop.f32.mrf.mxu3  ;;  %v2441_v39 = vpop.f32.mrf.mxu1 }
 0x3aa   :  { %v3103_v30 = vadd.f32 %v2950_v46, %v2837_v36  ;;  %v2592_v53 = vadd.f32 %v2441_v39, %v7592_v48  ;;  %v4338_v36 = vld [vmem:[#allocation2 + $0x188] sm:$0xff] }
 0x3ab   :  { %v3215_v59 = vpop.f32.mrf.mxu0  ;;  %v2689_v8 = vpop.f32.mrf.mxu2 }
 0x3ac   :  { %v6180_v21 = vadd.f32 %v3210_v51, %v3103_v30  ;;  %4155 = vmatmul.msk.bf16.gmra.mxu1 %vm79_vm1, %v5556_v55  ;;  %v2838_v63 = vadd.f32 %v2687_v44, %v2592_v53  ;;  %v4339_v30 = vld [vmem:[#allocation2 + $0x190] sm:$0x3] }
 0x3ad   :  { %v2393_v48 = vrot.slane %v4339_v30, 2 }
 0x3ae   :  { %v3427_v23 = vpack.c.bf16 %v6180_v21, %v6180_v21  ;;  %4221 = vmatmul.msk.bf16.gmra.mxu3 %vm79_vm1, %v7593_v14  ;;  %v7596_v14 = vld [vmem:[#allocation23_spill] sm:$0xff] }
 0x3b0   :  { %3492 = vst.msk [vmem:[%s7216_s2 + $0x14] sm:$0xf] %vm3486_vm5, %v3427_v23  ;;  %4189 = vmatmul.msk.bf16.gmra.mxu2 %vm79_vm1, %v5610_v62  ;;  %v2391_v62 = vrot.slane %v4338_v36, 2 }
 0x3b1   :  { %v2953_v51 = vpop.f32.mrf.mxu3  ;;  %v2443_v6 = vpop.f32.mrf.mxu1 }
 0x3b2   :  { %v3104_v2 = vadd.f32 %v2953_v51, %v2838_v63  ;;  %v2593_v57 = vadd.f32 %v2443_v6, %v7594_v34  ;;  %v2392_v51 = vsel %vm1287_vm4, %v2390_v22, %v2391_v62  ;;  %v2394_v6 = vsel %vm1287_vm4, %v2391_v62, %v2393_v48  ;;  %v7598_v62 = vld [vmem:[#allocation29_spill] sm:$0xff] }
 0x3b3   :  { %v3218_v35 = vpop.f32.mrf.mxu0  ;;  %v2692_v55 = vpop.f32.mrf.mxu2 }
 0x3b4   :  { %v6195_v27 = vadd.f32 %v3213_v0, %v3104_v2  ;;  %v2839_v44 = vadd.f32 %v2689_v8, %v2593_v57  ;;  %v6213_v2 = vpack.c.bf16 %v2394_v6, %v2392_v51  ;;  %v7597_v57 = vld [vmem:[#allocation33_spill] sm:$0xff]  ;;  %v7600_v6 = vld [vmem:[#allocation40_spill] sm:$0xff] }
 0x3b6   :  { %v3428_v54 = vpack.c.bf16 %v6195_v27, %v6195_v27  ;;  %4255 = vmatmul.msk.bf16.gmra.mxu0 %vm79_vm1, %v7595_v43 }
 0x3b8   :  { %3493 = vst.msk [vmem:[%s7216_s2 + $0x18] sm:$0xf] %vm3486_vm5, %v3428_v54 }
 0x3b9   :  { %v2955_v0 = vpop.f32.mrf.mxu3  ;;  %v2446_v46 = vpop.f32.mrf.mxu1 }
 0x3ba   :  { %v3105_v39 = vadd.f32 %v2955_v0, %v2839_v44  ;;  %v2594_v63 = vadd.f32 %v2446_v46, %v7596_v14 }
 0x3bb   :  { %v3220_v53 = vpop.f32.mrf.mxu0  ;;  %v2694_v23 = vpop.f32.mrf.mxu2 }
 0x3bc   :  { %v6206_v8 = vadd.f32 %v3215_v59, %v3105_v39  ;;  %4156 = vmatmul.msk.bf16.gmra.mxu1 %vm79_vm1, %v7591_v50  ;;  %v2840_v54 = vadd.f32 %v2692_v55, %v2594_v63  ;;  %v7599_v63 = vld [vmem:[#allocation30_spill] sm:$0xff] }
 0x3be   :  { %v3429_v34 = vpack.c.bf16 %v6206_v8, %v6206_v8  ;;  %4222 = vmatmul.msk.bf16.gmra.mxu3 %vm79_vm1, %v7597_v57 }
 0x3c0   :  { %3494 = vst.msk [vmem:[%s7216_s2 + $0x1c] sm:$0xf] %vm3486_vm5, %v3429_v34  ;;  %4190 = vmatmul.msk.bf16.gmra.mxu2 %vm79_vm1, %v5635_v42 }
 0x3c1   :  { %v2958_v50 = vpop.f32.mrf.mxu3  ;;  %v2448_v59 = vpop.f32.mrf.mxu1 }
 0x3c2   :  { %v3106_v44 = vadd.f32 %v2958_v50, %v2840_v54  ;;  %v2595_v0 = vadd.f32 %v2448_v59, %v7598_v62 }
 0x3c3   :  { %v3223_v16 = vpop.f32.mrf.mxu0  ;;  %v2697_v22 = vpop.f32.mrf.mxu2 }
 0x3c4   :  { %v6225_v36 = vadd.f32 %v3218_v35, %v3106_v44  ;;  %v2841_v46 = vadd.f32 %v2694_v23, %v2595_v0  ;;  %v306_v0 = vld [vmem:[#allocation2 + $0x1a0] sm:$0xff] }
 0x3c6   :  { %v3430_v55 = vpack.c.bf16 %v6225_v36, %v6225_v36  ;;  %4256 = vmatmul.msk.bf16.gmra.mxu0 %vm79_vm1, %v5639_v3 }
 0x3c8   :  { %3495 = vst.msk [vmem:[%s7216_s2 + $0x20] sm:$0xf] %vm3486_vm5, %v3430_v55  ;;  %v307_v55 = vld [vmem:[#allocation2 + $0x1a8] sm:$0x3] }
 0x3c9   :  { %v2960_v42 = vpop.f32.mrf.mxu3  ;;  %v2451_v39 = vpop.f32.mrf.mxu1 }
 0x3ca   :  { %v3107_v30 = vadd.f32 %v2960_v42, %v2841_v46  ;;  %v2596_v51 = vadd.f32 %v2451_v39, %v7599_v63  ;;  %v3163_v63 = vrot.slane %v306_v0, 2 }
 0x3cb   :  { %v3225_v48 = vpop.f32.mrf.mxu0  ;;  %v2699_v35 = vpop.f32.mrf.mxu2 }
 0x3cc   :  { %v6236_v14 = vadd.f32 %v3220_v53, %v3107_v30  ;;  %4157 = vmatmul.msk.bf16.gmra.mxu1 %vm79_vm1, %v7595_v43  ;;  %v2842_v34 = vadd.f32 %v2697_v22, %v2596_v51  ;;  %v3165_v51 = vrot.slane %v307_v55, 2 }
 0x3ce   :  { %v3431_v23 = vpack.c.bf16 %v6236_v14, %v6236_v14  ;;  %4223 = vmatmul.msk.bf16.gmra.mxu3 %vm79_vm1, %v7600_v6 }
 0x3d0   :  { %3496 = vst.msk [vmem:[%s7216_s2 + $0x24] sm:$0xf] %vm3486_vm5, %v3431_v23  ;;  %4191 = vmatmul.msk.bf16.gmra.mxu2 %vm79_vm1, %v5659_v52  ;;  %v305_v52 = vld [vmem:[#allocation2 + $0x198] sm:$0xff] }
 0x3d1   :  { %v2963_v53 = vpop.f32.mrf.mxu3  ;;  %v2453_v57 = vpop.f32.mrf.mxu1  ;;  %v3162_v30 = vrot.slane %v305_v52, 2  ;;  %v2650_v6 = vpack.c.bf16 %v306_v0, %v305_v52 }
 0x3d2   :  { %v3108_v54 = vadd.f32 %v2963_v53, %v2842_v34  ;;  %v2597_v44 = vadd.f32 %v2453_v57, %v5641_v49  ;;  %v7601_v53 = vld [vmem:[#allocation38_spill] sm:$0xff] }
 0x3d3   :  { %v3228_v50 = vpop.f32.mrf.mxu0  ;;  %v2702_v43 = vpop.f32.mrf.mxu2 }
 0x3d4   :  { %v6251_v59 = vadd.f32 %v3223_v16, %v3108_v54  ;;  %v2843_v62 = vadd.f32 %v2699_v35, %v2597_v44  ;;  %v3164_v54 = vsel %vm1287_vm4, %v3162_v30, %v3163_v63  ;;  %v3166_v44 = vsel %vm1287_vm4, %v3163_v63, %v3165_v51  ;;  %v7602_v30 = vld [vmem:[#allocation36_spill] sm:$0xff] }
 0x3d6   :  { %v3432_v22 = vpack.c.bf16 %v6251_v59, %v6251_v59  ;;  %4257 = vmatmul.msk.bf16.gmra.mxu0 %vm79_vm1, %v6213_v2 }
 0x3d8   :  { %3497 = vst.msk [vmem:[%s7216_s2 + $0x28] sm:$0xf] %vm3486_vm5, %v3432_v22  ;;  %v3176_v22 = vpack.c.bf16 %v3166_v44, %v3164_v54 }
 0x3d9   :  { %v2965_v46 = vpop.f32.mrf.mxu3  ;;  %v2456_v16 = vpop.f32.mrf.mxu1 }
 0x3da   :  { %v3109_v42 = vadd.f32 %v2965_v46, %v2843_v62  ;;  %v2598_v23 = vadd.f32 %v2456_v16, %v5652_v29  ;;  %v2902_v46 = vrot.slane %v305_v52, 1  ;;  %v2903_v16 = vrot.slane %v306_v0, 1 }
 0x3db   :  { %v3230_v39 = vpop.f32.mrf.mxu0  ;;  %v2704_v49 = vpop.f32.mrf.mxu2 }
 0x3dc   :  { %v6262_v35 = vadd.f32 %v3225_v48, %v3109_v42  ;;  %4158 = vmatmul.msk.bf16.gmra.mxu1 %vm79_vm1, %v5639_v3  ;;  %v2844_v57 = vadd.f32 %v2702_v43, %v2598_v23  ;;  %v2905_v42 = vrot.slane %v307_v55, 1 }
 0x3de   :  { %v3433_v34 = vpack.c.bf16 %v6262_v35, %v6262_v35  ;;  %4224 = vmatmul.msk.bf16.gmra.mxu3 %vm79_vm1, %v7601_v53 }
 0x3e0   :  { %3498 = vst.msk [vmem:[%s7216_s2 + $0x2c] sm:$0xf] %vm3486_vm5, %v3433_v34  ;;  %4192 = vmatmul.msk.bf16.gmra.mxu2 %vm79_vm1, %v2650_v6  ;;  %v2904_v6 = vsel %vm491_vm3, %v2902_v46, %v2903_v16  ;;  %v2906_v34 = vsel %vm491_vm3, %v2903_v16, %v2905_v42 }
 0x3e1   :  { %v2968_v3 = vpop.f32.mrf.mxu3  ;;  %v2458_v29 = vpop.f32.mrf.mxu1  ;;  %v2916_v55 = vpack.c.bf16 %v2906_v34, %v2904_v6 }
 0x3e2   :  { %v3110_v48 = vadd.f32 %v2968_v3, %v2844_v57  ;;  %v2599_v63 = vadd.f32 %v2458_v29, %v7602_v30 }
 0x3e3   :  { %v3233_v62 = vpop.f32.mrf.mxu0  ;;  %v2707_v43 = vpop.f32.mrf.mxu2 }
 0x3e4   :  { %v6278_v23 = vadd.f32 %v3228_v50, %v3110_v48  ;;  %v2845_v53 = vadd.f32 %v2704_v49, %v2599_v63  ;;  %v7603_v49 = vld [vmem:[#allocation37_spill] sm:$0xff] }
 0x3e6   :  { %v3434_v51 = vpack.c.bf16 %v6278_v23, %v6278_v23  ;;  %4258 = vmatmul.msk.bf16.gmra.mxu0 %vm79_vm1, %v3176_v22 }
 0x3e8   :  { %3499 = vst.msk [vmem:[%s7216_s2 + $0x30] sm:$0xf] %vm3486_vm5, %v3434_v51 }
 0x3e9   :  { %v2970_v52 = vpop.f32.mrf.mxu3  ;;  %v2461_v50 = vpop.f32.mrf.mxu1 }
 0x3ea   :  { %v3111_v0 = vadd.f32 %v2970_v52, %v2845_v53  ;;  %v2600_v3 = vadd.f32 %v2461_v50, %v7603_v49 }
 0x3eb   :  { %v3235_v57 = vpop.f32.mrf.mxu0  ;;  %v2709_v54 = vpop.f32.mrf.mxu2 }
 0x3ec   :  { %v6290_v44 = vadd.f32 %v3230_v39, %v3111_v0  ;;  %4159 = vmatmul.msk.bf16.gmra.mxu1 %vm79_vm1, %v6213_v2  ;;  %v2846_v48 = vadd.f32 %v2707_v43, %v2600_v3 }
 0x3ee   :  { %v3435_v29 = vpack.c.bf16 %v6290_v44, %v6290_v44  ;;  %4225 = vmatmul.msk.bf16.gmra.mxu3 %vm79_vm1, %v2916_v55 }
 0x3f0   :  { %3500 = vst.msk [vmem:[%s7216_s2 + $0x34] sm:$0xf] %vm3486_vm5, %v3435_v29  ;;  %4193 = vmatmul.msk.bf16.gmra.mxu2 %vm79_vm1, %v5692_v4 }
 0x3f1   :  { %v2973_v39 = vpop.f32.mrf.mxu3  ;;  %v2463_v22 = vpop.f32.mrf.mxu1 }
 0x3f2   :  { %v3112_v46 = vadd.f32 %v2973_v39, %v2846_v48  ;;  %v2601_v30 = vadd.f32 %v2463_v22, %v5679_v18 }
 0x3f3   :  { %v3238_v16 = vpop.f32.mrf.mxu0  ;;  %v2712_v42 = vpop.f32.mrf.mxu2 }
 0x3f4   :  { %v6304_v2 = vadd.f32 %v3233_v62, %v3112_v46  ;;  %v2847_v63 = vadd.f32 %v2709_v54, %v2601_v30  ;;  %v7606_v30 = vld [vmem:[#allocation15_spill] sm:$0xff] }
 0x3f6   :  { %v3436_v43 = vpack.c.bf16 %v6304_v2, %v6304_v2  ;;  %4259 = vmatmul.msk.bf16.gmra.mxu0 %vm79_vm1, %v5695_v20 }
 0x3f8   :  { %3501 = vst.msk [vmem:[%s7216_s2 + $0x38] sm:$0xf] %vm3486_vm5, %v3436_v43 }
 0x3f9   :  { %v2975_v4 = vpop.f32.mrf.mxu3  ;;  %v2466_v51 = vpop.f32.mrf.mxu1 }
 0x3fa   :  { %v3113_v53 = vadd.f32 %v2975_v4, %v2847_v63  ;;  %v2602_v18 = vadd.f32 %v2466_v51, %v5685_v7 }
 0x3fb   :  { %v3240_v6 = vpop.f32.mrf.mxu0  ;;  %v2714_v62 = vpop.f32.mrf.mxu2 }
 0x3fc   :  { %v6315_v34 = vadd.f32 %v3235_v57, %v3113_v53  ;;  %4160 = vmatmul.msk.bf16.gmra.mxu1 %vm79_vm1, %v5677_v1  ;;  %v2848_v50 = vadd.f32 %v2712_v42, %v2602_v18 }
 0x3fe   :  { %7604 = vst [vmem:[#allocation66_spill] sm:$0xff] %v6315_v34  ;;  %v3437_v52 = vpack.c.bf16 %v6315_v34, %v6315_v34  ;;  %4226 = vmatmul.msk.bf16.gmra.mxu3 %vm79_vm1, %v7459_v56 }
 0x400   :  { %3502 = vst.msk [vmem:[%s7216_s2 + $0x3c] sm:$0xf] %vm3486_vm5, %v3437_v52  ;;  %4194 = vmatmul.msk.bf16.gmra.mxu2 %vm79_vm1, %v5711_v45 }
 0x401   :  { %v2978_v0 = vpop.f32.mrf.mxu3  ;;  %v2468_v7 = vpop.f32.mrf.mxu1 }
 0x402   :  { %v3114_v55 = vadd.f32 %v2978_v0, %v2848_v50  ;;  %v2603_v49 = vadd.f32 %v2468_v7, %v5697_v13  ;;  %v7605_v13 = vld [vmem:[#allocation8_spill] sm:$0xff] }
 0x403   :  { %v3243_v57 = vpop.f32.mrf.mxu0  ;;  %v2717_v1 = vpop.f32.mrf.mxu2 }
 0x404   :  { %v6330_v54 = vadd.f32 %v3238_v16, %v3114_v55  ;;  %v2849_v3 = vadd.f32 %v2714_v62, %v2603_v49  ;;  %v7607_v62 = vld [vmem:[#allocation11_spill] sm:$0xff]  ;;  %v7609_v49 = vld [vmem:[#allocation90_spill] sm:$0xff] }
 0x406   :  { %v3438_v56 = vpack.c.bf16 %v6330_v54, %v6330_v54  ;;  %4260 = vmatmul.msk.bf16.gmra.mxu0 %vm79_vm1, %v5715_v40 }
 0x408   :  { %3503 = vst.msk [vmem:[%s7216_s2 + $0x40] sm:$0xf] %vm3486_vm5, %v3438_v56 }
 0x409   :  { %v2980_v45 = vpop.f32.mrf.mxu3  ;;  %v2471_v29 = vpop.f32.mrf.mxu1 }
 0x40a   :  { %v3115_v48 = vadd.f32 %v2980_v45, %v2849_v3  ;;  %v2604_v16 = vadd.f32 %v2471_v29, %v7605_v13  ;;  %v7610_v45 = vld [vmem:[#allocation18_spill] sm:$0xff] }
 0x40b   :  { %v3245_v39 = vpop.f32.mrf.mxu0  ;;  %v2719_v22 = vpop.f32.mrf.mxu2 }
 0x40c   :  { %v6341_v46 = vadd.f32 %v3240_v6, %v3115_v48  ;;  %4161 = vmatmul.msk.bf16.gmra.mxu1 %vm79_vm1, %v5695_v20  ;;  %v2850_v43 = vadd.f32 %v2717_v1, %v2604_v16 }
 0x40e   :  { %v3439_v42 = vpack.c.bf16 %v6341_v46, %v6341_v46  ;;  %4227 = vmatmul.msk.bf16.gmra.mxu3 %vm79_vm1, %v7606_v30 }
 0x410   :  { %3504 = vst.msk [vmem:[%s7216_s2 + $0x44] sm:$0xf] %vm3486_vm5, %v3439_v42  ;;  %4195 = vmatmul.msk.bf16.gmra.mxu2 %vm79_vm1, %v5731_v24  ;;  %v7611_v42 = vld [vmem:[#allocation91_spill] sm:$0xff] }
 0x411   :  { %v2983_v63 = vpop.f32.mrf.mxu3  ;;  %v2473_v4 = vpop.f32.mrf.mxu1 }
 0x412   :  { %v3116_v51 = vadd.f32 %v2983_v63, %v2850_v43  ;;  %v2605_v18 = vadd.f32 %v2473_v4, %v7607_v62  ;;  %v7612_v4 = vld [vmem:[#allocation93_spill] sm:$0xff] }
 0x413   :  { %v3248_v53 = vpop.f32.mrf.mxu0  ;;  %v2722_v20 = vpop.f32.mrf.mxu2 }
 0x414   :  { %v6356_v6 = vadd.f32 %v3243_v57, %v3116_v51  ;;  %v2851_v50 = vadd.f32 %v2719_v22, %v2605_v18 }
 0x416   :  { %v3440_v52 = vpack.c.bf16 %v6356_v6, %v6356_v6  ;;  %4261 = vmatmul.msk.bf16.gmra.mxu0 %vm79_vm1, %v5735_v31 }
 0x418   :  { %3505 = vst.msk [vmem:[%s7216_s2 + $0x48] sm:$0xf] %vm3486_vm5, %v3440_v52  ;;  %v7613_v52 = vld [vmem:[#allocation92_spill] sm:$0xff] }
 0x419   :  { %v2985_v24 = vpop.f32.mrf.mxu3  ;;  %v2476_v0 = vpop.f32.mrf.mxu1 }
 0x41a   :  { %v3117_v7 = vadd.f32 %v2985_v24, %v2851_v50  ;;  %v2606_v56 = vadd.f32 %v2476_v0, %v7609_v49  ;;  %v7614_v0 = vld [vmem:[#allocation21_spill] sm:$0xff] }
 0x41b   :  { %v3250_v55 = vpop.f32.mrf.mxu0  ;;  %v2724_v57 = vpop.f32.mrf.mxu2 }
 0x41c   :  { %v6367_v1 = vadd.f32 %v3245_v39, %v3117_v7  ;;  %4162 = vmatmul.msk.bf16.gmra.mxu1 %vm79_vm1, %v5715_v40  ;;  %v2852_v29 = vadd.f32 %v2722_v20, %v2606_v56 }
 0x41e   :  { %7608 = vst [vmem:[#allocation59_spill] sm:$0xff] %v6367_v1  ;;  %v3441_v3 = vpack.c.bf16 %v6367_v1, %v6367_v1  ;;  %4228 = vmatmul.msk.bf16.gmra.mxu3 %vm79_vm1, %v7610_v45 }
 0x420   :  { %3506 = vst.msk [vmem:[%s7216_s2 + $0x4c] sm:$0xf] %vm3486_vm5, %v3441_v3  ;;  %4196 = vmatmul.msk.bf16.gmra.mxu2 %vm79_vm1, %v5751_v60 }
 0x421   :  { %v2988_v48 = vpop.f32.mrf.mxu3  ;;  %v2478_v39 = vpop.f32.mrf.mxu1 }
 0x422   :  { %v3118_v22 = vadd.f32 %v2988_v48, %v2852_v29  ;;  %v2607_v30 = vadd.f32 %v2478_v39, %v7611_v42  ;;  %v7616_v29 = vld [vmem:[#allocation94_spill] sm:$0xff] }
 0x423   :  { %v3253_v13 = vpop.f32.mrf.mxu0  ;;  %v2727_v40 = vpop.f32.mrf.mxu2 }
 0x424   :  { %v6382_v16 = vadd.f32 %v3248_v53, %v3118_v22  ;;  %v2853_v63 = vadd.f32 %v2724_v57, %v2607_v30  ;;  %v7615_v57 = vld [vmem:[#allocation96_spill] sm:$0xff] }
 0x426   :  { %v3442_v43 = vpack.c.bf16 %v6382_v16, %v6382_v16  ;;  %4262 = vmatmul.msk.bf16.gmra.mxu0 %vm79_vm1, %v7612_v4 }
 0x428   :  { %3507 = vst.msk [vmem:[%s7216_s2 + $0x50] sm:$0xf] %vm3486_vm5, %v3442_v43 }
 0x429   :  { %v2990_v60 = vpop.f32.mrf.mxu3  ;;  %v2481_v51 = vpop.f32.mrf.mxu1 }
 0x42a   :  { %v3119_v20 = vadd.f32 %v2990_v60, %v2853_v63  ;;  %v2608_v50 = vadd.f32 %v2481_v51, %v7613_v52  ;;  %v7619_v51 = vld [vmem:[#allocation95_spill] sm:$0xff]  ;;  %v7620_v52 = vld [vmem:[#allocation28_spill] sm:$0xff] }
 0x42b   :  { %v3255_v62 = vpop.f32.mrf.mxu0  ;;  %v2729_v53 = vpop.f32.mrf.mxu2 }
 0x42c   :  { %v6393_v18 = vadd.f32 %v3250_v55, %v3119_v20  ;;  %4163 = vmatmul.msk.bf16.gmra.mxu1 %vm79_vm1, %v5735_v31  ;;  %v2854_v7 = vadd.f32 %v2727_v40, %v2608_v50  ;;  %v7617_v40 = vld [vmem:[#allocation97_spill] sm:$0xff] }
 0x42e   :  { %v3443_v24 = vpack.c.bf16 %v6393_v18, %v6393_v18  ;;  %4229 = vmatmul.msk.bf16.gmra.mxu3 %vm79_vm1, %v7614_v0 }
 0x430   :  { %3508 = vst.msk [vmem:[%s7216_s2 + $0x54] sm:$0xf] %vm3486_vm5, %v3443_v24  ;;  %4197 = vmatmul.msk.bf16.gmra.mxu2 %vm79_vm1, %v7615_v57  ;;  %v7621_v24 = vld [vmem:[#allocation100_spill] sm:$0xff] }
 0x431   :  { %v2993_v55 = vpop.f32.mrf.mxu3  ;;  %v2483_v49 = vpop.f32.mrf.mxu1 }
 0x432   :  { %v3120_v56 = vadd.f32 %v2993_v55, %v2854_v7  ;;  %v2609_v48 = vadd.f32 %v2483_v49, %v7616_v29  ;;  %v7622_v49 = vld [vmem:[#allocation98_spill] sm:$0xff] }
 0x433   :  { %v3258_v3 = vpop.f32.mrf.mxu0  ;;  %v2732_v31 = vpop.f32.mrf.mxu2 }
 0x434   :  { %v6408_v45 = vadd.f32 %v3253_v13, %v3120_v56  ;;  %v2855_v22 = vadd.f32 %v2729_v53, %v2609_v48  ;;  %v7623_v48 = vld [vmem:[#allocation101_spill] sm:$0xff] }
 0x436   :  { %v3444_v39 = vpack.c.bf16 %v6408_v45, %v6408_v45  ;;  %4263 = vmatmul.msk.bf16.gmra.mxu0 %vm79_vm1, %v7617_v40 }
 0x438   :  { %3509 = vst.msk [vmem:[%s7216_s2 + $0x58] sm:$0xf] %vm3486_vm5, %v3444_v39 }
 0x439   :  { %v2995_v42 = vpop.f32.mrf.mxu3  ;;  %v2486_v30 = vpop.f32.mrf.mxu1 }
 0x43a   :  { %v3121_v43 = vadd.f32 %v2995_v42, %v2855_v22  ;;  %v2610_v20 = vadd.f32 %v2486_v30, %v7619_v51  ;;  %v7624_v51 = vld [vmem:[#allocation99_spill] sm:$0xff] }
 0x43b   :  { %v3260_v63 = vpop.f32.mrf.mxu0  ;;  %v2734_v13 = vpop.f32.mrf.mxu2 }
 0x43c   :  { %v6419_v60 = vadd.f32 %v3255_v62, %v3121_v43  ;;  %4164 = vmatmul.msk.bf16.gmra.mxu1 %vm79_vm1, %v7612_v4  ;;  %v2856_v50 = vadd.f32 %v2732_v31, %v2610_v20 }
 0x43e   :  { %7618 = vst [vmem:[#allocation68_spill] sm:$0xff] %v6419_v60  ;;  %v3445_v53 = vpack.c.bf16 %v6419_v60, %v6419_v60  ;;  %4230 = vmatmul.msk.bf16.gmra.mxu3 %vm79_vm1, %v7620_v52 }
 0x440   :  { %3510 = vst.msk [vmem:[%s7216_s2 + $0x5c] sm:$0xf] %vm3486_vm5, %v3445_v53  ;;  %4198 = vmatmul.msk.bf16.gmra.mxu2 %vm79_vm1, %v7621_v24  ;;  %v7625_v53 = vld [vmem:[#allocation35_spill] sm:$0xff] }
 0x441   :  { %v2998_v62 = vpop.f32.mrf.mxu3  ;;  %v2488_v0 = vpop.f32.mrf.mxu1 }
 0x442   :  { %v3122_v7 = vadd.f32 %v2998_v62, %v2856_v50  ;;  %v2611_v56 = vadd.f32 %v2488_v0, %v7622_v49  ;;  %v7626_v50 = vld [vmem:[#allocation104_spill] sm:$0xff]  ;;  %v7627_v49 = vld [vmem:[#allocation102_spill] sm:$0xff] }
 0x443   :  { %v3263_v57 = vpop.f32.mrf.mxu0  ;;  %v2737_v4 = vpop.f32.mrf.mxu2 }
 0x444   :  { %v6434_v55 = vadd.f32 %v3258_v3, %v3122_v7  ;;  %v2857_v29 = vadd.f32 %v2734_v13, %v2611_v56 }
 0x446   :  { %v3446_v31 = vpack.c.bf16 %v6434_v55, %v6434_v55  ;;  %4264 = vmatmul.msk.bf16.gmra.mxu0 %vm79_vm1, %v7623_v48 }
 0x448   :  { %3511 = vst.msk [vmem:[%s7216_s2 + $0x60] sm:$0xf] %vm3486_vm5, %v3446_v31 }
 0x449   :  { %v3000_v39 = vpop.f32.mrf.mxu3  ;;  %v2491_v22 = vpop.f32.mrf.mxu1 }
 0x44a   :  { %v3123_v42 = vadd.f32 %v3000_v39, %v2857_v29  ;;  %v2612_v20 = vadd.f32 %v2491_v22, %v7624_v51  ;;  %v7628_v29 = vld [vmem:[#allocation105_spill] sm:$0xff] }
 0x44b   :  { %v3265_v30 = vpop.f32.mrf.mxu0  ;;  %v2739_v3 = vpop.f32.mrf.mxu2 }
 0x44c   :  { %v6445_v43 = vadd.f32 %v3260_v63, %v3123_v42  ;;  %4165 = vmatmul.msk.bf16.gmra.mxu1 %vm79_vm1, %v7617_v40  ;;  %v2858_v52 = vadd.f32 %v2737_v4, %v2612_v20 }
 0x44e   :  { %v3447_v13 = vpack.c.bf16 %v6445_v43, %v6445_v43  ;;  %4231 = vmatmul.msk.bf16.gmra.mxu3 %vm79_vm1, %v7625_v53 }
 0x450   :  { %3512 = vst.msk [vmem:[%s7216_s2 + $0x64] sm:$0xf] %vm3486_vm5, %v3447_v13  ;;  %4199 = vmatmul.msk.bf16.gmra.mxu2 %vm79_vm1, %v7626_v50  ;;  %v7630_v13 = vld [vmem:[#allocation103_spill] sm:$0xff] }
 0x451   :  { %v3003_v63 = vpop.f32.mrf.mxu3  ;;  %v2493_v24 = vpop.f32.mrf.mxu1 }
 0x452   :  { %v3124_v62 = vadd.f32 %v3003_v63, %v2858_v52  ;;  %v2613_v56 = vadd.f32 %v2493_v24, %v7627_v49  ;;  %v7631_v52 = vld [vmem:[#allocation7_spill] sm:$0xff]  ;;  %v7632_v63 = vld [vmem:[#allocation42_spill] sm:$0xff] }
 0x453   :  { %v3268_v0 = vpop.f32.mrf.mxu0  ;;  %v2742_v40 = vpop.f32.mrf.mxu2 }
 0x454   :  { %v6460_v7 = vadd.f32 %v3263_v57, %v3124_v62  ;;  %v2859_v31 = vadd.f32 %v2739_v3, %v2613_v56 }
 0x456   :  { %v3448_v4 = vpack.c.bf16 %v6460_v7, %v6460_v7  ;;  %4265 = vmatmul.msk.bf16.gmra.mxu0 %vm79_vm1, %v7628_v29 }
 0x458   :  { %3513 = vst.msk [vmem:[%s7216_s2 + $0x68] sm:$0xf] %vm3486_vm5, %v3448_v4  ;;  %v7633_v4 = vld [vmem:[#allocation106_spill] sm:$0xff] }
 0x459   :  { %v3005_v39 = vpop.f32.mrf.mxu3  ;;  %v2496_v22 = vpop.f32.mrf.mxu1 }
 0x45a   :  { %v3125_v42 = vadd.f32 %v3005_v39, %v2859_v31  ;;  %v2614_v53 = vadd.f32 %v2496_v22, %v7630_v13  ;;  %v7634_v22 = vld [vmem:[#allocation108_spill] sm:$0xff] }
 0x45b   :  { %v3270_v51 = vpop.f32.mrf.mxu0  ;;  %v2744_v57 = vpop.f32.mrf.mxu2 }
 0x45c   :  { %v6471_v20 = vadd.f32 %v3265_v30, %v3125_v42  ;;  %4166 = vmatmul.msk.bf16.gmra.mxu1 %vm79_vm1, %v7623_v48  ;;  %v2860_v50 = vadd.f32 %v2742_v40, %v2614_v53 }
 0x45e   :  { %7629 = vst [vmem:[#allocation63_spill] sm:$0xff] %v6471_v20  ;;  %v3449_v3 = vpack.c.bf16 %v6471_v20, %v6471_v20  ;;  %4232 = vmatmul.msk.bf16.gmra.mxu3 %vm79_vm1, %v7631_v52 }
 0x460   :  { %3514 = vst.msk [vmem:[%s7216_s2 + $0x6c] sm:$0xf] %vm3486_vm5, %v3449_v3  ;;  %4200 = vmatmul.msk.bf16.gmra.mxu2 %vm79_vm1, %v7632_v63 }
 0x461   :  { %v3008_v30 = vpop.f32.mrf.mxu3  ;;  %v2498_v24 = vpop.f32.mrf.mxu1 }
 0x462   :  { %v3126_v62 = vadd.f32 %v3008_v30, %v2860_v50  ;;  %v2615_v31 = vadd.f32 %v2498_v24, %v7633_v4  ;;  %v7635_v50 = vld [vmem:[#allocation107_spill] sm:$0xff]  ;;  %v7636_v30 = vld [vmem:[#allocation10_spill] sm:$0xff] }
 0x463   :  { %v3273_v49 = vpop.f32.mrf.mxu0  ;;  %v2747_v48 = vpop.f32.mrf.mxu2 }
 0x464   :  { %v6486_v56 = vadd.f32 %v3268_v0, %v3126_v62  ;;  %v2861_v39 = vadd.f32 %v2744_v57, %v2615_v31  ;;  %v7637_v62 = vld [vmem:[#allocation46_spill] sm:$0xff] }
 0x466   :  { %v3450_v40 = vpack.c.bf16 %v6486_v56, %v6486_v56  ;;  %4266 = vmatmul.msk.bf16.gmra.mxu0 %vm79_vm1, %v7634_v22 }
 0x468   :  { %3515 = vst.msk [vmem:[%s7216_s2 + $0x70] sm:$0xf] %vm3486_vm5, %v3450_v40 }
 0x469   :  { %v3010_v42 = vpop.f32.mrf.mxu3  ;;  %v2501_v13 = vpop.f32.mrf.mxu1 }
 0x46a   :  { %v3127_v53 = vadd.f32 %v3010_v42, %v2861_v39  ;;  %v2616_v63 = vadd.f32 %v2501_v13, %v7635_v50  ;;  %v7638_v42 = vld [vmem:[#allocation109_spill] sm:$0xff]  ;;  %v7639_v50 = vld [vmem:[#allocation110_spill] sm:$0xff] }
 0x46b   :  { %v3275_v3 = vpop.f32.mrf.mxu0  ;;  %v2749_v0 = vpop.f32.mrf.mxu2 }
 0x46c   :  { %v6497_v52 = vadd.f32 %v3270_v51, %v3127_v53  ;;  %4167 = vmatmul.msk.bf16.gmra.mxu1 %vm79_vm1, %v7628_v29  ;;  %v2862_v24 = vadd.f32 %v2747_v48, %v2616_v63 }
 0x46e   :  { %v3451_v57 = vpack.c.bf16 %v6497_v52, %v6497_v52  ;;  %4233 = vmatmul.msk.bf16.gmra.mxu3 %vm79_vm1, %v7636_v30 }
 0x470   :  { %3516 = vst.msk [vmem:[%s7216_s2 + $0x74] sm:$0xf] %vm3486_vm5, %v3451_v57  ;;  %4201 = vmatmul.msk.bf16.gmra.mxu2 %vm79_vm1, %v7637_v62 }
 0x471   :  { %v3013_v51 = vpop.f32.mrf.mxu3  ;;  %v2503_v4 = vpop.f32.mrf.mxu1 }
 0x472   :  { %v3128_v31 = vadd.f32 %v3013_v51, %v2862_v24  ;;  %v2617_v13 = vadd.f32 %v2503_v4, %v7638_v42  ;;  %v7641_v51 = vld [vmem:[#allocation43_spill] sm:$0xff] }
 0x473   :  { %v3278_v40 = vpop.f32.mrf.mxu0  ;;  %v2752_v29 = vpop.f32.mrf.mxu2 }
 0x474   :  { %v6512_v39 = vadd.f32 %v3273_v49, %v3128_v31  ;;  %v2863_v53 = vadd.f32 %v2749_v0, %v2617_v13  ;;  %v7642_v31 = vld [vmem:[#allocation14_spill] sm:$0xff]  ;;  %v7643_v13 = vld [vmem:[#allocation52_spill] sm:$0xff] }
 0x476   :  { %v3452_v48 = vpack.c.bf16 %v6512_v39, %v6512_v39  ;;  %4267 = vmatmul.msk.bf16.gmra.mxu0 %vm79_vm1, %v7639_v50 }
 0x478   :  { %3517 = vst.msk [vmem:[%s7216_s2 + $0x78] sm:$0xf] %vm3486_vm5, %v3452_v48 }
 0x479   :  { %v3015_v63 = vpop.f32.mrf.mxu3  ;;  %v2506_v57 = vpop.f32.mrf.mxu1 }
 0x47a   :  { %v3129_v30 = vadd.f32 %v3015_v63, %v2863_v53  ;;  %v2618_v4 = vadd.f32 %v2506_v57, %v7641_v51 }
 0x47b   :  { %v3280_v24 = vpop.f32.mrf.mxu0  ;;  %v2754_v49 = vpop.f32.mrf.mxu2 }
 0x47c   :  { %v6523_v62 = vadd.f32 %v3275_v3, %v3129_v30  ;;  %4168 = vmatmul.msk.bf16.gmra.mxu1 %vm79_vm1, %v7634_v22  ;;  %v2864_v42 = vadd.f32 %v2752_v29, %v2618_v4  ;;  %v7644_v30 = vld [vmem:[#allocation111_spill] sm:$0xff] }
 0x47e   :  { %7640 = vst [vmem:[#allocation25_spill] sm:$0xff] %v6523_v62  ;;  %v3453_v0 = vpack.c.bf16 %v6523_v62, %v6523_v62  ;;  %4234 = vmatmul.msk.bf16.gmra.mxu3 %vm79_vm1, %v7642_v31  ;;  %v7645_v31 = vld [vmem:[#allocation112_spill] sm:$0xff] }
 0x480   :  { %3518 = vst.msk [vmem:[%s7216_s2 + $0x7c] sm:$0xf] %vm3486_vm5, %v3453_v0  ;;  %4202 = vmatmul.msk.bf16.gmra.mxu2 %vm79_vm1, %v7643_v13 }
 0x481   :  { %v3018_v3 = vpop.f32.mrf.mxu3  ;;  %v2508_v48 = vpop.f32.mrf.mxu1 }
 0x482   :  { %v3130_v53 = vadd.f32 %v3018_v3, %v2864_v42  ;;  %v2619_v51 = vadd.f32 %v2508_v48, %v7644_v30  ;;  %v7647_v48 = vld [vmem:[#allocation49_spill] sm:$0xff] }
 0x483   :  { %v3283_v63 = vpop.f32.mrf.mxu0  ;;  %v2757_v22 = vpop.f32.mrf.mxu2 }
 0x484   :  { %v6538_v57 = vadd.f32 %v3278_v40, %v3130_v53  ;;  %v2865_v4 = vadd.f32 %v2754_v49, %v2619_v51  ;;  %v7648_v51 = vld [vmem:[#allocation17_spill] sm:$0xff] }
 0x486   :  { %v3454_v29 = vpack.c.bf16 %v6538_v57, %v6538_v57  ;;  %4268 = vmatmul.msk.bf16.gmra.mxu0 %vm79_vm1, %v7645_v31 }
 0x488   :  { %3519 = vst.msk [vmem:[%s7216_s2 + $0x80] sm:$0xf] %vm3486_vm5, %v3454_v29  ;;  %v7649_v29 = vld [vmem:[#allocation58_spill] sm:$0xff] }
 0x489   :  { %v3020_v0 = vpop.f32.mrf.mxu3  ;;  %v2511_v42 = vpop.f32.mrf.mxu1 }
 0x48a   :  { %v3131_v13 = vadd.f32 %v3020_v0, %v2865_v4  ;;  %v2620_v30 = vadd.f32 %v2511_v42, %v7647_v48  ;;  %v7651_v48 = vld [vmem:[#allocation113_spill] sm:$0xff] }
 0x48b   :  { %v3285_v3 = vpop.f32.mrf.mxu0  ;;  %v2759_v40 = vpop.f32.mrf.mxu2 }
 0x48c   :  { %v6549_v53 = vadd.f32 %v3280_v24, %v3131_v13  ;;  %4169 = vmatmul.msk.bf16.gmra.mxu1 %vm79_vm1, %v7639_v50  ;;  %v2866_v17 = vadd.f32 %v2757_v22, %v2620_v30 }
 0x48e   :  { %7646 = vst [vmem:[#allocation72_spill] sm:$0xff] %v6549_v53  ;;  %v3455_v49 = vpack.c.bf16 %v6549_v53, %v6549_v53  ;;  %4235 = vmatmul.msk.bf16.gmra.mxu3 %vm79_vm1, %v7648_v51  ;;  %v7652_v51 = vld [vmem:[#allocation114_spill] sm:$0xff] }
 0x490   :  { %3520 = vst.msk [vmem:[%s7216_s2 + $0x84] sm:$0xf] %vm3486_vm5, %v3455_v49  ;;  %4203 = vmatmul.msk.bf16.gmra.mxu2 %vm79_vm1, %v7649_v29 }
 0x491   :  { %v3023_v24 = vpop.f32.mrf.mxu3  ;;  %v2513_v4 = vpop.f32.mrf.mxu1 }
 0x492   :  { %v3132_v0 = vadd.f32 %v3023_v24, %v2866_v17  ;;  %v2621_v41 = vadd.f32 %v2513_v4, %v7651_v48  ;;  %v7654_v4 = vld [vmem:[#allocation55_spill] sm:$0xff] }
 0x493   :  { %v3288_v42 = vpop.f32.mrf.mxu0  ;;  %v2762_v50 = vpop.f32.mrf.mxu2 }
 0x494   :  { %v6564_v13 = vadd.f32 %v3283_v63, %v3132_v0  ;;  %v2867_v30 = vadd.f32 %v2759_v40, %v2621_v41  ;;  %v7655_v40 = vld [vmem:[#allocation20_spill] sm:$0xff] }
 0x496   :  { %7650 = vst [vmem:[#allocation65_spill] sm:$0xff] %v6564_v13  ;;  %v3456_v22 = vpack.c.bf16 %v6564_v13, %v6564_v13  ;;  %4269 = vmatmul.msk.bf16.gmra.mxu0 %vm79_vm1, %v7652_v51 }
 0x498   :  { %3521 = vst.msk [vmem:[%s7216_s2 + $0x88] sm:$0xf] %vm3486_vm5, %v3456_v22  ;;  %v7656_v22 = vld [vmem:[#allocation64_spill] sm:$0xff] }
 0x499   :  { %v3025_v49 = vpop.f32.mrf.mxu3  ;;  %v2516_v17 = vpop.f32.mrf.mxu1 }
 0x49a   :  { %v3133_v29 = vadd.f32 %v3025_v49, %v2867_v30  ;;  %v2622_v48 = vadd.f32 %v2516_v17, %v7654_v4  ;;  %v7658_v4 = vld [vmem:[#allocation115_spill] sm:$0xff] }
 0x49b   :  { %v3290_v24 = vpop.f32.mrf.mxu0  ;;  %v2764_v63 = vpop.f32.mrf.mxu2 }
 0x49c   :  { %v6575_v0 = vadd.f32 %v3285_v3, %v3133_v29  ;;  %4170 = vmatmul.msk.bf16.gmra.mxu1 %vm79_vm1, %v7645_v31  ;;  %v2868_v12 = vadd.f32 %v2762_v50, %v2622_v48 }
 0x49e   :  { %7653 = vst [vmem:[#allocation74_spill] sm:$0xff] %v6575_v0  ;;  %v3457_v41 = vpack.c.bf16 %v6575_v0, %v6575_v0  ;;  %4236 = vmatmul.msk.bf16.gmra.mxu3 %vm79_vm1, %v7655_v40  ;;  %v7659_v40 = vld [vmem:[#allocation116_spill] sm:$0xff] }
 0x4a0   :  { %3522 = vst.msk [vmem:[%s7216_s2 + $0x8c] sm:$0xf] %vm3486_vm5, %v3457_v41  ;;  %4204 = vmatmul.msk.bf16.gmra.mxu2 %vm79_vm1, %v7656_v22 }
 0x4a1   :  { %v3028_v3 = vpop.f32.mrf.mxu3  ;;  %v2518_v30 = vpop.f32.mrf.mxu1 }
 0x4a2   :  { %v3134_v49 = vadd.f32 %v3028_v3, %v2868_v12  ;;  %v2623_v58 = vadd.f32 %v2518_v30, %v7658_v4  ;;  %v7661_v30 = vld [vmem:[#allocation61_spill] sm:$0xff] }
 0x4a3   :  { %v3293_v17 = vpop.f32.mrf.mxu0  ;;  %v2767_v31 = vpop.f32.mrf.mxu2 }
 0x4a4   :  { %v6590_v29 = vadd.f32 %v3288_v42, %v3134_v49  ;;  %v2869_v48 = vadd.f32 %v2764_v63, %v2623_v58  ;;  %v7662_v63 = vld [vmem:[#allocation27_spill] sm:$0xff] }
 0x4a6   :  { %7657 = vst [vmem:[#allocation69_spill] sm:$0xff] %v6590_v29  ;;  %v3458_v50 = vpack.c.bf16 %v6590_v29, %v6590_v29  ;;  %4270 = vmatmul.msk.bf16.gmra.mxu0 %vm79_vm1, %v7659_v40 }
 0x4a8   :  { %3523 = vst.msk [vmem:[%s7216_s2 + $0x90] sm:$0xf] %vm3486_vm5, %v3458_v50 }
 0x4a9   :  { %v3030_v41 = vpop.f32.mrf.mxu3  ;;  %v2521_v12 = vpop.f32.mrf.mxu1 }
 0x4aa   :  { %v3135_v22 = vadd.f32 %v3030_v41, %v2869_v48  ;;  %v2624_v4 = vadd.f32 %v2521_v12, %v7661_v30 }
 0x4ab   :  { %v3295_v3 = vpop.f32.mrf.mxu0  ;;  %v2769_v42 = vpop.f32.mrf.mxu2 }
 0x4ac   :  { %v6601_v49 = vadd.f32 %v3290_v24, %v3135_v22  ;;  %4171 = vmatmul.msk.bf16.gmra.mxu1 %vm79_vm1, %v7652_v51  ;;  %v2870_v25 = vadd.f32 %v2767_v31, %v2624_v4  ;;  %v7664_v22 = vld [vmem:[#allocation117_spill] sm:$0xff] }
 0x4ae   :  { %7660 = vst [vmem:[#allocation32_spill] sm:$0xff] %v6601_v49  ;;  %v3459_v58 = vpack.c.bf16 %v6601_v49, %v6601_v49  ;;  %4237 = vmatmul.msk.bf16.gmra.mxu3 %vm79_vm1, %v7662_v63  ;;  %v7665_v63 = vld [vmem:[#allocation70_spill] sm:$0xff] }
 0x4b0   :  { %3524 = vst.msk [vmem:[%s7216_s2 + $0x94] sm:$0xf] %vm3486_vm5, %v3459_v58  ;;  %4205 = vmatmul.msk.bf16.gmra.mxu2 %vm79_vm1, %v5939_v47  ;;  %v4340_v58 = vld [vmem:[#allocation2 + $0x330] sm:$0xff]  ;;  %v2396_v47 = vrot.slane %v4341_v28, 2 }
 0x4b1   :  { %v3033_v24 = vpop.f32.mrf.mxu3  ;;  %v2523_v50 = vpop.f32.mrf.mxu1  ;;  %v2395_v61 = vrot.slane %v4340_v58, 2 }
 0x4b2   :  { %v3136_v48 = vadd.f32 %v3033_v24, %v2870_v25  ;;  %v2625_v30 = vadd.f32 %v2523_v50, %v7664_v22  ;;  %v4342_v50 = vld [vmem:[#allocation2 + $0x340] sm:$0x3] }
 0x4b3   :  { %v3298_v41 = vpop.f32.mrf.mxu0  ;;  %v2772_v51 = vpop.f32.mrf.mxu2  ;;  %v2397_v28 = vsel %vm1287_vm4, %v2395_v61, %v2396_v47 }
 0x4b4   :  { %v6616_v12 = vadd.f32 %v3293_v17, %v3136_v48  ;;  %v2871_v4 = vadd.f32 %v2769_v42, %v2625_v30  ;;  %v2398_v48 = vrot.slane %v4342_v50, 2  ;;  %v7667_v30 = vld [vmem:[#allocation67_spill] sm:$0xff]  ;;  %v7669_v50 = vld [vmem:[#allocation118_spill] sm:$0xff] }
 0x4b6   :  { %7663 = vst [vmem:[#allocation78_spill] sm:$0xff] %v6616_v12  ;;  %v3460_v31 = vpack.c.bf16 %v6616_v12, %v6616_v12  ;;  %4271 = vmatmul.msk.bf16.gmra.mxu0 %vm79_vm1, %v7665_v63  ;;  %v2399_v58 = vsel %vm1287_vm4, %v2396_v47, %v2398_v48 }
 0x4b7   :  { %v6634_v29 = vpack.c.bf16 %v2399_v58, %v2397_v28 }
 0x4b8   :  { %3525 = vst.msk [vmem:[%s7216_s2 + $0x98] sm:$0xf] %vm3486_vm5, %v3460_v31 }
 0x4b9   :  { %v3035_v25 = vpop.f32.mrf.mxu3  ;;  %v2526_v17 = vpop.f32.mrf.mxu1 }
 0x4ba   :  { %v3137_v24 = vadd.f32 %v3035_v25, %v2871_v4  ;;  %v2626_v49 = vadd.f32 %v2526_v17, %v7667_v30  ;;  %v7668_v4 = vld [vmem:[#allocation34_spill] sm:$0xff] }
 0x4bb   :  { %v3300_v22 = vpop.f32.mrf.mxu0  ;;  %v2774_v12 = vpop.f32.mrf.mxu2 }
 0x4bc   :  { %v6627_v42 = vadd.f32 %v3295_v3, %v3137_v24  ;;  %4172 = vmatmul.msk.bf16.gmra.mxu1 %vm79_vm1, %v7659_v40  ;;  %v2872_v25 = vadd.f32 %v2772_v51, %v2626_v49 }
 0x4be   :  { %7666 = vst [vmem:[#allocation71_spill] sm:$0xff] %v6627_v42  ;;  %v3461_v31 = vpack.c.bf16 %v6627_v42, %v6627_v42  ;;  %4238 = vmatmul.msk.bf16.gmra.mxu3 %vm79_vm1, %v7668_v4  ;;  %v7671_v4 = vld [vmem:[#allocation73_spill] sm:$0xff] }
 0x4c0   :  { %3526 = vst.msk [vmem:[%s7216_s2 + $0x9c] sm:$0xf] %vm3486_vm5, %v3461_v31  ;;  %4206 = vmatmul.msk.bf16.gmra.mxu2 %vm79_vm1, %v5959_v38 }
 0x4c1   :  { %v3038_v61 = vpop.f32.mrf.mxu3  ;;  %v2528_v40 = vpop.f32.mrf.mxu1 }
 0x4c2   :  { %v3138_v3 = vadd.f32 %v3038_v61, %v2872_v25  ;;  %v2627_v48 = vadd.f32 %v2528_v40, %v7669_v50  ;;  %v7672_v61 = vld [vmem:[#allocation41_spill] sm:$0xff] }
 0x4c3   :  { %v3303_v47 = vpop.f32.mrf.mxu0  ;;  %v2777_v17 = vpop.f32.mrf.mxu2 }
 0x4c4   :  { %v6646_v24 = vadd.f32 %v3298_v41, %v3138_v3  ;;  %v2873_v51 = vadd.f32 %v2774_v12, %v2627_v48 }
 0x4c6   :  { %v3462_v49 = vpack.c.bf16 %v6646_v24, %v6646_v24  ;;  %4272 = vmatmul.msk.bf16.gmra.mxu0 %vm79_vm1, %v5963_v10 }
 0x4c8   :  { %3527 = vst.msk [vmem:[%s7216_s2 + $0xa0] sm:$0xf] %vm3486_vm5, %v3462_v49 }
 0x4c9   :  { %v3040_v38 = vpop.f32.mrf.mxu3  ;;  %v2531_v30 = vpop.f32.mrf.mxu1 }
 0x4ca   :  { %v3139_v28 = vadd.f32 %v3040_v38, %v2873_v51  ;;  %v2628_v25 = vadd.f32 %v2531_v30, %v7671_v4  ;;  %v360_v30 = vld [vmem:[#allocation2 + $0x350] sm:$0xff] }
 0x4cb   :  { %v3305_v58 = vpop.f32.mrf.mxu0  ;;  %v2779_v41 = vpop.f32.mrf.mxu2 }
 0x4cc   :  { %v6657_v31 = vadd.f32 %v3300_v22, %v3139_v28  ;;  %4173 = vmatmul.msk.bf16.gmra.mxu1 %vm79_vm1, %v7665_v63  ;;  %v2874_v40 = vadd.f32 %v2777_v17, %v2628_v25  ;;  %v361_v28 = vld [vmem:[#allocation2 + $0x358] sm:$0x3] }
 0x4ce   :  { %7670 = vst [vmem:[#allocation80_spill] sm:$0xff] %v6657_v31  ;;  %v3463_v12 = vpack.c.bf16 %v6657_v31, %v6657_v31  ;;  %4239 = vmatmul.msk.bf16.gmra.mxu3 %vm79_vm1, %v7672_v61 }
 0x4d0   :  { %3528 = vst.msk [vmem:[%s7216_s2 + $0xa4] sm:$0xf] %vm3486_vm5, %v3463_v12  ;;  %4207 = vmatmul.msk.bf16.gmra.mxu2 %vm79_vm1, %v5981_v19  ;;  %v359_v19 = vld [vmem:[#allocation2 + $0x348] sm:$0xff] }
 0x4d1   :  { %v3043_v22 = vpop.f32.mrf.mxu3  ;;  %v2533_v3 = vpop.f32.mrf.mxu1  ;;  %v3167_v61 = vrot.slane %v359_v19, 2 }
 0x4d2   :  { %v3140_v50 = vadd.f32 %v3043_v22, %v2874_v40  ;;  %v2629_v51 = vadd.f32 %v2533_v3, %v5965_v32  ;;  %v3168_v40 = vrot.slane %v360_v30, 2  ;;  %v3170_v22 = vrot.slane %v361_v28, 2 }
 0x4d3   :  { %v3308_v48 = vpop.f32.mrf.mxu0  ;;  %v2782_v63 = vpop.f32.mrf.mxu2 }
 0x4d4   :  { %v6672_v49 = vadd.f32 %v3303_v47, %v3140_v50  ;;  %v2875_v38 = vadd.f32 %v2779_v41, %v2629_v51  ;;  %v2651_v50 = vpack.c.bf16 %v360_v30, %v359_v19 }
 0x4d6   :  { %7673 = vst [vmem:[#allocation75_spill] sm:$0xff] %v6672_v49  ;;  %v3464_v17 = vpack.c.bf16 %v6672_v49, %v6672_v49  ;;  %4273 = vmatmul.msk.bf16.gmra.mxu0 %vm79_vm1, %v6634_v29  ;;  %v2908_v49 = vrot.slane %v360_v30, 1 }
 0x4d8   :  { %3529 = vst.msk [vmem:[%s7216_s2 + $0xa8] sm:$0xf] %vm3486_vm5, %v3464_v17 }
 0x4d9   :  { %v3045_v4 = vpop.f32.mrf.mxu3  ;;  %v2536_v47 = vpop.f32.mrf.mxu1 }
 0x4da   :  { %v3141_v25 = vadd.f32 %v3045_v4, %v2875_v38  ;;  %v2630_v3 = vadd.f32 %v2536_v47, %v5976_v5  ;;  %v3169_v38 = vsel %vm1287_vm4, %v3167_v61, %v3168_v40  ;;  %v3171_v4 = vsel %vm1287_vm4, %v3168_v40, %v3170_v22  ;;  %v7675_v61 = vld [vmem:[#allocation76_spill] sm:$0xff] }
 0x4db   :  { %v3310_v12 = vpop.f32.mrf.mxu0  ;;  %v2784_v32 = vpop.f32.mrf.mxu2  ;;  %v3177_v47 = vpack.c.bf16 %v3171_v4, %v3169_v38 }
 0x4dc   :  { %v6683_v41 = vadd.f32 %v3305_v58, %v3141_v25  ;;  %4174 = vmatmul.msk.bf16.gmra.mxu1 %vm79_vm1, %v5963_v10  ;;  %v2876_v17 = vadd.f32 %v2782_v63, %v2630_v3 }
 0x4de   :  { %7674 = vst [vmem:[#allocation39_spill] sm:$0xff] %v6683_v41  ;;  %v3465_v51 = vpack.c.bf16 %v6683_v41, %v6683_v41  ;;  %4240 = vmatmul.msk.bf16.gmra.mxu3 %vm79_vm1, %v5974_v37  ;;  %v2907_v41 = vrot.slane %v359_v19, 1  ;;  %v2910_v37 = vrot.slane %v361_v28, 1 }
 0x4e0   :  { %3530 = vst.msk [vmem:[%s7216_s2 + $0xac] sm:$0xf] %vm3486_vm5, %v3465_v51  ;;  %4208 = vmatmul.msk.bf16.gmra.mxu2 %vm79_vm1, %v2651_v50  ;;  %v2909_v50 = vsel %vm491_vm3, %v2907_v41, %v2908_v49  ;;  %v2911_v51 = vsel %vm491_vm3, %v2908_v49, %v2910_v37  ;;  %v3553_v49 = vsel %vm3551_vm6, %v6128_v11, 0.0  ;;  %v3557_v37 = vsel %vm3551_vm6, %v6154_v9, 0.0 }
 0x4e1   :  { %v3048_v10 = vpop.f32.mrf.mxu3  ;;  %v2538_v5 = vpop.f32.mrf.mxu1  ;;  %v2917_v28 = vpack.c.bf16 %v2911_v51, %v2909_v50  ;;  %v3559_v50 = vsel %vm3551_vm6, %v6169_v15, 0.0 }
 0x4e2   :  { %v3142_v58 = vadd.f32 %v3048_v10, %v2876_v17  ;;  %v2631_v40 = vadd.f32 %v2538_v5, %v7675_v61  ;;  %v3552_v5 = vsel %vm3551_vm6, %v6117_v33, 0.0 }
 0x4e3   :  { %v3313_v25 = vpop.f32.mrf.mxu0  ;;  %v2787_v63 = vpop.f32.mrf.mxu2 }
 0x4e4   :  { %v6699_v3 = vadd.f32 %v3308_v48, %v3142_v58  ;;  %v2877_v31 = vadd.f32 %v2784_v32, %v2631_v40  ;;  %v7676_v32 = vld [vmem:[#allocation79_spill] sm:$0xff] }
 0x4e6   :  { %v3466_v22 = vpack.c.bf16 %v6699_v3, %v6699_v3  ;;  %4274 = vmatmul.msk.bf16.gmra.mxu0 %vm79_vm1, %v3177_v47 }
 0x4e8   :  { %3531 = vst.msk [vmem:[%s7216_s2 + $0xb0] sm:$0xf] %vm3486_vm5, %v3466_v22 }
 0x4e9   :  { %v3050_v19 = vpop.f32.mrf.mxu3  ;;  %v2541_v48 = vpop.f32.mrf.mxu1 }
 0x4ea   :  { %v3143_v30 = vadd.f32 %v3050_v19, %v2877_v31  ;;  %v2632_v10 = vadd.f32 %v2541_v48, %v7676_v32  ;;  %v7678_v19 = vld [vmem:[#allocation82_spill] sm:$0xff] }
 0x4eb   :  { %v3315_v17 = vpop.f32.mrf.mxu0  ;;  %v2789_v38 = vpop.f32.mrf.mxu2 }
 0x4ec   :  { %v6711_v4 = vadd.f32 %v3310_v12, %v3143_v30  ;;  %4175 = vmatmul.msk.bf16.gmra.mxu1 %vm79_vm1, %v6634_v29  ;;  %v2878_v31 = vadd.f32 %v2787_v63, %v2632_v10  ;;  %v3555_v12 = vsel %vm3551_vm6, %v6143_v26, 0.0  ;;  %v3554_v29 = vadd.f32 %v3553_v49, %v3552_v5 }
 0x4ee   :  { %v3467_v41 = vpack.c.bf16 %v6711_v4, %v6711_v4  ;;  %4241 = vmatmul.msk.bf16.gmra.mxu3 %vm79_vm1, %v2917_v28  ;;  %v3556_v40 = vadd.f32 %v3555_v12, %v3554_v29  ;;  %v3561_v28 = vsel %vm3551_vm6, %v6180_v21, 0.0  ;;  %v3565_v12 = vsel %vm3551_vm6, %v6206_v8, 0.0 }
 0x4f0   :  { %3532 = vst.msk [vmem:[%s7216_s2 + $0xb4] sm:$0xf] %vm3486_vm5, %v3467_v41  ;;  %v3558_v30 = vadd.f32 %v3557_v37, %v3556_v40  ;;  %v3563_v41 = vsel %vm3551_vm6, %v6195_v27, 0.0  ;;  %v7679_v40 = vld [vmem:[#allocation48_spill] sm:$0xff] }
 0x4f1   :  { %v3053_v58 = vpop.f32.mrf.mxu3  ;;  %v2543_v47 = vpop.f32.mrf.mxu1 }
 0x4f2   :  { %v3144_v61 = vadd.f32 %v3053_v58, %v2878_v31  ;;  %v2633_v48 = vadd.f32 %v2543_v47, %v7678_v19  ;;  %v3560_v49 = vadd.f32 %v3559_v50, %v3558_v30 }
 0x4f3   :  { %v3318_v63 = vpop.f32.mrf.mxu0  ;;  %v2792_v22 = vpop.f32.mrf.mxu2 }
 0x4f4   :  { %v6733_v51 = vadd.f32 %v3313_v25, %v3144_v61  ;;  %v2879_v10 = vadd.f32 %v2789_v38, %v2633_v48  ;;  %v3562_v25 = vadd.f32 %v3561_v28, %v3560_v49  ;;  %v3567_v38 = vsel %vm3551_vm6, %v6225_v36, 0.0 }
 0x4f5   :  { %v3569_v48 = vsel %vm3551_vm6, %v6236_v14, 0.0 }
 0x4f6   :  { %7677 = vst [vmem:[#allocation77_spill] sm:$0xff] %v6733_v51  ;;  %v3468_v32 = vpack.c.bf16 %v6733_v51, %v6733_v51  ;;  %v3564_v58 = vadd.f32 %v3563_v41, %v3562_v25  ;;  %v3573_v25 = vsel %vm3551_vm6, %v6262_v35, 0.0 }
 0x4f8   :  { %3533 = vst.msk [vmem:[%s7216_s2 + $0xb8] sm:$0xf] %vm3486_vm5, %v3468_v32  ;;  %v3566_v19 = vadd.f32 %v3565_v12, %v3564_v58 }
 0x4f9   :  { %v3055_v31 = vpop.f32.mrf.mxu3  ;;  %v2546_v5 = vpop.f32.mrf.mxu1 }
 0x4fa   :  { %v3145_v29 = vadd.f32 %v3055_v31, %v2879_v10  ;;  %v2634_v50 = vadd.f32 %v2546_v5, %v7679_v40  ;;  %v3568_v32 = vadd.f32 %v3567_v38, %v3566_v19  ;;  %v3571_v10 = vsel %vm3551_vm6, %v6251_v59, 0.0  ;;  %v7680_v38 = vld [vmem:[#allocation84_spill] sm:$0xff] }
 0x4fb   :  { %v3320_v47 = vpop.f32.mrf.mxu0  ;;  %v2794_v37 = vpop.f32.mrf.mxu2  ;;  %v3577_v19 = vsel %vm3551_vm6, %v6290_v44, 0.0 }
 0x4fc   :  { %v6750_v61 = vadd.f32 %v3315_v17, %v3145_v29  ;;  %v2880_v28 = vadd.f32 %v2792_v22, %v2634_v50  ;;  %v3570_v17 = vadd.f32 %v3569_v48, %v3568_v32  ;;  %v3575_v22 = vsel %vm3551_vm6, %v6278_v23, 0.0 }
 0x4fe   :  { %v3469_v30 = vpack.c.bf16 %v6750_v61, %v6750_v61  ;;  %v3572_v5 = vadd.f32 %v3571_v10, %v3570_v17 }
 0x500   :  { %3534 = vst.msk [vmem:[%s7216_s2 + $0xbc] sm:$0xf] %vm3486_vm5, %v3469_v30  ;;  %v3574_v50 = vadd.f32 %v3573_v25, %v3572_v5 }
 0x501   :  { %v3058_v49 = vpop.f32.mrf.mxu3  ;;  %v2548_v41 = vpop.f32.mrf.mxu1 }
 0x502   :  { %v3146_v31 = vadd.f32 %v3058_v49, %v2880_v28  ;;  %v2635_v40 = vadd.f32 %v2548_v41, %v7680_v38  ;;  %v3576_v32 = vadd.f32 %v3575_v22, %v3574_v50  ;;  %v3579_v28 = vsel %vm3551_vm6, %v6304_v2, 0.0  ;;  %v7681_v38 = vld [vmem:[#allocation50_spill] sm:$0xff] }
 0x503   :  { %v3323_v12 = vpop.f32.mrf.mxu0  ;;  %v2797_v29 = vpop.f32.mrf.mxu2  ;;  %v3581_v49 = vsel %vm3551_vm6, %v6315_v34, 0.0 }
 0x504   :  { %v6767_v58 = vadd.f32 %v3318_v63, %v3146_v31  ;;  %v2881_v30 = vadd.f32 %v2794_v37, %v2635_v40  ;;  %v3578_v63 = vadd.f32 %v3577_v19, %v3576_v32  ;;  %v3583_v37 = vsel %vm3551_vm6, %v6330_v54, 0.0 }
 0x505   :  { %v3585_v19 = vsel %vm3551_vm6, %v6341_v46, 0.0 }
 0x506   :  { %v3470_v48 = vpack.c.bf16 %v6767_v58, %v6767_v58  ;;  %v3580_v25 = vadd.f32 %v3579_v28, %v3578_v63 }
 0x508   :  { %3535 = vst.msk [vmem:[%s7216_s2 + $0xc0] sm:$0xf] %vm3486_vm5, %v3470_v48  ;;  %v3582_v50 = vadd.f32 %v3581_v49, %v3580_v25 }
 0x509   :  { %v3060_v10 = vpop.f32.mrf.mxu3  ;;  %v2551_v17 = vpop.f32.mrf.mxu1 }
 0x50a   :  { %v3147_v41 = vadd.f32 %v3060_v10, %v2881_v30  ;;  %v2636_v40 = vadd.f32 %v2551_v17, %v7681_v38  ;;  %v3584_v34 = vadd.f32 %v3583_v37, %v3582_v50  ;;  %v3587_v30 = vsel %vm3551_vm6, %v6356_v6, 0.0  ;;  %v7682_v38 = vld [vmem:[#allocation45_spill] sm:$0xff] }
 0x50b   :  { %v3325_v31 = vpop.f32.mrf.mxu0  ;;  %v2799_v5 = vpop.f32.mrf.mxu2  ;;  %v3589_v10 = vsel %vm3551_vm6, %v6367_v1, 0.0 }
 0x50c   :  { %v6784_v22 = vadd.f32 %v3320_v47, %v3147_v41  ;;  %v2882_v32 = vadd.f32 %v2797_v29, %v2636_v40  ;;  %v3586_v47 = vadd.f32 %v3585_v19, %v3584_v34  ;;  %v3591_v29 = vsel %vm3551_vm6, %v6382_v16, 0.0 }
 0x50d   :  { %v3593_v34 = vsel %vm3551_vm6, %v6393_v18, 0.0 }
 0x50e   :  { %v3471_v48 = vpack.c.bf16 %v6784_v22, %v6784_v22  ;;  %v3588_v49 = vadd.f32 %v3587_v30, %v3586_v47 }
 0x510   :  { %3536 = vst.msk [vmem:[%s7216_s2 + $0xc4] sm:$0xf] %vm3486_vm5, %v3471_v48  ;;  %v3590_v50 = vadd.f32 %v3589_v10, %v3588_v49 }
 0x511   :  { %v3063_v28 = vpop.f32.mrf.mxu3  ;;  %v2553_v63 = vpop.f32.mrf.mxu1 }
 0x512   :  { %v3148_v17 = vadd.f32 %v3063_v28, %v2882_v32  ;;  %v2637_v40 = vadd.f32 %v2553_v63, %v7682_v38  ;;  %v3592_v1 = vadd.f32 %v3591_v29, %v3590_v50  ;;  %v3595_v32 = vsel %vm3551_vm6, %v6408_v45, 0.0  ;;  %v7684_v38 = vld [vmem:[#allocation44_spill] sm:$0xff] }
 0x513   :  { %v3328_v41 = vpop.f32.mrf.mxu0  ;;  %v2802_v25 = vpop.f32.mrf.mxu2  ;;  %v3597_v28 = vsel %vm3551_vm6, %v6419_v60, 0.0 }
 0x514   :  { %v6801_v37 = vadd.f32 %v3323_v12, %v3148_v17  ;;  %v2883_v48 = vadd.f32 %v2799_v5, %v2637_v40  ;;  %v3594_v12 = vadd.f32 %v3593_v34, %v3592_v1  ;;  %v3599_v5 = vsel %vm3551_vm6, %v6434_v55, 0.0 }
 0x515   :  { %v3601_v1 = vsel %vm3551_vm6, %v6445_v43, 0.0 }
 0x516   :  { %v3472_v19 = vpack.c.bf16 %v6801_v37, %v6801_v37  ;;  %v3596_v10 = vadd.f32 %v3595_v32, %v3594_v12 }
 0x518   :  { %3537 = vst.msk [vmem:[%s7216_s2 + $0xc8] sm:$0xf] %vm3486_vm5, %v3472_v19  ;;  %v3598_v50 = vadd.f32 %v3597_v28, %v3596_v10 }
 0x519   :  { %v3065_v30 = vpop.f32.mrf.mxu3  ;;  %v2556_v47 = vpop.f32.mrf.mxu1 }
 0x51a   :  { %v3149_v63 = vadd.f32 %v3065_v30, %v2883_v48  ;;  %v2638_v40 = vadd.f32 %v2556_v47, %v7684_v38  ;;  %v3600_v60 = vadd.f32 %v3599_v5, %v3598_v50  ;;  %v3603_v48 = vsel %vm3551_vm6, %v6460_v7, 0.0  ;;  %v7685_v38 = vld [vmem:[#allocation12_spill] sm:$0xff] }
 0x51b   :  { %v3330_v17 = vpop.f32.mrf.mxu0  ;;  %v2804_v49 = vpop.f32.mrf.mxu2  ;;  %v3605_v30 = vsel %vm3551_vm6, %v6471_v20, 0.0 }
 0x51c   :  { %v6818_v29 = vadd.f32 %v3325_v31, %v3149_v63  ;;  %v2884_v19 = vadd.f32 %v2802_v25, %v2638_v40  ;;  %v3602_v31 = vadd.f32 %v3601_v1, %v3600_v60  ;;  %v3607_v25 = vsel %vm3551_vm6, %v6486_v56, 0.0 }
 0x51d   :  { %v3609_v60 = vsel %vm3551_vm6, %v6497_v52, 0.0 }
 0x51e   :  { %7683 = vst [vmem:[#allocation85_spill] sm:$0xff] %v6818_v29  ;;  %v3473_v34 = vpack.c.bf16 %v6818_v29, %v6818_v29  ;;  %v3604_v28 = vadd.f32 %v3603_v48, %v3602_v31 }
 0x520   :  { %3538 = vst.msk [vmem:[%s7216_s2 + $0xcc] sm:$0xf] %vm3486_vm5, %v3473_v34  ;;  %v3606_v50 = vadd.f32 %v3605_v30, %v3604_v28 }
 0x521   :  { %v3068_v32 = vpop.f32.mrf.mxu3  ;;  %v2558_v12 = vpop.f32.mrf.mxu1 }
 0x522   :  { %v3150_v47 = vadd.f32 %v3068_v32, %v2884_v19  ;;  %v2639_v40 = vadd.f32 %v2558_v12, %v7685_v38  ;;  %v3608_v20 = vadd.f32 %v3607_v25, %v3606_v50  ;;  %v3611_v19 = vsel %vm3551_vm6, %v6512_v39, 0.0  ;;  %v7686_v38 = vld [vmem:[#allocation54_spill] sm:$0xff] }
 0x523   :  { %v3333_v63 = vpop.f32.mrf.mxu0  ;;  %v2807_v10 = vpop.f32.mrf.mxu2  ;;  %v3613_v32 = vsel %vm3551_vm6, %v6523_v62, 0.0 }
 0x524   :  { %v6835_v5 = vadd.f32 %v3328_v41, %v3150_v47  ;;  %v2885_v34 = vadd.f32 %v2804_v49, %v2639_v40  ;;  %v3610_v41 = vadd.f32 %v3609_v60, %v3608_v20  ;;  %v3615_v49 = vsel %vm3551_vm6, %v6538_v57, 0.0 }
 0x525   :  { %v3617_v20 = vsel %vm3551_vm6, %v6549_v53, 0.0  ;;  %v7689_v53 = vld [vmem:[#allocation32_spill] sm:$0xff] }
 0x526   :  { %v3474_v1 = vpack.c.bf16 %v6835_v5, %v6835_v5  ;;  %v3612_v30 = vadd.f32 %v3611_v19, %v3610_v41 }
 0x528   :  { %3539 = vst.msk [vmem:[%s7216_s2 + $0xd0] sm:$0xf] %vm3486_vm5, %v3474_v1  ;;  %v3614_v50 = vadd.f32 %v3613_v32, %v3612_v30  ;;  %v7687_v30 = vld [vmem:[#allocation69_spill] sm:$0xff] }
 0x529   :  { %v3070_v48 = vpop.f32.mrf.mxu3  ;;  %v2561_v31 = vpop.f32.mrf.mxu1 }
 0x52a   :  { %v3151_v12 = vadd.f32 %v3070_v48, %v2885_v34  ;;  %v2640_v40 = vadd.f32 %v2561_v31, %v7686_v38  ;;  %v3616_v62 = vadd.f32 %v3615_v49, %v3614_v50  ;;  %v3619_v34 = vsel %vm3551_vm6, %v6564_v13, 0.0  ;;  %v7688_v38 = vld [vmem:[#allocation47_spill] sm:$0xff] }
 0x52b   :  { %v3335_v47 = vpop.f32.mrf.mxu0  ;;  %v2809_v28 = vpop.f32.mrf.mxu2  ;;  %v3621_v48 = vsel %vm3551_vm6, %v6575_v0, 0.0 }
 0x52c   :  { %v6852_v25 = vadd.f32 %v3330_v17, %v3151_v12  ;;  %v2886_v1 = vadd.f32 %v2807_v10, %v2640_v40  ;;  %v3618_v17 = vadd.f32 %v3617_v20, %v3616_v62  ;;  %v3623_v10 = vsel %vm3551_vm6, %v7687_v30, 0.0 }
 0x52d   :  { %v3625_v62 = vsel %vm3551_vm6, %v7689_v53, 0.0 }
 0x52e   :  { %v3475_v60 = vpack.c.bf16 %v6852_v25, %v6852_v25  ;;  %v3620_v32 = vadd.f32 %v3619_v34, %v3618_v17 }
 0x530   :  { %3540 = vst.msk [vmem:[%s7216_s2 + $0xd4] sm:$0xf] %vm3486_vm5, %v3475_v60  ;;  %v3622_v13 = vadd.f32 %v3621_v48, %v3620_v32 }
 0x531   :  { %v3073_v19 = vpop.f32.mrf.mxu3  ;;  %v2563_v41 = vpop.f32.mrf.mxu1 }
 0x532   :  { %v3152_v31 = vadd.f32 %v3073_v19, %v2886_v1  ;;  %v2641_v40 = vadd.f32 %v2563_v41, %v7688_v38  ;;  %v3624_v0 = vadd.f32 %v3623_v10, %v3622_v13  ;;  %v7690_v1 = vld [vmem:[#allocation78_spill] sm:$0xff]  ;;  %v3629_v41 = vsel %vm3551_vm6, %v6627_v42, 0.0  ;;  %v7692_v10 = vld [vmem:[#allocation56_spill] sm:$0xff] }
 0x533   :  { %v2812_v12 = vpop.f32.mrf.mxu2  ;;  %v3338_v50 = vpop.f32.mrf.mxu0  ;;  %v3627_v34 = vsel %vm3551_vm6, %v7690_v1, 0.0  ;;  %v3631_v13 = vsel %vm3551_vm6, %v6646_v24, 0.0  ;;  %v7693_v1 = vld [vmem:[#allocation80_spill] sm:$0xff] }
 0x534   :  { %v6869_v49 = vadd.f32 %v3333_v63, %v3152_v31  ;;  %v2887_v60 = vadd.f32 %v2809_v28, %v2641_v40  ;;  %v3626_v63 = vadd.f32 %v3625_v62, %v3624_v0 }
 0x536   :  { %v3476_v20 = vpack.c.bf16 %v6869_v49, %v6869_v49  ;;  %v3628_v31 = vadd.f32 %v3627_v34, %v3626_v63 }
 0x538   :  { %3541 = vst.msk [vmem:[%s7216_s2 + $0xd8] sm:$0xf] %vm3486_vm5, %v3476_v20  ;;  %v3630_v40 = vadd.f32 %v3629_v41, %v3628_v31  ;;  %v3633_v20 = vsel %vm3551_vm6, %v7693_v1, 0.0 }
 0x539   :  { %v3075_v17 = vpop.f32.mrf.mxu3  ;;  %v2566_v19 = vpop.f32.mrf.mxu1 }
 0x53a   :  { %v3153_v48 = vadd.f32 %v3075_v17, %v2887_v60  ;;  %v2642_v38 = vadd.f32 %v2566_v19, %v7692_v10  ;;  %v3632_v42 = vadd.f32 %v3631_v13, %v3630_v40  ;;  %v7694_v60 = vld [vmem:[#allocation75_spill] sm:$0xff] }
 0x53b   :  { %v2814_v32 = vpop.f32.mrf.mxu2  ;;  %v3340_v53 = vpop.f32.mrf.mxu0  ;;  %v3635_v34 = vsel %vm3551_vm6, %v7694_v60, 0.0  ;;  %v7695_v19 = vld [vmem:[#allocation39_spill] sm:$0xff] }
 0x53c   :  { %v6886_v28 = vadd.f32 %v3335_v47, %v3153_v48  ;;  %v2888_v62 = vadd.f32 %v2812_v12, %v2642_v38  ;;  %v3634_v47 = vadd.f32 %v3633_v20, %v3632_v42  ;;  %v3637_v41 = vsel %vm3551_vm6, %v7695_v19, 0.0  ;;  %v7696_v38 = vld [vmem:[#allocation51_spill] sm:$0xff] }
 0x53d   :  { %v3639_v12 = vsel %vm3551_vm6, %v6699_v3, 0.0 }
 0x53e   :  { %7691 = vst [vmem:[#allocation81_spill] sm:$0xff] %v6886_v28  ;;  %v3477_v0 = vpack.c.bf16 %v6886_v28, %v6886_v28  ;;  %v3636_v31 = vadd.f32 %v3635_v34, %v3634_v47 }
 0x540   :  { %3542 = vst.msk [vmem:[%s7216_s2 + $0xdc] sm:$0xf] %vm3486_vm5, %v3477_v0  ;;  %v3638_v60 = vadd.f32 %v3637_v41, %v3636_v31  ;;  %v3641_v0 = vsel %vm3551_vm6, %v6711_v4, 0.0 }
 0x541   :  { %v3078_v63 = vpop.f32.mrf.mxu3  ;;  %v2568_v17 = vpop.f32.mrf.mxu1 }
 0x542   :  { %v3154_v48 = vadd.f32 %v3078_v63, %v2888_v62  ;;  %v2643_v40 = vadd.f32 %v2568_v17, %v7696_v38  ;;  %v3640_v1 = vadd.f32 %v3639_v12, %v3638_v60  ;;  %v3643_v62 = vsel %vm3551_vm6, %v6733_v51, 0.0  ;;  %v7697_v12 = vld [vmem:[#allocation16_spill] sm:$0xff] }
 0x543   :  { %v2817_v10 = vpop.f32.mrf.mxu2  ;;  %v3645_v17 = vsel %vm3551_vm6, %v6750_v61, 0.0 }
 0x544   :  { %v6903_v13 = vadd.f32 %v3338_v50, %v3154_v48  ;;  %v2889_v20 = vadd.f32 %v2814_v32, %v2643_v40  ;;  %v3343_v50 = vpop.f32.mrf.mxu0  ;;  %v3642_v34 = vadd.f32 %v3641_v0, %v3640_v1  ;;  %v3647_v32 = vsel %vm3551_vm6, %v6767_v58, 0.0 }
 0x546   :  { %v3478_v42 = vpack.c.bf16 %v6903_v13, %v6903_v13  ;;  %v3644_v48 = vadd.f32 %v3643_v62, %v3642_v34 }
 0x548   :  { %3543 = vst.msk [vmem:[%s7216_s2 + $0xe0] sm:$0xf] %vm3486_vm5, %v3478_v42  ;;  %v3646_v40 = vadd.f32 %v3645_v17, %v3644_v48  ;;  %v3649_v42 = vsel %vm3551_vm6, %v6784_v22, 0.0 }
 0x549   :  { %v3080_v47 = vpop.f32.mrf.mxu3  ;;  %v2571_v63 = vpop.f32.mrf.mxu1 }
 0x54a   :  { %v3155_v41 = vadd.f32 %v3080_v47, %v2889_v20  ;;  %v2644_v38 = vadd.f32 %v2571_v63, %v7697_v12  ;;  %v3648_v51 = vadd.f32 %v3647_v32, %v3646_v40  ;;  %v3651_v20 = vsel %vm3551_vm6, %v6801_v37, 0.0  ;;  %v7698_v32 = vld [vmem:[#allocation60_spill] sm:$0xff] }
 0x54b   :  { %v2819_v31 = vpop.f32.mrf.mxu2  ;;  %v3653_v47 = vsel %vm3551_vm6, %v6818_v29, 0.0 }
 0x54c   :  { %v6920_v60 = vadd.f32 %v3340_v53, %v3155_v41  ;;  %v2890_v0 = vadd.f32 %v2817_v10, %v2644_v38  ;;  %v3650_v53 = vadd.f32 %v3649_v42, %v3648_v51  ;;  %v3345_v17 = vpop.f32.mrf.mxu0  ;;  %v3655_v10 = vsel %vm3551_vm6, %v6835_v5, 0.0 }
 0x54d   :  { %v3657_v51 = vsel %vm3551_vm6, %v6852_v25, 0.0 }
 0x54e   :  { %v3479_v1 = vpack.c.bf16 %v6920_v60, %v6920_v60  ;;  %v3652_v41 = vadd.f32 %v3651_v20, %v3650_v53 }
 0x550   :  { %3544 = vst.msk [vmem:[%s7216_s2 + $0xe4] sm:$0xf] %vm3486_vm5, %v3479_v1  ;;  %v3654_v40 = vadd.f32 %v3653_v47, %v3652_v41  ;;  %v7699_v41 = vld [vmem:[#allocation53_spill] sm:$0xff] }
 0x551   :  { %v3083_v62 = vpop.f32.mrf.mxu3  ;;  %v2573_v34 = vpop.f32.mrf.mxu1 }
 0x552   :  { %v3156_v63 = vadd.f32 %v3083_v62, %v2890_v0  ;;  %v2645_v12 = vadd.f32 %v2573_v34, %v7698_v32  ;;  %v3656_v29 = vadd.f32 %v3655_v10, %v3654_v40  ;;  %v3659_v0 = vsel %vm3551_vm6, %v6869_v49, 0.0 }
 0x553   :  { %v2822_v38 = vpop.f32.mrf.mxu2  ;;  %v3661_v62 = vsel %vm3551_vm6, %v6886_v28, 0.0  ;;  %v3665_v40 = vsel %vm3551_vm6, %v6920_v60, 0.0 }
 0x554   :  { %v6937_v48 = vadd.f32 %v3343_v50, %v3156_v63  ;;  %v2891_v1 = vadd.f32 %v2819_v31, %v2645_v12  ;;  %v3658_v50 = vadd.f32 %v3657_v51, %v3656_v29  ;;  %v3663_v31 = vsel %vm3551_vm6, %v6903_v13, 0.0  ;;  %v3348_v32 = vpop.f32.mrf.mxu0 }
 0x556   :  { %v3480_v42 = vpack.c.bf16 %v6937_v48, %v6937_v48  ;;  %v3660_v47 = vadd.f32 %v3659_v0, %v3658_v50 }
 0x558   :  { %3545 = vst.msk [vmem:[%s7216_s2 + $0xe8] sm:$0xf] %vm3486_vm5, %v3480_v42  ;;  %v3662_v12 = vadd.f32 %v3661_v62, %v3660_v47 }
 0x559   :  { %v3085_v20 = vpop.f32.mrf.mxu3  ;;  %v2576_v53 = vpop.f32.mrf.mxu1 }
 0x55a   :  { %v3157_v34 = vadd.f32 %v3085_v20, %v2891_v1  ;;  %v2646_v10 = vadd.f32 %v2576_v53, %v7699_v41  ;;  %v3664_v28 = vadd.f32 %v3663_v31, %v3662_v12  ;;  %v3667_v1 = vsel %vm3551_vm6, %v6937_v48, 0.0 }
 0x55b   :  { %v2824_v42 = vpop.f32.mrf.mxu2 }
 0x55c   :  { %v6954_v63 = vadd.f32 %v3345_v17, %v3157_v34  ;;  %v2892_v51 = vadd.f32 %v2822_v38, %v2646_v10  ;;  %v3666_v17 = vadd.f32 %v3665_v40, %v3664_v28  ;;  %v7700_v38 = vld [vmem:[#allocation62_spill] sm:$0xff]  ;;  %v3350_v12 = vpop.f32.mrf.mxu0 }
 0x55e   :  { %v3481_v29 = vpack.c.bf16 %v6954_v63, %v6954_v63  ;;  %v3669_v20 = vsel %vm3551_vm6, %v6954_v63, 0.0  ;;  %v3668_v62 = vadd.f32 %v3667_v1, %v3666_v17 }
 0x560   :  { %3546 = vst.msk [vmem:[%s7216_s2 + $0xec] sm:$0xf] %vm3486_vm5, %v3481_v29  ;;  %v3670_v31 = vadd.f32 %v3669_v20, %v3668_v62 }
 0x561   :  { %v3088_v0 = vpop.f32.mrf.mxu3  ;;  %v2578_v50 = vpop.f32.mrf.mxu1 }
 0x562   :  { %v3158_v53 = vadd.f32 %v3088_v0, %v2892_v51  ;;  %v2647_v47 = vadd.f32 %v2578_v50, %v7700_v38  ;;  %v7701_v0 = vld [vmem:[#allocation57_spill] sm:$0xff] }
 0x563   :  { %v2827_v29 = vpop.f32.mrf.mxu2 }
 0x564   :  { %v6969_v34 = vadd.f32 %v3348_v32, %v3158_v53  ;;  %v2893_v28 = vadd.f32 %v2824_v42, %v2647_v47  ;;  %v3353_v38 = vpop.f32.mrf.mxu0 }
 0x566   :  { %v3482_v41 = vpack.c.bf16 %v6969_v34, %v6969_v34  ;;  %v3671_v10 = vsel %vm3551_vm6, %v6969_v34, 0.0 }
 0x567   :  { %v3672_v40 = vadd.f32 %v3671_v10, %v3670_v31 }
 0x568   :  { %3547 = vst.msk [vmem:[%s7216_s2 + $0xf0] sm:$0xf] %vm3486_vm5, %v3482_v41 }
 0x569   :  { %v3090_v32 = vpop.f32.mrf.mxu3  ;;  %v2581_v51 = vpop.f32.mrf.mxu1 }
 0x56a   :  { %v3159_v1 = vadd.f32 %v3090_v32, %v2893_v28  ;;  %v2648_v50 = vadd.f32 %v2581_v51, %v7701_v0  ;;  %v7702_v28 = vld [vmem:[#allocation19_spill] sm:$0xff] }
 0x56b   :  { %v2829_v10 = vpop.f32.mrf.mxu2 }
 0x56c   :  { %v6980_v17 = vadd.f32 %v3350_v12, %v3159_v1  ;;  %v2894_v53 = vadd.f32 %v2827_v29, %v2648_v50 }
 0x56e   :  { %v3483_v20 = vpack.c.bf16 %v6980_v17, %v6980_v17  ;;  %v3673_v42 = vsel %vm3551_vm6, %v6980_v17, 0.0 }
 0x56f   :  { %v3674_v62 = vadd.f32 %v3673_v42, %v3672_v40 }
 0x570   :  { %3548 = vst.msk [vmem:[%s7216_s2 + $0xf4] sm:$0xf] %vm3486_vm5, %v3483_v20  ;;  %v3355_v20 = vpop.f32.mrf.mxu0 }
 0x571   :  { %v3093_v47 = vpop.f32.mrf.mxu3  ;;  %v2583_v31 = vpop.f32.mrf.mxu1 }
 0x572   :  { %v3160_v41 = vadd.f32 %v3093_v47, %v2894_v53  ;;  %v2649_v32 = vadd.f32 %v2583_v31, %v7702_v28 }
 0x574   :  { %v6991_v12 = vadd.f32 %v3353_v38, %v3160_v41  ;;  %v2895_v29 = vadd.f32 %v2829_v10, %v2649_v32 }
 0x576   :  { %v3484_v51 = vpack.c.bf16 %v6991_v12, %v6991_v12  ;;  %v3675_v40 = vsel %vm3551_vm6, %v6991_v12, 0.0 }
 0x577   :  { %v3676_v1 = vadd.f32 %v3675_v40, %v3674_v62  ;;  %v4370_v62 = vmov 512.0  }
 0x578   :  { %3549 = vst.msk [vmem:[%s7216_s2 + $0xf8] sm:$0xf] %vm3486_vm5, %v3484_v51  ;;  %4281 = vrcp.f32 %v4370_v62 }
 0x579   :  { %v3095_v0 = vpop.f32.mrf.mxu3 }
 0x57a   :  { %v3161_v50 = vadd.f32 %v3095_v0, %v2895_v29 }
 0x57c   :  { %v7002_v42 = vadd.f32 %v3355_v20, %v3161_v50 }
 0x57e   :  { %v3485_v53 = vpack.c.bf16 %v7002_v42, %v7002_v42  ;;  %v3677_v38 = vsel %vm3551_vm6, %v7002_v42, 0.0  ;;  %v4282_v41 = vpop.eup %4281 }
 0x57f   :  { %v3678_v47 = vadd.f32 %v3677_v38, %v3676_v1  ;;  %v3686_v28 = vmul.f32 512.0, %v4282_v41  ;;  %vm3690_vm7 = vweird.f32 %v4282_v41 }
 0x580   :  { %3550 = vst.msk [vmem:[%s7216_s2 + $0xfc] sm:$0xf] %vm3486_vm5, %v3485_v53  ;;  %s4371_s2 = smov [#allocation3]  }
 0x581   :  { %v3679_v31 = vrot.slane %v3678_v47, 4  ;;  %v3687_v51 = vsub.f32 1.0, %v3686_v28  ;;  %s3966_s6 = sshll.u32 %s4371_s2, 4  ;;  %s3967_s6 = int_to_ptr.vmem [resolvable:$true] %s3966_s6 }
 0x583   :  { %v3680_v10 = vadd.f32 %v3679_v31, %v3678_v47  ;;  %v3688_v29 = vmul.f32 %v4282_v41, %v3687_v51 }
 0x585   :  { %v3681_v32 = vrot.slane %v3680_v10, 2  ;;  %v3689_v50 = vadd.f32 %v4282_v41, %v3688_v29 }
 0x587   :  { %v3682_v40 = vadd.f32 %v3681_v32, %v3680_v10  ;;  %v7012_v1 = vsel %vm3690_vm7, %v4282_v41, %v3689_v50 }
 0x589   :  { %v3683_v0 = vrot.slane %v3682_v40, 1 }
 0x58b   :  { %v3684_v20 = vadd.f32 %v3683_v0, %v3682_v40 }
 0x58d   :  { %v7015_v38 = vmul.f32 %v7012_v1, %v3684_v20 }
 0x58f   :  { %v3693_v53 = vsub.f32 %v6117_v33, %v7015_v38  ;;  %v3694_v47 = vsub.f32 %v6128_v11, %v7015_v38  ;;  %v3695_v62 = vsub.f32 %v6143_v26, %v7015_v38  ;;  %v3696_v31 = vsub.f32 %v6154_v9, %v7015_v38 }
 0x590   :  { %v3697_v41 = vsub.f32 %v6169_v15, %v7015_v38  ;;  %v3698_v51 = vsub.f32 %v6180_v21, %v7015_v38  ;;  %v3699_v26 = vsub.f32 %v6195_v27, %v7015_v38  ;;  %v3700_v15 = vsub.f32 %v6206_v8, %v7015_v38 }
 0x591   :  { %v3757_v10 = vmul.f32 %v3693_v53, %v3693_v53  ;;  %v3758_v28 = vmul.f32 %v3694_v47, %v3694_v47  ;;  %v3759_v32 = vmul.f32 %v3695_v62, %v3695_v62  ;;  %v3760_v40 = vmul.f32 %v3696_v31, %v3696_v31 }
 0x592   :  { %v3761_v0 = vmul.f32 %v3697_v41, %v3697_v41  ;;  %v3762_v20 = vmul.f32 %v3698_v51, %v3698_v51  ;;  %v3701_v47 = vsub.f32 %v6225_v36, %v7015_v38  ;;  %v3763_v62 = vmul.f32 %v3699_v26, %v3699_v26 }
 0x593   :  { %v3821_v33 = vsel %vm3551_vm6, %v3757_v10, 0.0  ;;  %v3822_v11 = vsel %vm3551_vm6, %v3758_v28, 0.0  ;;  %v3824_v9 = vsel %vm3551_vm6, %v3759_v32, 0.0  ;;  %v3826_v53 = vsel %vm3551_vm6, %v3760_v40, 0.0 }
 0x594   :  { %v3823_v29 = vadd.f32 %v3822_v11, %v3821_v33  ;;  %v3828_v31 = vsel %vm3551_vm6, %v3761_v0, 0.0  ;;  %v3702_v27 = vsub.f32 %v6236_v14, %v7015_v38  ;;  %v3764_v28 = vmul.f32 %v3700_v15, %v3700_v15 }
 0x595   :  { %v3830_v41 = vsel %vm3551_vm6, %v3762_v20, 0.0  ;;  %v3703_v8 = vsub.f32 %v6251_v59, %v7015_v38  ;;  %v3765_v51 = vmul.f32 %v3701_v47, %v3701_v47  ;;  %v3832_v40 = vsel %vm3551_vm6, %v3763_v62, 0.0 }
 0x596   :  { %v3825_v50 = vadd.f32 %v3824_v9, %v3823_v29  ;;  %v3704_v36 = vsub.f32 %v6262_v35, %v7015_v38  ;;  %v3766_v11 = vmul.f32 %v3702_v27, %v3702_v27  ;;  %v3834_v29 = vsel %vm3551_vm6, %v3764_v28, 0.0 }
 0x597   :  { %v3705_v14 = vsub.f32 %v6278_v23, %v7015_v38  ;;  %v3767_v0 = vmul.f32 %v3703_v8, %v3703_v8  ;;  %v3836_v9 = vsel %vm3551_vm6, %v3765_v51, 0.0  ;;  %v3706_v59 = vsub.f32 %v6290_v44, %v7015_v38  ;;  %v7703_v23 = vld [vmem:[#allocation66_spill] sm:$0xff] }
 0x598   :  { %v3827_v21 = vadd.f32 %v3826_v53, %v3825_v50  ;;  %v3768_v15 = vmul.f32 %v3704_v36, %v3704_v36  ;;  %v3838_v20 = vsel %vm3551_vm6, %v3766_v11, 0.0  ;;  %v3707_v35 = vsub.f32 %v6304_v2, %v7015_v38 }
 0x599   :  { %v3840_v47 = vsel %vm3551_vm6, %v3767_v0, 0.0  ;;  %v3709_v44 = vsub.f32 %v6330_v54, %v7015_v38  ;;  %v3710_v2 = vsub.f32 %v6341_v46, %v7015_v38  ;;  %v3711_v36 = vsub.f32 %v6356_v6, %v7015_v38  ;;  %v7704_v54 = vld [vmem:[#allocation59_spill] sm:$0xff] }
 0x59a   :  { %v3829_v10 = vadd.f32 %v3828_v31, %v3827_v21  ;;  %v3769_v21 = vmul.f32 %v3705_v14, %v3705_v14  ;;  %v3708_v31 = vsub.f32 %v7703_v23, %v7015_v38  ;;  %v3842_v27 = vsel %vm3551_vm6, %v3768_v15, 0.0 }
 0x59b   :  { %v3773_v11 = vmul.f32 %v3709_v44, %v3709_v44  ;;  %v3712_v14 = vsub.f32 %v7704_v54, %v7015_v38  ;;  %v3774_v0 = vmul.f32 %v3710_v2, %v3710_v2  ;;  %v3713_v46 = vsub.f32 %v6382_v16, %v7015_v38  ;;  %v7705_v16 = vld [vmem:[#allocation68_spill] sm:$0xff] }
 0x59c   :  { %v3831_v32 = vadd.f32 %v3830_v41, %v3829_v10  ;;  %v3770_v10 = vmul.f32 %v3706_v59, %v3706_v59  ;;  %v3771_v41 = vmul.f32 %v3707_v35, %v3707_v35  ;;  %v3772_v51 = vmul.f32 %v3708_v31, %v3708_v31 }
 0x59d   :  { %v3775_v59 = vmul.f32 %v3711_v36, %v3711_v36  ;;  %v3852_v15 = vsel %vm3551_vm6, %v3773_v11, 0.0  ;;  %v3714_v6 = vsub.f32 %v6393_v18, %v7015_v38  ;;  %v3854_v35 = vsel %vm3551_vm6, %v3774_v0, 0.0 }
 0x59e   :  { %v3833_v33 = vadd.f32 %v3832_v40, %v3831_v32  ;;  %v3844_v32 = vsel %vm3551_vm6, %v3769_v21, 0.0  ;;  %v3846_v40 = vsel %vm3551_vm6, %v3770_v10, 0.0  ;;  %v3716_v10 = vsub.f32 %v7705_v16, %v7015_v38 }
 0x59f   :  { %v3856_v23 = vsel %vm3551_vm6, %v3775_v59, 0.0  ;;  %v3717_v18 = vsub.f32 %v6434_v55, %v7015_v38  ;;  %v7706_v55 = vld [vmem:[#allocation63_spill] sm:$0xff] }
 0x5a0   :  { %v3835_v26 = vadd.f32 %v3834_v29, %v3833_v33  ;;  %v3848_v29 = vsel %vm3551_vm6, %v3771_v41, 0.0  ;;  %v3780_v2 = vmul.f32 %v3716_v10, %v3716_v10 }
 0x5a1   :  { %v3781_v36 = vmul.f32 %v3717_v18, %v3717_v18 }
 0x5a2   :  { %v3837_v50 = vadd.f32 %v3836_v9, %v3835_v26  ;;  %v3850_v9 = vsel %vm3551_vm6, %v3772_v51, 0.0 }
 0x5a4   :  { %v3839_v53 = vadd.f32 %v3838_v20, %v3837_v50 }
 0x5a6   :  { %v3841_v62 = vadd.f32 %v3840_v47, %v3839_v53  ;;  %v3776_v53 = vmul.f32 %v3712_v14, %v3712_v14  ;;  %v3715_v47 = vsub.f32 %v6408_v45, %v7015_v38  ;;  %v3718_v45 = vsub.f32 %v6445_v43, %v7015_v38 }
 0x5a7   :  { %v3866_v14 = vsel %vm3551_vm6, %v3780_v2, 0.0  ;;  %v3721_v43 = vsub.f32 %v6486_v56, %v7015_v38  ;;  %v7707_v56 = vld [vmem:[#allocation25_spill] sm:$0xff] }
 0x5a8   :  { %v3843_v28 = vadd.f32 %v3842_v27, %v3841_v62  ;;  %v3777_v62 = vmul.f32 %v3713_v46, %v3713_v46  ;;  %v3778_v27 = vmul.f32 %v3714_v6, %v3714_v6  ;;  %v3779_v41 = vmul.f32 %v3715_v47, %v3715_v47 }
 0x5a9   :  { %v3782_v54 = vmul.f32 %v3718_v45, %v3718_v45  ;;  %v3723_v6 = vsub.f32 %v6512_v39, %v7015_v38  ;;  %v3724_v47 = vsub.f32 %v7707_v56, %v7015_v38  ;;  %v7708_v39 = vld [vmem:[#allocation72_spill] sm:$0xff]  ;;  %v3733_v56 = vsub.f32 %v6646_v24, %v7015_v38 }
 0x5aa   :  { %v3845_v8 = vadd.f32 %v3844_v32, %v3843_v28  ;;  %v3858_v28 = vsel %vm3551_vm6, %v3776_v53, 0.0  ;;  %v3860_v32 = vsel %vm3551_vm6, %v3777_v62, 0.0  ;;  %v3862_v51 = vsel %vm3551_vm6, %v3778_v27, 0.0 }
 0x5ab   :  { %v3864_v11 = vsel %vm3551_vm6, %v3779_v41, 0.0  ;;  %v3785_v53 = vmul.f32 %v3721_v43, %v3721_v43  ;;  %v3787_v16 = vmul.f32 %v3723_v6, %v3723_v6  ;;  %v3736_v24 = vsub.f32 %v7695_v19, %v7015_v38  ;;  %v7716_v19 = vld [vmem:[#allocation77_spill] sm:$0xff] }
 0x5ac   :  { %v3847_v33 = vadd.f32 %v3846_v40, %v3845_v8 }
 0x5ad   :  { %v3876_v10 = vsel %vm3551_vm6, %v3785_v53, 0.0  ;;  %v3880_v2 = vsel %vm3551_vm6, %v3787_v16, 0.0 }
 0x5ae   :  { %v3849_v26 = vadd.f32 %v3848_v29, %v3847_v33  ;;  %v3719_v33 = vsub.f32 %v6460_v7, %v7015_v38  ;;  %v3722_v7 = vsub.f32 %v6497_v52, %v7015_v38  ;;  %v3725_v52 = vsub.f32 %v6538_v57, %v7015_v38  ;;  %v7710_v57 = vld [vmem:[#allocation74_spill] sm:$0xff] }
 0x5b0   :  { %v3851_v50 = vadd.f32 %v3850_v9, %v3849_v26  ;;  %v3720_v26 = vsub.f32 %v7706_v55, %v7015_v38  ;;  %v3783_v9 = vmul.f32 %v3719_v33, %v3719_v33  ;;  %v3786_v62 = vmul.f32 %v3722_v7, %v3722_v7 }
 0x5b1   :  { %v3789_v45 = vmul.f32 %v3725_v52, %v3725_v52 }
 0x5b2   :  { %v3853_v20 = vadd.f32 %v3852_v15, %v3851_v50  ;;  %v3868_v50 = vsel %vm3551_vm6, %v3781_v36, 0.0  ;;  %v3784_v59 = vmul.f32 %v3720_v26, %v3720_v26  ;;  %v3870_v15 = vsel %vm3551_vm6, %v3782_v54, 0.0 }
 0x5b3   :  { %v3878_v18 = vsel %vm3551_vm6, %v3786_v62, 0.0  ;;  %v3884_v26 = vsel %vm3551_vm6, %v3789_v45, 0.0 }
 0x5b4   :  { %v3855_v21 = vadd.f32 %v3854_v35, %v3853_v20  ;;  %v3872_v35 = vsel %vm3551_vm6, %v3783_v9, 0.0 }
 0x5b6   :  { %v3857_v31 = vadd.f32 %v3856_v23, %v3855_v21  ;;  %v3874_v23 = vsel %vm3551_vm6, %v3784_v59, 0.0 }
 0x5b8   :  { %v3859_v44 = vadd.f32 %v3858_v28, %v3857_v31  ;;  %v3726_v28 = vsub.f32 %v7708_v39, %v7015_v38  ;;  %v7715_v39 = vld [vmem:[#allocation75_spill] sm:$0xff] }
 0x5ba   :  { %v3861_v8 = vadd.f32 %v3860_v32, %v3859_v44  ;;  %v3788_v44 = vmul.f32 %v3724_v47, %v3724_v47  ;;  %v7709_v32 = vld [vmem:[#allocation65_spill] sm:$0xff]  ;;  %v3790_v33 = vmul.f32 %v3726_v28, %v3726_v28  ;;  %v3735_v28 = vsub.f32 %v7715_v39, %v7015_v38 }
 0x5bb   :  { %v3747_v39 = vsub.f32 %v6869_v49, %v7015_v38  ;;  %v3750_v49 = vsub.f32 %v6920_v60, %v7015_v38  ;;  %v3753_v60 = vsub.f32 %v6969_v34, %v7015_v38  ;;  %v3756_v34 = vsub.f32 %v7002_v42, %v7015_v38 }
 0x5bc   :  { %v3863_v40 = vadd.f32 %v3862_v51, %v3861_v8  ;;  %v3727_v8 = vsub.f32 %v7709_v32, %v7015_v38  ;;  %v3882_v36 = vsel %vm3551_vm6, %v3788_v44, 0.0  ;;  %v3886_v9 = vsel %vm3551_vm6, %v3790_v33, 0.0 }
 0x5bd   :  { %v3797_v44 = vmul.f32 %v3733_v56, %v3733_v56  ;;  %v3738_v33 = vsub.f32 %v6711_v4, %v7015_v38  ;;  %v3741_v4 = vsub.f32 %v6767_v58, %v7015_v38  ;;  %v7717_v58 = vld [vmem:[#allocation85_spill] sm:$0xff] }
 0x5be   :  { %v3865_v29 = vadd.f32 %v3864_v11, %v3863_v40  ;;  %v3728_v40 = vsub.f32 %v7710_v57, %v7015_v38  ;;  %v3791_v55 = vmul.f32 %v3727_v8, %v3727_v8 }
 0x5bf   :  { %v3900_v57 = vsel %vm3551_vm6, %v3797_v44, 0.0 }
 0x5c0   :  { %v3867_v0 = vadd.f32 %v3866_v14, %v3865_v29  ;;  %v3729_v29 = vsub.f32 %v7687_v30, %v7015_v38  ;;  %v7711_v14 = vld [vmem:[#allocation32_spill] sm:$0xff]  ;;  %v3792_v43 = vmul.f32 %v3728_v40, %v3728_v40  ;;  %v7713_v30 = vld [vmem:[#allocation71_spill] sm:$0xff] }
 0x5c1   :  { %v3732_v6 = vsub.f32 %v7713_v30, %v7015_v38 }
 0x5c2   :  { %v3869_v46 = vadd.f32 %v3868_v50, %v3867_v0  ;;  %v3730_v0 = vsub.f32 %v7711_v14, %v7015_v38  ;;  %v3793_v59 = vmul.f32 %v3729_v29, %v3729_v29 }
 0x5c3   :  { %v3796_v16 = vmul.f32 %v3732_v6, %v3732_v6  ;;  %v3805_v6 = vmul.f32 %v3741_v4, %v3741_v4 }
 0x5c4   :  { %v3871_v20 = vadd.f32 %v3870_v15, %v3869_v46  ;;  %v7712_v46 = vld [vmem:[#allocation78_spill] sm:$0xff]  ;;  %v3888_v15 = vsel %vm3551_vm6, %v3791_v55, 0.0  ;;  %v3794_v53 = vmul.f32 %v3730_v0, %v3730_v0  ;;  %v3892_v62 = vsel %vm3551_vm6, %v3793_v59, 0.0 }
 0x5c5   :  { %v3731_v7 = vsub.f32 %v7712_v46, %v7015_v38  ;;  %v3898_v8 = vsel %vm3551_vm6, %v3796_v16, 0.0  ;;  %v3739_v55 = vsub.f32 %v7716_v19, %v7015_v38  ;;  %v3802_v0 = vmul.f32 %v3738_v33, %v3738_v33 }
 0x5c6   :  { %v3873_v21 = vadd.f32 %v3872_v35, %v3871_v20  ;;  %v3890_v35 = vsel %vm3551_vm6, %v3792_v43, 0.0  ;;  %v3742_v59 = vsub.f32 %v6784_v22, %v7015_v38  ;;  %v3745_v22 = vsub.f32 %v6835_v5, %v7015_v38  ;;  %v7718_v5 = vld [vmem:[#allocation81_spill] sm:$0xff] }
 0x5c7   :  { %v3795_v47 = vmul.f32 %v3731_v7, %v3731_v7 }
 0x5c8   :  { %v3875_v31 = vadd.f32 %v3874_v23, %v3873_v21  ;;  %v3806_v56 = vmul.f32 %v3742_v59, %v3742_v59 }
 0x5ca   :  { %v3877_v27 = vadd.f32 %v3876_v10, %v3875_v31  ;;  %v7714_v31 = vld [vmem:[#allocation80_spill] sm:$0xff]  ;;  %v3894_v10 = vsel %vm3551_vm6, %v3794_v53, 0.0 }
 0x5cb   :  { %v3734_v52 = vsub.f32 %v7714_v31, %v7015_v38  ;;  %v3916_v31 = vsel %vm3551_vm6, %v3805_v6, 0.0  ;;  %v3820_v6 = vmul.f32 %v3756_v34, %v3756_v34 }
 0x5cc   :  { %v3879_v41 = vadd.f32 %v3878_v18, %v3877_v27  ;;  %v3896_v18 = vsel %vm3551_vm6, %v3795_v47, 0.0 }
 0x5cd   :  { %v3798_v32 = vmul.f32 %v3734_v52, %v3734_v52 }
 0x5ce   :  { %v3881_v51 = vadd.f32 %v3880_v2, %v3879_v41  ;;  %v3737_v2 = vsub.f32 %v6699_v3, %v7015_v38  ;;  %v3740_v3 = vsub.f32 %v6750_v61, %v7015_v38  ;;  %v3743_v61 = vsub.f32 %v6801_v37, %v7015_v38 }
 0x5cf   :  { %v3746_v37 = vsub.f32 %v6852_v25, %v7015_v38  ;;  %v3749_v25 = vsub.f32 %v6903_v13, %v7015_v38  ;;  %v3752_v13 = vsub.f32 %v6954_v63, %v7015_v38  ;;  %v3755_v63 = vsub.f32 %v6991_v12, %v7015_v38 }
 0x5d0   :  { %v3883_v11 = vadd.f32 %v3882_v36, %v3881_v51  ;;  %v3799_v51 = vmul.f32 %v3735_v28, %v3735_v28  ;;  %v3800_v36 = vmul.f32 %v3736_v24, %v3736_v24  ;;  %v3809_v28 = vmul.f32 %v3745_v22, %v3745_v22 }
 0x5d1   :  { %v3810_v24 = vmul.f32 %v3746_v37, %v3746_v37 }
 0x5d2   :  { %v3885_v54 = vadd.f32 %v3884_v26, %v3883_v11  ;;  %v3902_v11 = vsel %vm3551_vm6, %v3798_v32, 0.0  ;;  %v3801_v26 = vmul.f32 %v3737_v2, %v3737_v2  ;;  %v3906_v43 = vsel %vm3551_vm6, %v3800_v36, 0.0 }
 0x5d3   :  { %v3924_v2 = vsel %vm3551_vm6, %v3809_v28, 0.0  ;;  %v3751_v36 = vsub.f32 %v6937_v48, %v7015_v38  ;;  %v3754_v48 = vsub.f32 %v6980_v17, %v7015_v38 }
 0x5d4   :  { %v3887_v50 = vadd.f32 %v3886_v9, %v3885_v54  ;;  %v3904_v54 = vsel %vm3551_vm6, %v3799_v51, 0.0  ;;  %v3908_v46 = vsel %vm3551_vm6, %v3801_v26, 0.0 }
 0x5d5   :  { %v3818_v59 = vmul.f32 %v3754_v48, %v3754_v48 }
 0x5d6   :  { %v3889_v20 = vadd.f32 %v3888_v15, %v3887_v50  ;;  %v3803_v50 = vmul.f32 %v3739_v55, %v3739_v55  ;;  %v3804_v15 = vmul.f32 %v3740_v3, %v3740_v3  ;;  %v3814_v55 = vmul.f32 %v3750_v49, %v3750_v49 }
 0x5d8   :  { %v3891_v21 = vadd.f32 %v3890_v35, %v3889_v20  ;;  %v3910_v20 = vsel %vm3551_vm6, %v3802_v0, 0.0  ;;  %v3912_v53 = vsel %vm3551_vm6, %v3803_v50, 0.0  ;;  %v3914_v47 = vsel %vm3551_vm6, %v3804_v15, 0.0 }
 0x5d9   :  { %v3817_v50 = vmul.f32 %v3753_v60, %v3753_v60 }
 0x5da   :  { %v3893_v23 = vadd.f32 %v3892_v62, %v3891_v21  ;;  %v3744_v21 = vsub.f32 %v7717_v58, %v7015_v38 }
 0x5db   :  { %v3940_v17 = vsel %vm3551_vm6, %v3817_v50, 0.0 }
 0x5dc   :  { %v3895_v27 = vadd.f32 %v3894_v10, %v3893_v23  ;;  %v3807_v23 = vmul.f32 %v3743_v61, %v3743_v61  ;;  %v3808_v16 = vmul.f32 %v3744_v21, %v3744_v21  ;;  %v3918_v10 = vsel %vm3551_vm6, %v3806_v56, 0.0 }
 0x5dd   :  { %v3946_v21 = vsel %vm3551_vm6, %v3820_v6, 0.0 }
 0x5de   :  { %v3897_v41 = vadd.f32 %v3896_v18, %v3895_v27  ;;  %v3920_v44 = vsel %vm3551_vm6, %v3807_v23, 0.0  ;;  %v3922_v32 = vsel %vm3551_vm6, %v3808_v16, 0.0 }
 0x5e0   :  { %v3899_v45 = vadd.f32 %v3898_v8, %v3897_v41  ;;  %v3748_v41 = vsub.f32 %v7718_v5, %v7015_v38 }
 0x5e2   :  { %v3901_v40 = vadd.f32 %v3900_v57, %v3899_v45  ;;  %v3811_v45 = vmul.f32 %v3747_v39, %v3747_v39  ;;  %v3812_v57 = vmul.f32 %v3748_v41, %v3748_v41 }
 0x5e4   :  { %v3903_v29 = vadd.f32 %v3902_v11, %v3901_v40  ;;  %v3926_v40 = vsel %vm3551_vm6, %v3810_v24, 0.0  ;;  %v3813_v11 = vmul.f32 %v3749_v25, %v3749_v25  ;;  %v3930_v26 = vsel %vm3551_vm6, %v3812_v57, 0.0 }
 0x5e6   :  { %v3905_v14 = vadd.f32 %v3904_v54, %v3903_v29  ;;  %v3928_v29 = vsel %vm3551_vm6, %v3811_v45, 0.0  ;;  %v3932_v3 = vsel %vm3551_vm6, %v3813_v11, 0.0 }
 0x5e8   :  { %v3907_v9 = vadd.f32 %v3906_v43, %v3905_v14  ;;  %v3815_v14 = vmul.f32 %v3751_v36, %v3751_v36  ;;  %v3816_v43 = vmul.f32 %v3752_v13, %v3752_v13 }
 0x5ea   :  { %v3909_v7 = vadd.f32 %v3908_v46, %v3907_v9  ;;  %v3934_v9 = vsel %vm3551_vm6, %v3814_v55, 0.0  ;;  %v3936_v46 = vsel %vm3551_vm6, %v3815_v14, 0.0  ;;  %v3938_v15 = vsel %vm3551_vm6, %v3816_v43, 0.0 }
 0x5ec   :  { %v3911_v30 = vadd.f32 %v3910_v20, %v3909_v7 }
 0x5ee   :  { %v3913_v35 = vadd.f32 %v3912_v53, %v3911_v30  ;;  %v3819_v30 = vmul.f32 %v3755_v63, %v3755_v63  ;;  %v3942_v53 = vsel %vm3551_vm6, %v3818_v59, 0.0 }
 0x5f0   :  { %v3915_v62 = vadd.f32 %v3914_v47, %v3913_v35  ;;  %v3944_v12 = vsel %vm3551_vm6, %v3819_v30, 0.0 }
 0x5f2   :  { %v3917_v52 = vadd.f32 %v3916_v31, %v3915_v62 }
 0x5f4   :  { %v3919_v27 = vadd.f32 %v3918_v10, %v3917_v52 }
 0x5f6   :  { %v3921_v18 = vadd.f32 %v3920_v44, %v3919_v27 }
 0x5f8   :  { %v3923_v8 = vadd.f32 %v3922_v32, %v3921_v18 }
 0x5fa   :  { %v3925_v51 = vadd.f32 %v3924_v2, %v3923_v8 }
 0x5fc   :  { %v3927_v33 = vadd.f32 %v3926_v40, %v3925_v51 }
 0x5fe   :  { %v3929_v19 = vadd.f32 %v3928_v29, %v3927_v33 }
 0x600   :  { %v3931_v54 = vadd.f32 %v3930_v26, %v3929_v19 }
 0x602   :  { %v3933_v0 = vadd.f32 %v3932_v3, %v3931_v54 }
 0x604   :  { %v3935_v4 = vadd.f32 %v3934_v9, %v3933_v0 }
 0x606   :  { %v3937_v7 = vadd.f32 %v3936_v46, %v3935_v4 }
 0x608   :  { %v3939_v20 = vadd.f32 %v3938_v15, %v3937_v7 }
 0x60a   :  { %v3941_v61 = vadd.f32 %v3940_v17, %v3939_v20 }
 0x60c   :  { %v3943_v35 = vadd.f32 %v3942_v53, %v3941_v61 }
 0x60e   :  { %v3945_v58 = vadd.f32 %v3944_v12, %v3943_v35 }
 0x610   :  { %v3947_v56 = vadd.f32 %v3946_v21, %v3945_v58 }
 0x612   :  { %v3948_v47 = vrot.slane %v3947_v56, 4 }
 0x614   :  { %v3949_v42 = vadd.f32 %v3948_v47, %v3947_v56 }
 0x616   :  { %v3950_v62 = vrot.slane %v3949_v42, 2 }
 0x618   :  { %v3951_v22 = vadd.f32 %v3950_v62, %v3949_v42 }
 0x61a   :  { %v3952_v23 = vrot.slane %v3951_v22, 1 }
 0x61c   :  { %v3953_v31 = vadd.f32 %v3952_v23, %v3951_v22 }
 0x61e   :  { %v3954_v52 = vmul.f32 %v3953_v31, %v7012_v1 }
 0x620   :  { %v3956_v37 = vsel %vm3955_vm8, %v7015_v38, %v3954_v52 }
 0x621   :  { %3958 = vst.msk [vmem:[#allocation3] sm:$0x3] %vm3957_vm9, %v3956_v37 }
 0x622   :  { %3971 = dma.vmem_to_hbm [thread:$0]  %s3967_s6, 32, %s3969_s9, [#allocation4]  }
 0x623   :  { %4367 = dma.done.wait [#allocation4], 32  }
 0x624   :  { %4368 = vsyncadd [#allocation4], 4294967264 }
 0x625   :  { %3978 = vsyncpa [#allocation4], 1 }

</bundles_post_ra>
